<compile_context>
chip_gen: v6e
topology: v6e:2x2x1
jax: 0.10.0
libtpu: 0.0.40
codegen_flags: <defaults>
</compile_context>

<pallas_src>
import functools

import jax
import jax.numpy as jnp
import numpy as np
from jax.experimental import pallas as pl
from jax.experimental.pallas import tpu as pltpu

LANE = 128                                  # TPU lane width; pad outputs to this
BRANCH_CHANNELS = (8, 16, 32, 64)           # scaled-down analogue of (48, 96, 192, 384)
IN_CHANNELS = sum(BRANCH_CHANNELS)          # 120 (scaled analogue of 720)
NUM_CLASSES = 7
PROJ_DIM = 32                               # scaled-down analogue of proj_dim=256
# 48 MiB fits under v7x's 64 MiB physical VMEM while raising the default scoped
# limit on v5e/v6e; actual working sets here are well under 2 MiB.
VMEM_LIMIT = 48 * 1024 * 1024


def _round_up(x, m):
    return ((x + m - 1) // m) * m


def bn_fold(gamma, beta, mean, var, eps=1e-5):
    scale = gamma / jnp.sqrt(var + eps)
    shift = beta - mean * scale
    return scale, shift


# ----------------------------------------------------------------------------
# Fused cls head: Conv3x3 (9-tap reduction, no im2col) + BN + ReLU
#                 + Dropout2d(eval=identity) + Conv1x1 (lane-padded to 128)
# One grid step per image; the whole padded NHWC slab sits in VMEM.
# ----------------------------------------------------------------------------
def _cls_head_kernel(x_ref, w3_ref, b3_ref, w1_ref, o_ref, *, H, W, C):
    # x_ref : (1, H+2, W+2, C) f32   zero-padded NHWC features for one image
    # w3_ref: (9, C, C)        bf16  per-tap conv3x3 weights, BN scale folded in
    # b3_ref: (1, C)           f32   conv_bias * bn_scale + bn_shift
    # w1_ref: (C, LANE)        bf16  conv1x1 weights, zero-padded 7 -> 128 lanes
    # o_ref : (1, H, W, LANE)  f32   lane-dense class logits
    acc = jnp.zeros((H * W, C), jnp.float32)
    for t in range(9):                       # im2col-free: 9 shifted VMEM views
        dh, dw = t // 3, t % 3
        xt = x_ref[0, dh:dh + H, dw:dw + W, :].reshape(H * W, C)
        acc = acc + jnp.dot(xt.astype(jnp.bfloat16), w3_ref[t],
                            preferred_element_type=jnp.float32)
    y = jnp.maximum(acc + b3_ref[...], 0.0)                     # fused BN + ReLU
    # TODO(synk): nn.Dropout2d(0.1) is identity in eval mode; training-time
    # random channel dropout is not modeled.
    seg = jnp.dot(y.astype(jnp.bfloat16), w1_ref[...],
                  preferred_element_type=jnp.float32)           # (H*W, LANE)
    o_ref[0] = seg.reshape(H, W, LANE)


def cls_head(feats, params):
    n, h, w, C = feats.shape
    scale, shift = bn_fold(*params['cls_bn'])
    # PyTorch (out, in, kh, kw) -> (kh*kw, in, out); fold BN scale into out cols.
    w3 = jnp.transpose(params['cls_conv3_w'], (2, 3, 1, 0)).reshape(9, C, C)
    w3 = (w3 * scale[None, None, :]).astype(jnp.bfloat16)
    b3 = (params['cls_conv3_b'] * scale + shift).reshape(1, C).astype(jnp.float32)
    w1 = jnp.zeros((C, LANE), jnp.float32).at[:, :NUM_CLASSES].set(
        params['cls_conv1_w'].T).astype(jnp.bfloat16)
    xpad = jnp.pad(feats, ((0, 0), (1, 1), (1, 1), (0, 0))).astype(jnp.float32)

    kernel = functools.partial(_cls_head_kernel, H=h, W=w, C=C)
    out = pl.pallas_call(
        kernel,
        out_shape=jax.ShapeDtypeStruct((n, h, w, LANE), jnp.float32),
        grid=(n,),
        in_specs=[
            pl.BlockSpec((1, h + 2, w + 2, C), lambda i: (i, 0, 0, 0)),
            pl.BlockSpec((9, C, C), lambda i: (0, 0, 0)),
            pl.BlockSpec((1, C), lambda i: (0, 0)),
            pl.BlockSpec((C, LANE), lambda i: (0, 0)),
        ],
        out_specs=pl.BlockSpec((1, h, w, LANE), lambda i: (i, 0, 0, 0)),
        compiler_params=pltpu.CompilerParams(
            dimension_semantics=("parallel",),
            vmem_limit_bytes=VMEM_LIMIT),
    )(xpad, w3, b3, w1)
    return out[..., :NUM_CLASSES]


# ----------------------------------------------------------------------------
# Fused proj head ('convmlp'): Conv1x1 + BN + ReLU + Conv1x1 + L2-normalize.
# Both weight matrices stay resident in VMEM; output is 128-lane padded.
# ----------------------------------------------------------------------------
def _proj_head_kernel(x_ref, w1_ref, b1_ref, w2_ref, b2_ref, o_ref):
    # x_ref : (tm, C)    bf16   pixels (rows) x in_channels (lanes)
    # w1_ref: (C, C)     bf16   conv1x1 weights with BN scale folded in
    # b1_ref: (1, C)     f32    folded bias
    # w2_ref: (C, LANE)  bf16   proj weights zero-padded 32 -> 128 lanes
    # b2_ref: (1, LANE)  f32    zero-padded bias
    z = jnp.dot(x_ref[...], w1_ref[...], preferred_element_type=jnp.float32)
    z = jnp.maximum(z + b1_ref[...], 0.0)                       # fused BN + ReLU
    e = jnp.dot(z.astype(jnp.bfloat16), w2_ref[...],
                preferred_element_type=jnp.float32) + b2_ref[...]
    # F.normalize(p=2, dim=1, eps=1e-12).  Padded lanes (>=32) are exactly zero
    # (zero weight columns, zero bias), so the 128-lane norm equals the real
    # 32-channel norm.  rsqrt(max(ssq, eps^2)) == 1 / max(||x||, eps).
    ssq = jnp.sum(e * e, axis=-1, keepdims=True)
    o_ref[...] = e * jax.lax.rsqrt(jnp.maximum(ssq, 1e-24))


def proj_head(m, params, *, tm=512):
    M, C = m.shape
    scale, shift = bn_fold(*params['proj_bn'])
    w1 = (params['proj_conv1_w'].T * scale[None, :]).astype(jnp.bfloat16)
    b1 = (params['proj_conv1_b'] * scale + shift).reshape(1, C).astype(jnp.float32)
    w2 = jnp.zeros((C, LANE), jnp.float32).at[:, :PROJ_DIM].set(
        params['proj_conv2_w'].T).astype(jnp.bfloat16)
    b2 = jnp.zeros((1, LANE), jnp.float32).at[0, :PROJ_DIM].set(params['proj_conv2_b'])

    tm = min(tm, _round_up(M, 8))
    Mp = _round_up(M, tm)
    x = m.astype(jnp.bfloat16)
    if Mp != M:
        x = jnp.pad(x, ((0, Mp - M), (0, 0)))

    out = pl.pallas_call(
        _proj_head_kernel,
        out_shape=jax.ShapeDtypeStruct((Mp, LANE), jnp.float32),
        grid=(Mp // tm,),
        in_specs=[
            pl.BlockSpec((tm, C), lambda i: (i, 0)),
            pl.BlockSpec((C, C), lambda i: (0, 0)),
            pl.BlockSpec((1, C), lambda i: (0, 0)),
            pl.BlockSpec((C, LANE), lambda i: (0, 0)),
            pl.BlockSpec((1, LANE), lambda i: (0, 0)),
        ],
        out_specs=pl.BlockSpec((tm, LANE), lambda i: (i, 0)),
        compiler_params=pltpu.CompilerParams(
            dimension_semantics=("parallel",),
            vmem_limit_bytes=VMEM_LIMIT),
    )(x, w1, b1, w2, b2)
    return out[:M, :PROJ_DIM]


# ----------------------------------------------------------------------------
# Separable bilinear resize (align_corners=True) via two lane-dense batched
# left-matmuls (H pass then W pass).  Interpolation matrices are numpy
# compile-time constants; these paths are tiny so they stay in f32.
# ----------------------------------------------------------------------------
def _interp_matrix(out_size, in_size):
    if in_size == 1:
        return jnp.ones((out_size, 1), jnp.float32)
    m = np.zeros((out_size, in_size), np.float32)
    if out_size == 1:
        m[0, 0] = 1.0
        return jnp.asarray(m)
    src = np.arange(out_size, dtype=np.float64) * (in_size - 1) / (out_size - 1)
    i0 = np.clip(np.floor(src).astype(np.int64), 0, in_size - 2)
    w1 = src - i0
    rows = np.arange(out_size)
    m[rows, i0] += (1.0 - w1)
    m[rows, i0 + 1] += w1
    return jnp.asarray(m, jnp.float32)


def _bmm_left_kernel(r_ref, x_ref, o_ref):
    o_ref[0] = jnp.dot(r_ref[...], x_ref[0], preferred_element_type=jnp.float32)


def bmm_left(r, x):
    """out[b] = r @ x[b];  r: (J, K), x: (B, K, L) -> (B, J, L)."""
    B, K, L = x.shape
    J = r.shape[0]
    return pl.pallas_call(
        _bmm_left_kernel,
        out_shape=jax.ShapeDtypeStruct((B, J, L), jnp.float32),
        grid=(B,),
        in_specs=[
            pl.BlockSpec((J, K), lambda i: (0, 0)),
            pl.BlockSpec((1, K, L), lambda i: (i, 0, 0)),
        ],
        out_specs=pl.BlockSpec((1, J, L), lambda i: (i, 0, 0)),
        compiler_params=pltpu.CompilerParams(dimension_semantics=("parallel",)),
    )(r.astype(jnp.float32), x.astype(jnp.float32))


def separable_resize(x, out_h, out_w):
    n, hi, wi, c = x.shape
    if (hi, wi) == (out_h, out_w):
        return x
    rh = _interp_matrix(out_h, hi)                               # (oh, hi)
    rw = _interp_matrix(out_w, wi)                               # (ow, wi)
    # H pass: contract hi; lane dim = wi*c (>= 128 for HRNet branch shapes).
    y = bmm_left(rh, x.reshape(n, hi, wi * c))                   # (n, oh, wi*c)
    y = y.reshape(n, out_h, wi, c).transpose(0, 2, 1, 3)         # (n, wi, oh, c)
    # W pass: contract wi; lane dim = oh*c.
    y = bmm_left(rw, y.reshape(n, wi, out_h * c))                # (n, ow, oh*c)
    return y.reshape(n, out_w, out_h, c).transpose(0, 2, 1, 3)   # (n, oh, ow, c)


# ----------------------------------------------------------------------------
# Synthetic backbone stem (stand-in) + parameters.
# ----------------------------------------------------------------------------
def avg_pool_nhwc(x, factor):
    n, h, w, c = x.shape
    return x.reshape(n, h // factor, factor, w // factor, factor, c).mean(axis=(2, 4))


def init_params(key):
    keys = list(jax.random.split(key, 32))
    it = iter(keys)

    def nrm(shape, std=0.05):
        return std * jax.random.normal(next(it), shape, jnp.float32)

    C = IN_CHANNELS
    p = {}
    # synthetic backbone stem: per-branch 1x1 conv (3 -> C_s) after pooling
    p['backbone_w'] = [nrm((3, c)) for c in BRANCH_CHANNELS]
    p['backbone_b'] = [nrm((c,)) for c in BRANCH_CHANNELS]

    # cls_head: Conv3x3(C,C) + BNReLU(C) + Dropout2d(0.1) + Conv1x1(C, classes, bias=False)
    p['cls_conv3_w'] = nrm((C, C, 3, 3))          # PyTorch (out, in, kh, kw)
    p['cls_conv3_b'] = nrm((C,))
    p['cls_bn'] = (1.0 + nrm((C,)), nrm((C,)), nrm((C,)), 0.5 + jnp.abs(nrm((C,))))
    p['cls_conv1_w'] = nrm((NUM_CLASSES, C))      # (out, in)

    # proj_head (convmlp): Conv1x1(C,C) + BNReLU(C) + Conv1x1(C, proj_dim), then F.normalize
    p['proj_conv1_w'] = nrm((C, C))
    p['proj_conv1_b'] = nrm((C,))
    p['proj_bn'] = (1.0 + nrm((C,)), nrm((C,)), nrm((C,)), 0.5 + jnp.abs(nrm((C,))))
    p['proj_conv2_w'] = nrm((PROJ_DIM, C))
    p['proj_conv2_b'] = nrm((PROJ_DIM,))
    return p


# ----------------------------------------------------------------------------
# Forward pass (mirrors HRNet_W48_CONTRAST.forward, eval mode).
# ----------------------------------------------------------------------------
def hrnet_w48_contrast_forward(params, x_nchw):
    x = jnp.transpose(x_nchw, (0, 2, 3, 1)).astype(jnp.float32)   # NCHW -> NHWC

    # ---- backbone (synthetic stand-in, strides 4/8/16/32).  K=3 1x1 convs are
    # pure launch overhead as Pallas kernels, so they stay in XLA (einsum). ----
    feats_ms = []
    for s in range(4):
        xp = avg_pool_nhwc(x, 4 * (2 ** s))
        y = jnp.einsum('nhwc,cd->nhwd', xp, params['backbone_w'][s])
        feats_ms.append(jax.nn.relu(y + params['backbone_b'][s]))

    # ---- head: separable bilinear upsample to x[0] resolution, channel concat ----
    n, h, w, _ = feats_ms[0].shape
    feats = jnp.concatenate(
        [feats_ms[0]] + [separable_resize(f, h, w) for f in feats_ms[1:]], axis=-1)

    # ---- cls_head: fused Conv3x3 + BN + ReLU + Dropout(eval=id) + Conv1x1 ----
    seg = cls_head(feats, params)                                  # (n, h, w, 7)
    seg = jnp.transpose(seg, (0, 3, 1, 2))                         # back to NCHW

    # ---- proj_head: fused Conv1x1 + BN + ReLU + Conv1x1 + L2-normalize ----
    emb = proj_head(feats.reshape(n * h * w, IN_CHANNELS), params)  # (M, 32)
    emb = jnp.transpose(emb.reshape(n, h, w, PROJ_DIM), (0, 3, 1, 2))

    return {'seg': seg, 'embed': emb}


if __name__ == "__main__":
    key = jax.random.PRNGKey(0)
    k_params, k_x = jax.random.split(key)
    params = init_params(k_params)

    # small image consistent with HRNet (stride-4 high-res branch): (N, 3, 64, 64)
    x = jax.random.normal(k_x, (2, 3, 64, 64), jnp.float32)

    fwd = jax.jit(hrnet_w48_contrast_forward)
    out = fwd(params, x)
    jax.block_until_ready(out)

    assert out['seg'].shape == (2, NUM_CLASSES, 16, 16), out['seg'].shape
    assert out['embed'].shape == (2, PROJ_DIM, 16, 16), out['embed'].shape
    # embeddings are L2-normalized along the channel axis
    norms = jnp.sqrt(jnp.sum(out['embed'].astype(jnp.float32) ** 2, axis=1))
    assert bool(jnp.allclose(norms, 1.0, atol=1e-3)), "embed not L2-normalized"

    print("KERNEL_OK")
</pallas_src>

<mosaic_0001>
module attributes {stable_mosaic.version = 11 : i64} {
  func.func @_bmm_left_kernel(%arg0: i32, %arg1: memref<16x8xf32, #tpu.memory_space<vmem>>, %arg2: memref<1x8x128xf32, #tpu.memory_space<vmem>>, %arg3: memref<1x16x128xf32, #tpu.memory_space<vmem>>) attributes {dimension_semantics = [#tpu.dimension_semantics<parallel>], iteration_bounds = array<i64: 2>, scalar_prefetch = 0 : i64, scratch_operands = 0 : i64, tpu.core_type = #tpu.core_type<tc>, window_params = [{pipeline_mode = #tpu.pipeline_mode<synchronous>, transform_indices = @transform_0, window_bounds = array<i64: 16, 8>}, {transform_indices = @transform_1, window_bounds = array<i64: 1, 8, 128>}, {transform_indices = @transform_2, window_bounds = array<i64: 1, 16, 128>}]} {
    %c0 = arith.constant 0 : index
    %c0_0 = arith.constant 0 : index
    %0 = vector.load %arg1[%c0, %c0_0] : memref<16x8xf32, #tpu.memory_space<vmem>>, vector<16x8xf32>
    %c0_1 = arith.constant 0 : index
    %c0_2 = arith.constant 0 : index
    %c0_3 = arith.constant 0 : index
    %1 = vector.load %arg2[%c0_1, %c0_2, %c0_3] : memref<1x8x128xf32, #tpu.memory_space<vmem>>, vector<1x8x128xf32>
    %2 = vector.shape_cast %1 : vector<1x8x128xf32> to vector<8x128xf32>
    %cst = arith.constant dense<0.000000e+00> : vector<16x128xf32>
    %3 = tpu.matmul %0, %2, %cst {dimension_numbers = #tpu.dot_dimension_numbers<[1], [0], [0], [1], [0, 0, 1, 1], [], []>} : vector<16x8xf32>, vector<8x128xf32>, vector<16x128xf32> -> vector<16x128xf32>
    %c0_4 = arith.constant 0 : index
    %c0_5 = arith.constant 0 : index
    %c0_6 = arith.constant 0 : index
    %4 = vector.load %arg3[%c0_4, %c0_5, %c0_6] : memref<1x16x128xf32, #tpu.memory_space<vmem>>, vector<1x16x128xf32>
    %5 = vector.shape_cast %4 : vector<1x16x128xf32> to vector<16x128xf32>
    %6 = vector.shape_cast %3 : vector<16x128xf32> to vector<1x16x128xf32>
    tpu.vector_store %arg3[%c0_4, %c0_5, %c0_6], %6 {strides = array<i32>} : memref<1x16x128xf32, #tpu.memory_space<vmem>>, vector<1x16x128xf32>,
    return
  }
  func.func @transform_0(%arg0: i32) -> (i32, i32) {
    %c0_i32 = arith.constant 0 : i32
    %c0_i32_0 = arith.constant 0 : i32
    %c0_i32_1 = arith.constant 0 : i32
    return %c0_i32, %c0_i32_0 : i32, i32
  }
  func.func @transform_1(%arg0: i32) -> (i32, i32, i32) {
    %c0_i32 = arith.constant 0 : i32
    %c0_i32_0 = arith.constant 0 : i32
    %c0_i32_1 = arith.constant 0 : i32
    return %arg0, %c0_i32, %c0_i32_0 : i32, i32, i32
  }
  func.func @transform_2(%arg0: i32) -> (i32, i32, i32) {
    %c0_i32 = arith.constant 0 : i32
    %c0_i32_0 = arith.constant 0 : i32
    %c0_i32_1 = arith.constant 0 : i32
    return %arg0, %c0_i32, %c0_i32_0 : i32, i32, i32
  }
}

module attributes {stable_mosaic.version = 11 : i64} {
  func.func @_bmm_left_kernel(%arg0: i32, %arg1: memref<16x8xf32, #tpu.memory_space<vmem>>, %arg2: memref<1x8x256xf32, #tpu.memory_space<vmem>>, %arg3: memref<1x16x256xf32, #tpu.memory_space<vmem>>) attributes {dimension_semantics = [#tpu.dimension_semantics<parallel>], iteration_bounds = array<i64: 2>, scalar_prefetch = 0 : i64, scratch_operands = 0 : i64, tpu.core_type = #tpu.core_type<tc>, window_params = [{pipeline_mode = #tpu.pipeline_mode<synchronous>, transform_indices = @transform_0, window_bounds = array<i64: 16, 8>}, {transform_indices = @transform_1, window_bounds = array<i64: 1, 8, 256>}, {transform_indices = @transform_2, window_bounds = array<i64: 1, 16, 256>}]} {
    %c0 = arith.constant 0 : index
    %c0_0 = arith.constant 0 : index
    %0 = vector.load %arg1[%c0, %c0_0] : memref<16x8xf32, #tpu.memory_space<vmem>>, vector<16x8xf32>
    %c0_1 = arith.constant 0 : index
    %c0_2 = arith.constant 0 : index
    %c0_3 = arith.constant 0 : index
    %1 = vector.load %arg2[%c0_1, %c0_2, %c0_3] : memref<1x8x256xf32, #tpu.memory_space<vmem>>, vector<1x8x256xf32>
    %2 = vector.shape_cast %1 : vector<1x8x256xf32> to vector<8x256xf32>
    %cst = arith.constant dense<0.000000e+00> : vector<16x256xf32>
    %3 = tpu.matmul %0, %2, %cst {dimension_numbers = #tpu.dot_dimension_numbers<[1], [0], [0], [1], [0, 0, 1, 1], [], []>} : vector<16x8xf32>, vector<8x256xf32>, vector<16x256xf32> -> vector<16x256xf32>
    %c0_4 = arith.constant 0 : index
    %c0_5 = arith.constant 0 : index
    %c0_6 = arith.constant 0 : index
    %4 = vector.load %arg3[%c0_4, %c0_5, %c0_6] : memref<1x16x256xf32, #tpu.memory_space<vmem>>, vector<1x16x256xf32>
    %5 = vector.shape_cast %4 : vector<1x16x256xf32> to vector<16x256xf32>
    %6 = vector.shape_cast %3 : vector<16x256xf32> to vector<1x16x256xf32>
    tpu.vector_store %arg3[%c0_4, %c0_5, %c0_6], %6 {strides = array<i32>} : memref<1x16x256xf32, #tpu.memory_space<vmem>>, vector<1x16x256xf32>,
    return
  }
  func.func @transform_0(%arg0: i32) -> (i32, i32) {
    %c0_i32 = arith.constant 0 : i32
    %c0_i32_0 = arith.constant 0 : i32
    %c0_i32_1 = arith.constant 0 : i32
    return %c0_i32, %c0_i32_0 : i32, i32
  }
  func.func @transform_1(%arg0: i32) -> (i32, i32, i32) {
    %c0_i32 = arith.constant 0 : i32
    %c0_i32_0 = arith.constant 0 : i32
    %c0_i32_1 = arith.constant 0 : i32
    return %arg0, %c0_i32, %c0_i32_0 : i32, i32, i32
  }
  func.func @transform_2(%arg0: i32) -> (i32, i32, i32) {
    %c0_i32 = arith.constant 0 : i32
    %c0_i32_0 = arith.constant 0 : i32
    %c0_i32_1 = arith.constant 0 : i32
    return %arg0, %c0_i32, %c0_i32_0 : i32, i32, i32
  }
}

module attributes {stable_mosaic.version = 11 : i64} {
  func.func @_bmm_left_kernel(%arg0: i32, %arg1: memref<16x4xf32, #tpu.memory_space<vmem>>, %arg2: memref<1x4x128xf32, #tpu.memory_space<vmem>>, %arg3: memref<1x16x128xf32, #tpu.memory_space<vmem>>) attributes {dimension_semantics = [#tpu.dimension_semantics<parallel>], iteration_bounds = array<i64: 2>, scalar_prefetch = 0 : i64, scratch_operands = 0 : i64, tpu.core_type = #tpu.core_type<tc>, window_params = [{pipeline_mode = #tpu.pipeline_mode<synchronous>, transform_indices = @transform_0, window_bounds = array<i64: 16, 4>}, {transform_indices = @transform_1, window_bounds = array<i64: 1, 4, 128>}, {transform_indices = @transform_2, window_bounds = array<i64: 1, 16, 128>}]} {
    %c0 = arith.constant 0 : index
    %c0_0 = arith.constant 0 : index
    %0 = vector.load %arg1[%c0, %c0_0] : memref<16x4xf32, #tpu.memory_space<vmem>>, vector<16x4xf32>
    %c0_1 = arith.constant 0 : index
    %c0_2 = arith.constant 0 : index
    %c0_3 = arith.constant 0 : index
    %1 = vector.load %arg2[%c0_1, %c0_2, %c0_3] : memref<1x4x128xf32, #tpu.memory_space<vmem>>, vector<1x4x128xf32>
    %2 = vector.shape_cast %1 : vector<1x4x128xf32> to vector<4x128xf32>
    %cst = arith.constant dense<0.000000e+00> : vector<16x128xf32>
    %3 = tpu.matmul %0, %2, %cst {dimension_numbers = #tpu.dot_dimension_numbers<[1], [0], [0], [1], [0, 0, 1, 1], [], []>} : vector<16x4xf32>, vector<4x128xf32>, vector<16x128xf32> -> vector<16x128xf32>
    %c0_4 = arith.constant 0 : index
    %c0_5 = arith.constant 0 : index
    %c0_6 = arith.constant 0 : index
    %4 = vector.load %arg3[%c0_4, %c0_5, %c0_6] : memref<1x16x128xf32, #tpu.memory_space<vmem>>, vector<1x16x128xf32>
    %5 = vector.shape_cast %4 : vector<1x16x128xf32> to vector<16x128xf32>
    %6 = vector.shape_cast %3 : vector<16x128xf32> to vector<1x16x128xf32>
    tpu.vector_store %arg3[%c0_4, %c0_5, %c0_6], %6 {strides = array<i32>} : memref<1x16x128xf32, #tpu.memory_space<vmem>>, vector<1x16x128xf32>,
    return
  }
  func.func @transform_0(%arg0: i32) -> (i32, i32) {
    %c0_i32 = arith.constant 0 : i32
    %c0_i32_0 = arith.constant 0 : i32
    %c0_i32_1 = arith.constant 0 : i32
    return %c0_i32, %c0_i32_0 : i32, i32
  }
  func.func @transform_1(%arg0: i32) -> (i32, i32, i32) {
    %c0_i32 = arith.constant 0 : i32
    %c0_i32_0 = arith.constant 0 : i32
    %c0_i32_1 = arith.constant 0 : i32
    return %arg0, %c0_i32, %c0_i32_0 : i32, i32, i32
  }
  func.func @transform_2(%arg0: i32) -> (i32, i32, i32) {
    %c0_i32 = arith.constant 0 : i32
    %c0_i32_0 = arith.constant 0 : i32
    %c0_i32_1 = arith.constant 0 : i32
    return %arg0, %c0_i32, %c0_i32_0 : i32, i32, i32
  }
}

module attributes {stable_mosaic.version = 11 : i64} {
  func.func @_bmm_left_kernel(%arg0: i32, %arg1: memref<16x4xf32, #tpu.memory_space<vmem>>, %arg2: memref<1x4x512xf32, #tpu.memory_space<vmem>>, %arg3: memref<1x16x512xf32, #tpu.memory_space<vmem>>) attributes {dimension_semantics = [#tpu.dimension_semantics<parallel>], iteration_bounds = array<i64: 2>, scalar_prefetch = 0 : i64, scratch_operands = 0 : i64, tpu.core_type = #tpu.core_type<tc>, window_params = [{pipeline_mode = #tpu.pipeline_mode<synchronous>, transform_indices = @transform_0, window_bounds = array<i64: 16, 4>}, {transform_indices = @transform_1, window_bounds = array<i64: 1, 4, 512>}, {transform_indices = @transform_2, window_bounds = array<i64: 1, 16, 512>}]} {
    %c0 = arith.constant 0 : index
    %c0_0 = arith.constant 0 : index
    %0 = vector.load %arg1[%c0, %c0_0] : memref<16x4xf32, #tpu.memory_space<vmem>>, vector<16x4xf32>
    %c0_1 = arith.constant 0 : index
    %c0_2 = arith.constant 0 : index
    %c0_3 = arith.constant 0 : index
    %1 = vector.load %arg2[%c0_1, %c0_2, %c0_3] : memref<1x4x512xf32, #tpu.memory_space<vmem>>, vector<1x4x512xf32>
    %2 = vector.shape_cast %1 : vector<1x4x512xf32> to vector<4x512xf32>
    %cst = arith.constant dense<0.000000e+00> : vector<16x512xf32>
    %3 = tpu.matmul %0, %2, %cst {dimension_numbers = #tpu.dot_dimension_numbers<[1], [0], [0], [1], [0, 0, 1, 1], [], []>} : vector<16x4xf32>, vector<4x512xf32>, vector<16x512xf32> -> vector<16x512xf32>
    %c0_4 = arith.constant 0 : index
    %c0_5 = arith.constant 0 : index
    %c0_6 = arith.constant 0 : index
    %4 = vector.load %arg3[%c0_4, %c0_5, %c0_6] : memref<1x16x512xf32, #tpu.memory_space<vmem>>, vector<1x16x512xf32>
    %5 = vector.shape_cast %4 : vector<1x16x512xf32> to vector<16x512xf32>
    %6 = vector.shape_cast %3 : vector<16x512xf32> to vector<1x16x512xf32>
    tpu.vector_store %arg3[%c0_4, %c0_5, %c0_6], %6 {strides = array<i32>} : memref<1x16x512xf32, #tpu.memory_space<vmem>>, vector<1x16x512xf32>,
    return
  }
  func.func @transform_0(%arg0: i32) -> (i32, i32) {
    %c0_i32 = arith.constant 0 : i32
    %c0_i32_0 = arith.constant 0 : i32
    %c0_i32_1 = arith.constant 0 : i32
    return %c0_i32, %c0_i32_0 : i32, i32
  }
  func.func @transform_1(%arg0: i32) -> (i32, i32, i32) {
    %c0_i32 = arith.constant 0 : i32
    %c0_i32_0 = arith.constant 0 : i32
    %c0_i32_1 = arith.constant 0 : i32
    return %arg0, %c0_i32, %c0_i32_0 : i32, i32, i32
  }
  func.func @transform_2(%arg0: i32) -> (i32, i32, i32) {
    %c0_i32 = arith.constant 0 : i32
    %c0_i32_0 = arith.constant 0 : i32
    %c0_i32_1 = arith.constant 0 : i32
    return %arg0, %c0_i32, %c0_i32_0 : i32, i32, i32
  }
}

module attributes {stable_mosaic.version = 11 : i64} {
  func.func @_bmm_left_kernel(%arg0: i32, %arg1: memref<16x2xf32, #tpu.memory_space<vmem>>, %arg2: memref<1x2x128xf32, #tpu.memory_space<vmem>>, %arg3: memref<1x16x128xf32, #tpu.memory_space<vmem>>) attributes {dimension_semantics = [#tpu.dimension_semantics<parallel>], iteration_bounds = array<i64: 2>, scalar_prefetch = 0 : i64, scratch_operands = 0 : i64, tpu.core_type = #tpu.core_type<tc>, window_params = [{pipeline_mode = #tpu.pipeline_mode<synchronous>, transform_indices = @transform_0, window_bounds = array<i64: 16, 2>}, {transform_indices = @transform_1, window_bounds = array<i64: 1, 2, 128>}, {transform_indices = @transform_2, window_bounds = array<i64: 1, 16, 128>}]} {
    %c0 = arith.constant 0 : index
    %c0_0 = arith.constant 0 : index
    %0 = vector.load %arg1[%c0, %c0_0] : memref<16x2xf32, #tpu.memory_space<vmem>>, vector<16x2xf32>
    %c0_1 = arith.constant 0 : index
    %c0_2 = arith.constant 0 : index
    %c0_3 = arith.constant 0 : index
    %1 = vector.load %arg2[%c0_1, %c0_2, %c0_3] : memref<1x2x128xf32, #tpu.memory_space<vmem>>, vector<1x2x128xf32>
    %2 = vector.shape_cast %1 : vector<1x2x128xf32> to vector<2x128xf32>
    %cst = arith.constant dense<0.000000e+00> : vector<16x128xf32>
    %3 = tpu.matmul %0, %2, %cst {dimension_numbers = #tpu.dot_dimension_numbers<[1], [0], [0], [1], [0, 0, 1, 1], [], []>} : vector<16x2xf32>, vector<2x128xf32>, vector<16x128xf32> -> vector<16x128xf32>
    %c0_4 = arith.constant 0 : index
    %c0_5 = arith.constant 0 : index
    %c0_6 = arith.constant 0 : index
    %4 = vector.load %arg3[%c0_4, %c0_5, %c0_6] : memref<1x16x128xf32, #tpu.memory_space<vmem>>, vector<1x16x128xf32>
    %5 = vector.shape_cast %4 : vector<1x16x128xf32> to vector<16x128xf32>
    %6 = vector.shape_cast %3 : vector<16x128xf32> to vector<1x16x128xf32>
    tpu.vector_store %arg3[%c0_4, %c0_5, %c0_6], %6 {strides = array<i32>} : memref<1x16x128xf32, #tpu.memory_space<vmem>>, vector<1x16x128xf32>,
    return
  }
  func.func @transform_0(%arg0: i32) -> (i32, i32) {
    %c0_i32 = arith.constant 0 : i32
    %c0_i32_0 = arith.constant 0 : i32
    %c0_i32_1 = arith.constant 0 : i32
    return %c0_i32, %c0_i32_0 : i32, i32
  }
  func.func @transform_1(%arg0: i32) -> (i32, i32, i32) {
    %c0_i32 = arith.constant 0 : i32
    %c0_i32_0 = arith.constant 0 : i32
    %c0_i32_1 = arith.constant 0 : i32
    return %arg0, %c0_i32, %c0_i32_0 : i32, i32, i32
  }
  func.func @transform_2(%arg0: i32) -> (i32, i32, i32) {
    %c0_i32 = arith.constant 0 : i32
    %c0_i32_0 = arith.constant 0 : i32
    %c0_i32_1 = arith.constant 0 : i32
    return %arg0, %c0_i32, %c0_i32_0 : i32, i32, i32
  }
}

module attributes {stable_mosaic.version = 11 : i64} {
  func.func @_bmm_left_kernel(%arg0: i32, %arg1: memref<16x2xf32, #tpu.memory_space<vmem>>, %arg2: memref<1x2x1024xf32, #tpu.memory_space<vmem>>, %arg3: memref<1x16x1024xf32, #tpu.memory_space<vmem>>) attributes {dimension_semantics = [#tpu.dimension_semantics<parallel>], iteration_bounds = array<i64: 2>, scalar_prefetch = 0 : i64, scratch_operands = 0 : i64, tpu.core_type = #tpu.core_type<tc>, window_params = [{pipeline_mode = #tpu.pipeline_mode<synchronous>, transform_indices = @transform_0, window_bounds = array<i64: 16, 2>}, {transform_indices = @transform_1, window_bounds = array<i64: 1, 2, 1024>}, {transform_indices = @transform_2, window_bounds = array<i64: 1, 16, 1024>}]} {
    %c0 = arith.constant 0 : index
    %c0_0 = arith.constant 0 : index
    %0 = vector.load %arg1[%c0, %c0_0] : memref<16x2xf32, #tpu.memory_space<vmem>>, vector<16x2xf32>
    %c0_1 = arith.constant 0 : index
    %c0_2 = arith.constant 0 : index
    %c0_3 = arith.constant 0 : index
    %1 = vector.load %arg2[%c0_1, %c0_2, %c0_3] : memref<1x2x1024xf32, #tpu.memory_space<vmem>>, vector<1x2x1024xf32>
    %2 = vector.shape_cast %1 : vector<1x2x1024xf32> to vector<2x1024xf32>
    %cst = arith.constant dense<0.000000e+00> : vector<16x1024xf32>
    %3 = tpu.matmul %0, %2, %cst {dimension_numbers = #tpu.dot_dimension_numbers<[1], [0], [0], [1], [0, 0, 1, 1], [], []>} : vector<16x2xf32>, vector<2x1024xf32>, vector<16x1024xf32> -> vector<16x1024xf32>
    %c0_4 = arith.constant 0 : index
    %c0_5 = arith.constant 0 : index
    %c0_6 = arith.constant 0 : index
    %4 = vector.load %arg3[%c0_4, %c0_5, %c0_6] : memref<1x16x1024xf32, #tpu.memory_space<vmem>>, vector<1x16x1024xf32>
    %5 = vector.shape_cast %4 : vector<1x16x1024xf32> to vector<16x1024xf32>
    %6 = vector.shape_cast %3 : vector<16x1024xf32> to vector<1x16x1024xf32>
    tpu.vector_store %arg3[%c0_4, %c0_5, %c0_6], %6 {strides = array<i32>} : memref<1x16x1024xf32, #tpu.memory_space<vmem>>, vector<1x16x1024xf32>,
    return
  }
  func.func @transform_0(%arg0: i32) -> (i32, i32) {
    %c0_i32 = arith.constant 0 : i32
    %c0_i32_0 = arith.constant 0 : i32
    %c0_i32_1 = arith.constant 0 : i32
    return %c0_i32, %c0_i32_0 : i32, i32
  }
  func.func @transform_1(%arg0: i32) -> (i32, i32, i32) {
    %c0_i32 = arith.constant 0 : i32
    %c0_i32_0 = arith.constant 0 : i32
    %c0_i32_1 = arith.constant 0 : i32
    return %arg0, %c0_i32, %c0_i32_0 : i32, i32, i32
  }
  func.func @transform_2(%arg0: i32) -> (i32, i32, i32) {
    %c0_i32 = arith.constant 0 : i32
    %c0_i32_0 = arith.constant 0 : i32
    %c0_i32_1 = arith.constant 0 : i32
    return %arg0, %c0_i32, %c0_i32_0 : i32, i32, i32
  }
}

module attributes {stable_mosaic.version = 11 : i64} {
  func.func @_proj_head_kernel(%arg0: i32, %arg1: memref<512x120xbf16, #tpu.memory_space<vmem>>, %arg2: memref<120x120xbf16, #tpu.memory_space<vmem>>, %arg3: memref<1x120xf32, #tpu.memory_space<vmem>>, %arg4: memref<120x128xbf16, #tpu.memory_space<vmem>>, %arg5: memref<1x128xf32, #tpu.memory_space<vmem>>, %arg6: memref<512x128xf32, #tpu.memory_space<vmem>>) attributes {dimension_semantics = [#tpu.dimension_semantics<parallel>], iteration_bounds = array<i64: 1>, scalar_prefetch = 0 : i64, scratch_operands = 0 : i64, tpu.core_type = #tpu.core_type<tc>, window_params = [{transform_indices = @transform_0, window_bounds = array<i64: 512, 120>}, {pipeline_mode = #tpu.pipeline_mode<synchronous>, transform_indices = @transform_1, window_bounds = array<i64: 120, 120>}, {pipeline_mode = #tpu.pipeline_mode<synchronous>, transform_indices = @transform_2, window_bounds = array<i64: 1, 120>}, {pipeline_mode = #tpu.pipeline_mode<synchronous>, transform_indices = @transform_3, window_bounds = array<i64: 120, 128>}, {pipeline_mode = #tpu.pipeline_mode<synchronous>, transform_indices = @transform_4, window_bounds = array<i64: 1, 128>}, {transform_indices = @transform_5, window_bounds = array<i64: 512, 128>}]} {
    %c0 = arith.constant 0 : index
    %c0_0 = arith.constant 0 : index
    %0 = vector.load %arg1[%c0, %c0_0] : memref<512x120xbf16, #tpu.memory_space<vmem>>, vector<512x120xbf16>
    %c0_1 = arith.constant 0 : index
    %c0_2 = arith.constant 0 : index
    %1 = vector.load %arg2[%c0_1, %c0_2] : memref<120x120xbf16, #tpu.memory_space<vmem>>, vector<120x120xbf16>
    %cst = arith.constant dense<0.000000e+00> : vector<512x120xf32>
    %2 = tpu.matmul %0, %1, %cst {dimension_numbers = #tpu.dot_dimension_numbers<[1], [0], [0], [1], [0, 0, 1, 1], [], []>} : vector<512x120xbf16>, vector<120x120xbf16>, vector<512x120xf32> -> vector<512x120xf32>
    %c0_3 = arith.constant 0 : index
    %c0_4 = arith.constant 0 : index
    %3 = vector.load %arg3[%c0_3, %c0_4] : memref<1x120xf32, #tpu.memory_space<vmem>>, vector<1x120xf32>
    %4 = vector.broadcast %3 : vector<1x120xf32> to vector<512x120xf32>
    %5 = arith.addf %2, %4 : vector<512x120xf32>
    %cst_5 = arith.constant 0.000000e+00 : f32
    %6 = vector.broadcast %cst_5 : f32 to vector<512x120xf32>
    %7 = arith.maximumf %5, %6 : vector<512x120xf32>
    %8 = arith.truncf %7 : vector<512x120xf32> to vector<512x120xbf16>
    %c0_6 = arith.constant 0 : index
    %c0_7 = arith.constant 0 : index
    %9 = vector.load %arg4[%c0_6, %c0_7] : memref<120x128xbf16, #tpu.memory_space<vmem>>, vector<120x128xbf16>
    %cst_8 = arith.constant dense<0.000000e+00> : vector<512x128xf32>
    %10 = tpu.matmul %8, %9, %cst_8 {dimension_numbers = #tpu.dot_dimension_numbers<[1], [0], [0], [1], [0, 0, 1, 1], [], []>} : vector<512x120xbf16>, vector<120x128xbf16>, vector<512x128xf32> -> vector<512x128xf32>
    %c0_9 = arith.constant 0 : index
    %c0_10 = arith.constant 0 : index
    %11 = vector.load %arg5[%c0_9, %c0_10] : memref<1x128xf32, #tpu.memory_space<vmem>>, vector<1x128xf32>
    %12 = vector.broadcast %11 : vector<1x128xf32> to vector<512x128xf32>
    %13 = arith.addf %10, %12 : vector<512x128xf32>
    %14 = arith.mulf %13, %13 : vector<512x128xf32>
    %cst_11 = arith.constant dense<0.000000e+00> : vector<512xf32>
    %15 = vector.multi_reduction <add>, %14, %cst_11 [1] : vector<512x128xf32> to vector<512xf32>
    %16 = vector.shape_cast %15 : vector<512xf32> to vector<512x1xf32>
    %cst_12 = arith.constant 1.000000e-24 : f32
    %17 = vector.broadcast %cst_12 : f32 to vector<512x1xf32>
    %18 = arith.maximumf %16, %17 : vector<512x1xf32>
    %19 = math.rsqrt %18 : vector<512x1xf32>
    %20 = vector.broadcast %19 : vector<512x1xf32> to vector<512x128xf32>
    %21 = arith.mulf %13, %20 : vector<512x128xf32>
    %c0_13 = arith.constant 0 : index
    %c0_14 = arith.constant 0 : index
    %22 = vector.load %arg6[%c0_13, %c0_14] : memref<512x128xf32, #tpu.memory_space<vmem>>, vector<512x128xf32>
    tpu.vector_store %arg6[%c0_13, %c0_14], %21 {strides = array<i32>} : memref<512x128xf32, #tpu.memory_space<vmem>>, vector<512x128xf32>,
    return
  }
  func.func @transform_0(%arg0: i32) -> (i32, i32) {
    %c0_i32 = arith.constant 0 : i32
    %c0_i32_0 = arith.constant 0 : i32
    return %arg0, %c0_i32 : i32, i32
  }
  func.func @transform_1(%arg0: i32) -> (i32, i32) {
    %c0_i32 = arith.constant 0 : i32
    %c0_i32_0 = arith.constant 0 : i32
    %c0_i32_1 = arith.constant 0 : i32
    return %c0_i32, %c0_i32_0 : i32, i32
  }
  func.func @transform_2(%arg0: i32) -> (i32, i32) {
    %c0_i32 = arith.constant 0 : i32
    %c0_i32_0 = arith.constant 0 : i32
    %c0_i32_1 = arith.constant 0 : i32
    return %c0_i32, %c0_i32_0 : i32, i32
  }
  func.func @transform_3(%arg0: i32) -> (i32, i32) {
    %c0_i32 = arith.constant 0 : i32
    %c0_i32_0 = arith.constant 0 : i32
    %c0_i32_1 = arith.constant 0 : i32
    return %c0_i32, %c0_i32_0 : i32, i32
  }
  func.func @transform_4(%arg0: i32) -> (i32, i32) {
    %c0_i32 = arith.constant 0 : i32
    %c0_i32_0 = arith.constant 0 : i32
    %c0_i32_1 = arith.constant 0 : i32
    return %c0_i32, %c0_i32_0 : i32, i32
  }
  func.func @transform_5(%arg0: i32) -> (i32, i32) {
    %c0_i32 = arith.constant 0 : i32
    %c0_i32_0 = arith.constant 0 : i32
    return %arg0, %c0_i32 : i32, i32
  }
}

module attributes {stable_mosaic.version = 11 : i64} {
  func.func @_cls_head_kernel(%arg0: i32, %arg1: memref<1x18x18x120xf32, #tpu.memory_space<vmem>>, %arg2: memref<9x120x120xbf16, #tpu.memory_space<vmem>>, %arg3: memref<1x120xf32, #tpu.memory_space<vmem>>, %arg4: memref<120x128xbf16, #tpu.memory_space<vmem>>, %arg5: memref<1x16x16x128xf32, #tpu.memory_space<vmem>>) attributes {dimension_semantics = [#tpu.dimension_semantics<parallel>], iteration_bounds = array<i64: 2>, scalar_prefetch = 0 : i64, scratch_operands = 0 : i64, tpu.core_type = #tpu.core_type<tc>, window_params = [{transform_indices = @transform_0, window_bounds = array<i64: 1, 18, 18, 120>}, {pipeline_mode = #tpu.pipeline_mode<synchronous>, transform_indices = @transform_1, window_bounds = array<i64: 9, 120, 120>}, {pipeline_mode = #tpu.pipeline_mode<synchronous>, transform_indices = @transform_2, window_bounds = array<i64: 1, 120>}, {pipeline_mode = #tpu.pipeline_mode<synchronous>, transform_indices = @transform_3, window_bounds = array<i64: 120, 128>}, {transform_indices = @transform_4, window_bounds = array<i64: 1, 16, 16, 128>}]} {
    %cst = arith.constant 0.000000e+00 : f32
    %0 = vector.broadcast %cst : f32 to vector<256x120xf32>
    %c0 = arith.constant 0 : index
    %c0_0 = arith.constant 0 : index
    %c0_1 = arith.constant 0 : index
    %c0_2 = arith.constant 0 : index
    %1 = vector.load %arg1[%c0, %c0_0, %c0_1, %c0_2] : memref<1x18x18x120xf32, #tpu.memory_space<vmem>>, vector<1x16x16x120xf32>
    %2 = vector.shape_cast %1 : vector<1x16x16x120xf32> to vector<16x16x120xf32>
    %3 = vector.shape_cast %2 : vector<16x16x120xf32> to vector<256x120xf32>
    %4 = arith.truncf %3 : vector<256x120xf32> to vector<256x120xbf16>
    %c0_3 = arith.constant 0 : index
    %c0_4 = arith.constant 0 : index
    %c0_5 = arith.constant 0 : index
    %5 = vector.load %arg2[%c0_3, %c0_4, %c0_5] : memref<9x120x120xbf16, #tpu.memory_space<vmem>>, vector<1x120x120xbf16>
    %6 = vector.shape_cast %5 : vector<1x120x120xbf16> to vector<120x120xbf16>
    %cst_6 = arith.constant dense<0.000000e+00> : vector<256x120xf32>
    %7 = tpu.matmul %4, %6, %cst_6 {dimension_numbers = #tpu.dot_dimension_numbers<[1], [0], [0], [1], [0, 0, 1, 1], [], []>} : vector<256x120xbf16>, vector<120x120xbf16>, vector<256x120xf32> -> vector<256x120xf32>
    %8 = arith.addf %0, %7 : vector<256x120xf32>
    %c0_7 = arith.constant 0 : index
    %c0_8 = arith.constant 0 : index
    %c1 = arith.constant 1 : index
    %c0_9 = arith.constant 0 : index
    %9 = vector.load %arg1[%c0_7, %c0_8, %c1, %c0_9] : memref<1x18x18x120xf32, #tpu.memory_space<vmem>>, vector<1x16x16x120xf32>
    %10 = vector.shape_cast %9 : vector<1x16x16x120xf32> to vector<16x16x120xf32>
    %11 = vector.shape_cast %10 : vector<16x16x120xf32> to vector<256x120xf32>
    %12 = arith.truncf %11 : vector<256x120xf32> to vector<256x120xbf16>
    %c1_10 = arith.constant 1 : index
    %c0_11 = arith.constant 0 : index
    %c0_12 = arith.constant 0 : index
    %13 = vector.load %arg2[%c1_10, %c0_11, %c0_12] : memref<9x120x120xbf16, #tpu.memory_space<vmem>>, vector<1x120x120xbf16>
    %14 = vector.shape_cast %13 : vector<1x120x120xbf16> to vector<120x120xbf16>
    %cst_13 = arith.constant dense<0.000000e+00> : vector<256x120xf32>
    %15 = tpu.matmul %12, %14, %cst_13 {dimension_numbers = #tpu.dot_dimension_numbers<[1], [0], [0], [1], [0, 0, 1, 1], [], []>} : vector<256x120xbf16>, vector<120x120xbf16>, vector<256x120xf32> -> vector<256x120xf32>
    %16 = arith.addf %8, %15 : vector<256x120xf32>
    %c0_14 = arith.constant 0 : index
    %c0_15 = arith.constant 0 : index
    %c2 = arith.constant 2 : index
    %c0_16 = arith.constant 0 : index
    %17 = vector.load %arg1[%c0_14, %c0_15, %c2, %c0_16] : memref<1x18x18x120xf32, #tpu.memory_space<vmem>>, vector<1x16x16x120xf32>
    %18 = vector.shape_cast %17 : vector<1x16x16x120xf32> to vector<16x16x120xf32>
    %19 = vector.shape_cast %18 : vector<16x16x120xf32> to vector<256x120xf32>
    %20 = arith.truncf %19 : vector<256x120xf32> to vector<256x120xbf16>
    %c2_17 = arith.constant 2 : index
    %c0_18 = arith.constant 0 : index
    %c0_19 = arith.constant 0 : index
    %21 = vector.load %arg2[%c2_17, %c0_18, %c0_19] : memref<9x120x120xbf16, #tpu.memory_space<vmem>>, vector<1x120x120xbf16>
    %22 = vector.shape_cast %21 : vector<1x120x120xbf16> to vector<120x120xbf16>
    %cst_20 = arith.constant dense<0.000000e+00> : vector<256x120xf32>
    %23 = tpu.matmul %20, %22, %cst_20 {dimension_numbers = #tpu.dot_dimension_numbers<[1], [0], [0], [1], [0, 0, 1, 1], [], []>} : vector<256x120xbf16>, vector<120x120xbf16>, vector<256x120xf32> -> vector<256x120xf32>
    %24 = arith.addf %16, %23 : vector<256x120xf32>
    %c0_21 = arith.constant 0 : index
    %c1_22 = arith.constant 1 : index
    %c0_23 = arith.constant 0 : index
    %c0_24 = arith.constant 0 : index
    %25 = vector.load %arg1[%c0_21, %c1_22, %c0_23, %c0_24] : memref<1x18x18x120xf32, #tpu.memory_space<vmem>>, vector<1x16x16x120xf32>
    %26 = vector.shape_cast %25 : vector<1x16x16x120xf32> to vector<16x16x120xf32>
    %27 = vector.shape_cast %26 : vector<16x16x120xf32> to vector<256x120xf32>
    %28 = arith.truncf %27 : vector<256x120xf32> to vector<256x120xbf16>
    %c3 = arith.constant 3 : index
    %c0_25 = arith.constant 0 : index
    %c0_26 = arith.constant 0 : index
    %29 = vector.load %arg2[%c3, %c0_25, %c0_26] : memref<9x120x120xbf16, #tpu.memory_space<vmem>>, vector<1x120x120xbf16>
    %30 = vector.shape_cast %29 : vector<1x120x120xbf16> to vector<120x120xbf16>
    %cst_27 = arith.constant dense<0.000000e+00> : vector<256x120xf32>
    %31 = tpu.matmul %28, %30, %cst_27 {dimension_numbers = #tpu.dot_dimension_numbers<[1], [0], [0], [1], [0, 0, 1, 1], [], []>} : vector<256x120xbf16>, vector<120x120xbf16>, vector<256x120xf32> -> vector<256x120xf32>
    %32 = arith.addf %24, %31 : vector<256x120xf32>
    %c0_28 = arith.constant 0 : index
    %c1_29 = arith.constant 1 : index
    %c1_30 = arith.constant 1 : index
    %c0_31 = arith.constant 0 : index
    %33 = vector.load %arg1[%c0_28, %c1_29, %c1_30, %c0_31] : memref<1x18x18x120xf32, #tpu.memory_space<vmem>>, vector<1x16x16x120xf32>
    %34 = vector.shape_cast %33 : vector<1x16x16x120xf32> to vector<16x16x120xf32>
    %35 = vector.shape_cast %34 : vector<16x16x120xf32> to vector<256x120xf32>
    %36 = arith.truncf %35 : vector<256x120xf32> to vector<256x120xbf16>
    %c4 = arith.constant 4 : index
    %c0_32 = arith.constant 0 : index
    %c0_33 = arith.constant 0 : index
    %37 = vector.load %arg2[%c4, %c0_32, %c0_33] : memref<9x120x120xbf16, #tpu.memory_space<vmem>>, vector<1x120x120xbf16>
    %38 = vector.shape_cast %37 : vector<1x120x120xbf16> to vector<120x120xbf16>
    %cst_34 = arith.constant dense<0.000000e+00> : vector<256x120xf32>
    %39 = tpu.matmul %36, %38, %cst_34 {dimension_numbers = #tpu.dot_dimension_numbers<[1], [0], [0], [1], [0, 0, 1, 1], [], []>} : vector<256x120xbf16>, vector<120x120xbf16>, vector<256x120xf32> -> vector<256x120xf32>
    %40 = arith.addf %32, %39 : vector<256x120xf32>
    %c0_35 = arith.constant 0 : index
    %c1_36 = arith.constant 1 : index
    %c2_37 = arith.constant 2 : index
    %c0_38 = arith.constant 0 : index
    %41 = vector.load %arg1[%c0_35, %c1_36, %c2_37, %c0_38] : memref<1x18x18x120xf32, #tpu.memory_space<vmem>>, vector<1x16x16x120xf32>
    %42 = vector.shape_cast %41 : vector<1x16x16x120xf32> to vector<16x16x120xf32>
    %43 = vector.shape_cast %42 : vector<16x16x120xf32> to vector<256x120xf32>
    %44 = arith.truncf %43 : vector<256x120xf32> to vector<256x120xbf16>
    %c5 = arith.constant 5 : index
    %c0_39 = arith.constant 0 : index
    %c0_40 = arith.constant 0 : index
    %45 = vector.load %arg2[%c5, %c0_39, %c0_40] : memref<9x120x120xbf16, #tpu.memory_space<vmem>>, vector<1x120x120xbf16>
    %46 = vector.shape_cast %45 : vector<1x120x120xbf16> to vector<120x120xbf16>
    %cst_41 = arith.constant dense<0.000000e+00> : vector<256x120xf32>
    %47 = tpu.matmul %44, %46, %cst_41 {dimension_numbers = #tpu.dot_dimension_numbers<[1], [0], [0], [1], [0, 0, 1, 1], [], []>} : vector<256x120xbf16>, vector<120x120xbf16>, vector<256x120xf32> -> vector<256x120xf32>
    %48 = arith.addf %40, %47 : vector<256x120xf32>
    %c0_42 = arith.constant 0 : index
    %c2_43 = arith.constant 2 : index
    %c0_44 = arith.constant 0 : index
    %c0_45 = arith.constant 0 : index
    %49 = vector.load %arg1[%c0_42, %c2_43, %c0_44, %c0_45] : memref<1x18x18x120xf32, #tpu.memory_space<vmem>>, vector<1x16x16x120xf32>
    %50 = vector.shape_cast %49 : vector<1x16x16x120xf32> to vector<16x16x120xf32>
    %51 = vector.shape_cast %50 : vector<16x16x120xf32> to vector<256x120xf32>
    %52 = arith.truncf %51 : vector<256x120xf32> to vector<256x120xbf16>
    %c6 = arith.constant 6 : index
    %c0_46 = arith.constant 0 : index
    %c0_47 = arith.constant 0 : index
    %53 = vector.load %arg2[%c6, %c0_46, %c0_47] : memref<9x120x120xbf16, #tpu.memory_space<vmem>>, vector<1x120x120xbf16>
    %54 = vector.shape_cast %53 : vector<1x120x120xbf16> to vector<120x120xbf16>
    %cst_48 = arith.constant dense<0.000000e+00> : vector<256x120xf32>
    %55 = tpu.matmul %52, %54, %cst_48 {dimension_numbers = #tpu.dot_dimension_numbers<[1], [0], [0], [1], [0, 0, 1, 1], [], []>} : vector<256x120xbf16>, vector<120x120xbf16>, vector<256x120xf32> -> vector<256x120xf32>
    %56 = arith.addf %48, %55 : vector<256x120xf32>
    %c0_49 = arith.constant 0 : index
    %c2_50 = arith.constant 2 : index
    %c1_51 = arith.constant 1 : index
    %c0_52 = arith.constant 0 : index
    %57 = vector.load %arg1[%c0_49, %c2_50, %c1_51, %c0_52] : memref<1x18x18x120xf32, #tpu.memory_space<vmem>>, vector<1x16x16x120xf32>
    %58 = vector.shape_cast %57 : vector<1x16x16x120xf32> to vector<16x16x120xf32>
    %59 = vector.shape_cast %58 : vector<16x16x120xf32> to vector<256x120xf32>
    %60 = arith.truncf %59 : vector<256x120xf32> to vector<256x120xbf16>
    %c7 = arith.constant 7 : index
    %c0_53 = arith.constant 0 : index
    %c0_54 = arith.constant 0 : index
    %61 = vector.load %arg2[%c7, %c0_53, %c0_54] : memref<9x120x120xbf16, #tpu.memory_space<vmem>>, vector<1x120x120xbf16>
    %62 = vector.shape_cast %61 : vector<1x120x120xbf16> to vector<120x120xbf16>
    %cst_55 = arith.constant dense<0.000000e+00> : vector<256x120xf32>
    %63 = tpu.matmul %60, %62, %cst_55 {dimension_numbers = #tpu.dot_dimension_numbers<[1], [0], [0], [1], [0, 0, 1, 1], [], []>} : vector<256x120xbf16>, vector<120x120xbf16>, vector<256x120xf32> -> vector<256x120xf32>
    %64 = arith.addf %56, %63 : vector<256x120xf32>
    %c0_56 = arith.constant 0 : index
    %c2_57 = arith.constant 2 : index
    %c2_58 = arith.constant 2 : index
    %c0_59 = arith.constant 0 : index
    %65 = vector.load %arg1[%c0_56, %c2_57, %c2_58, %c0_59] : memref<1x18x18x120xf32, #tpu.memory_space<vmem>>, vector<1x16x16x120xf32>
    %66 = vector.shape_cast %65 : vector<1x16x16x120xf32> to vector<16x16x120xf32>
    %67 = vector.shape_cast %66 : vector<16x16x120xf32> to vector<256x120xf32>
    %68 = arith.truncf %67 : vector<256x120xf32> to vector<256x120xbf16>
    %c8 = arith.constant 8 : index
    %c0_60 = arith.constant 0 : index
    %c0_61 = arith.constant 0 : index
    %69 = vector.load %arg2[%c8, %c0_60, %c0_61] : memref<9x120x120xbf16, #tpu.memory_space<vmem>>, vector<1x120x120xbf16>
    %70 = vector.shape_cast %69 : vector<1x120x120xbf16> to vector<120x120xbf16>
    %cst_62 = arith.constant dense<0.000000e+00> : vector<256x120xf32>
    %71 = tpu.matmul %68, %70, %cst_62 {dimension_numbers = #tpu.dot_dimension_numbers<[1], [0], [0], [1], [0, 0, 1, 1], [], []>} : vector<256x120xbf16>, vector<120x120xbf16>, vector<256x120xf32> -> vector<256x120xf32>
    %72 = arith.addf %64, %71 : vector<256x120xf32>
    %c0_63 = arith.constant 0 : index
    %c0_64 = arith.constant 0 : index
    %73 = vector.load %arg3[%c0_63, %c0_64] : memref<1x120xf32, #tpu.memory_space<vmem>>, vector<1x120xf32>
    %74 = vector.broadcast %73 : vector<1x120xf32> to vector<256x120xf32>
    %75 = arith.addf %72, %74 : vector<256x120xf32>
    %cst_65 = arith.constant 0.000000e+00 : f32
    %76 = vector.broadcast %cst_65 : f32 to vector<256x120xf32>
    %77 = arith.maximumf %75, %76 : vector<256x120xf32>
    %78 = arith.truncf %77 : vector<256x120xf32> to vector<256x120xbf16>
    %c0_66 = arith.constant 0 : index
    %c0_67 = arith.constant 0 : index
    %79 = vector.load %arg4[%c0_66, %c0_67] : memref<120x128xbf16, #tpu.memory_space<vmem>>, vector<120x128xbf16>
    %cst_68 = arith.constant dense<0.000000e+00> : vector<256x128xf32>
    %80 = tpu.matmul %78, %79, %cst_68 {dimension_numbers = #tpu.dot_dimension_numbers<[1], [0], [0], [1], [0, 0, 1, 1], [], []>} : vector<256x120xbf16>, vector<120x128xbf16>, vector<256x128xf32> -> vector<256x128xf32>
    %81 = vector.shape_cast %80 : vector<256x128xf32> to vector<16x16x128xf32>
    %c0_69 = arith.constant 0 : index
    %c0_70 = arith.constant 0 : index
    %c0_71 = arith.constant 0 : index
    %c0_72 = arith.constant 0 : index
    %82 = vector.load %arg5[%c0_69, %c0_70, %c0_71, %c0_72] : memref<1x16x16x128xf32, #tpu.memory_space<vmem>>, vector<1x16x16x128xf32>
    %83 = vector.shape_cast %82 : vector<1x16x16x128xf32> to vector<16x16x128xf32>
    %84 = vector.shape_cast %81 : vector<16x16x128xf32> to vector<1x16x16x128xf32>
    tpu.vector_store %arg5[%c0_69, %c0_70, %c0_71, %c0_72], %84 {strides = array<i32>} : memref<1x16x16x128xf32, #tpu.memory_space<vmem>>, vector<1x16x16x128xf32>,
    return
  }
  func.func @transform_0(%arg0: i32) -> (i32, i32, i32, i32) {
    %c0_i32 = arith.constant 0 : i32
    %c0_i32_0 = arith.constant 0 : i32
    %c0_i32_1 = arith.constant 0 : i32
    %c0_i32_2 = arith.constant 0 : i32
    return %arg0, %c0_i32, %c0_i32_0, %c0_i32_1 : i32, i32, i32, i32
  }
  func.func @transform_1(%arg0: i32) -> (i32, i32, i32) {
    %c0_i32 = arith.constant 0 : i32
    %c0_i32_0 = arith.constant 0 : i32
    %c0_i32_1 = arith.constant 0 : i32
    %c0_i32_2 = arith.constant 0 : i32
    return %c0_i32, %c0_i32_0, %c0_i32_1 : i32, i32, i32
  }
  func.func @transform_2(%arg0: i32) -> (i32, i32) {
    %c0_i32 = arith.constant 0 : i32
    %c0_i32_0 = arith.constant 0 : i32
    %c0_i32_1 = arith.constant 0 : i32
    return %c0_i32, %c0_i32_0 : i32, i32
  }
  func.func @transform_3(%arg0: i32) -> (i32, i32) {
    %c0_i32 = arith.constant 0 : i32
    %c0_i32_0 = arith.constant 0 : i32
    %c0_i32_1 = arith.constant 0 : i32
    return %c0_i32, %c0_i32_0 : i32, i32
  }
  func.func @transform_4(%arg0: i32) -> (i32, i32, i32, i32) {
    %c0_i32 = arith.constant 0 : i32
    %c0_i32_0 = arith.constant 0 : i32
    %c0_i32_1 = arith.constant 0 : i32
    %c0_i32_2 = arith.constant 0 : i32
    return %arg0, %c0_i32, %c0_i32_0, %c0_i32_1 : i32, i32, i32, i32
  }
}

</mosaic_0001>

<bundles_post_ra>
// kernel: hrnet_w48_contrast_forward.8
= control target key start
LH: loop header
LB: loop body
LE: loop exit
PB: predicated region body
PF: predicated region fallthrough
CT: control target
= control target key end

     0   :  { %s335_s9 = smov 0   ;;  %s352_s0 = inlined_call_operand.vmem [shape: f32[16,8], index: 0, kind: input, shape index: {}]   ;;  %s353_s1 = inlined_call_operand.vmem [shape: f32[2,8,128], index: 1, kind: input, shape index: {}]   ;;  %s354_s2 = inlined_call_operand.vmem [shape: f32[2,16,128], index: 2, kind: output, shape index: {}]  }
   0x1 LB: > { %s283_s10 = sadd.s32 4294967295, %s318_s9   ;;  %p287_p0 = scmp.ge.s32.totalorder %s318_s9, 1  ;;  %s318_s9 = sphi %s335_s9, %s12_s9  }
   0x2   : > { %p111_p1 = scmp.lt.s32.totalorder %s318_s9, 3 }
   0x4   : > { %p112_p2 = pnand %p287_p0, %p111_p1 }
   0x5   : > { %p132_p3 = scmp.lt.s32.totalorder (!%p112_p2), %s283_s10, 1 }
   0x6   : > { %115 = sbr.rel (%p112_p2) target bundleno = 213 (0xd5), region = 28 }
   0xb   : > { %v141_v0 = vld [vmem:[%s352_s0] sm:$0xff]  ;;  %vm144_vm0 = vcmask 64512   ;;  %s356_s10 = smov (!%p132_p3, %s283_s10), 1  ;;  %v142_v2 = vld [vmem:[%s352_s0 + $0x8] sm:$0xff] }
   0xc   : > { %301 = vmatprep.mubr.msk.f32.mxu0 %vm144_vm0, %v141_v0  ;;  %s288_s13 = sshll.u32 %s356_s10, 3  ;;  %s295_s19 = sshll.u32 %s356_s10, 4 }
   0xd   : > { %s135_s16 = scalar_lea.vmem %s353_s1, %s288_s13  ;;  %s140_s22 = scalar_lea.vmem %s354_s2, %s295_s19 }
   0xe   : > { %v143_v1 = vld [vmem:[%s135_s16] sm:$0xff] }
   0xf   : > { %299 = vmatprep.subr.mxu0 %v143_v1 }
  0x10   : > { %300 = vmatpush3.msra.mxu0 %v143_v1 }
  0x11   : > { %302 = vmatmul.mubr.msk.f32.vlgmr.msra.gmra.mxu0 %vm144_vm0, %v142_v2 }
  0xd1   : > { %v303_v3 = vpop.f32.mrf.mxu0 }
  0xd2   : > { %227 = vst [vmem:[%s140_s22 + $0x8] sm:$0xff] %v303_v3 }
  0xd3   : > { %v217_v4 = vpop.f32.mrf.mxu0 }
  0xd4   : > { %226 = vst [vmem:[%s140_s22] sm:$0xff] %v217_v4 }
  0xd5 PF: > { %s12_s9 = sadd.s32 1, %s318_s9  }
  0xd6   : > { %p9_p4 = scmp.ge.s32.totalorder %s12_s9, 4  }
  0xd8   :  { %11 = sbr.rel (!%p9_p4) target bundleno = 1 (0x1), region = 58 }

// kernel: hrnet_w48_contrast_forward.9
= control target key start
LH: loop header
LB: loop body
LE: loop exit
PB: predicated region body
PF: predicated region fallthrough
CT: control target
= control target key end

     0   :  { %s341_s9 = smov 0   ;;  %s364_s0 = inlined_call_operand.vmem [shape: f32[16,8], index: 0, kind: input, shape index: {}]   ;;  %s365_s1 = inlined_call_operand.vmem [shape: f32[2,8,256], index: 1, kind: input, shape index: {}]   ;;  %s366_s2 = inlined_call_operand.vmem [shape: f32[2,16,256], index: 2, kind: output, shape index: {}]  }
   0x1 LB: > { %s291_s10 = sadd.s32 4294967295, %s323_s9   ;;  %p295_p0 = scmp.ge.s32.totalorder %s323_s9, 1  ;;  %s323_s9 = sphi %s341_s9, %s12_s9  }
   0x2   : > { %p112_p1 = scmp.lt.s32.totalorder %s323_s9, 3 }
   0x4   : > { %p113_p2 = pnand %p295_p0, %p112_p1 }
   0x5   : > { %p134_p3 = scmp.lt.s32.totalorder (!%p113_p2), %s291_s10, 1 }
   0x6   : > { %116 = sbr.rel (%p113_p2) target bundleno = 213 (0xd5), region = 28 }
   0xb   : > { %v325_v0 = vmov 0.0   ;;  %s368_s10 = smov (!%p134_p3, %s291_s10), 1  ;;  %v144_v1 = vld [vmem:[%s364_s0] sm:$0xff]  ;;  %vm148_vm0 = vcmask 64512   ;;  %v145_v4 = vld [vmem:[%s364_s0 + $0x8] sm:$0xff] }
   0xc   : > { %219 = vmatprep.mubr.f32.mxu0 %v325_v0  ;;  %225 = vmatprep.mubr.f32.mxu1 %v325_v0  ;;  %s304_s11 = sshll.u32 %s368_s10, 4  ;;  %s305_s19 = sshll.u32 %s368_s10, 5 }
   0xd   : > { %s138_s14 = scalar_lea.vmem %s365_s1, %s304_s11  ;;  %s143_s22 = scalar_lea.vmem %s366_s2, %s305_s19 }
   0xe   : > { %v147_v2 = vld [vmem:[%s138_s14 + $0x8] sm:$0xff]  ;;  %v146_v3 = vld [vmem:[%s138_s14] sm:$0xff] }
   0xf   : > { %185 = vmatprep.subr.mxu0 %v147_v2  ;;  %306 = vmatprep.subr.mxu1 %v147_v2 }
  0x10   : > { %186 = vmatpush1.msra.mxu0 %v146_v3  ;;  %307 = vmatpush1.msra.mxu1 %v146_v3 }
  0x11   : > { %300 = vmatmul.mubr.msk.f32.vlgmr.msra.gmra.mxu0 %vm148_vm0, %v144_v1  ;;  %301 = vmatmul.mubr.msk.f32.vlgmr.msra.gmra.mxu1 %vm148_vm0, %v145_v4 }
  0xd1   : > { %v221_v5 = vpop.f32.mrf.mxu0  ;;  %v227_v6 = vpop.f32.mrf.mxu1 }
  0xd2   : > { %232 = vst [vmem:[%s143_s22] sm:$0xff] %v221_v5  ;;  %234 = vst [vmem:[%s143_s22 + $0x10] sm:$0xff] %v227_v6 }
  0xd3   : > { %v223_v7 = vpop.f32.mrf.mxu0  ;;  %v229_v8 = vpop.f32.mrf.mxu1 }
  0xd4   : > { %233 = vst [vmem:[%s143_s22 + $0x8] sm:$0xff] %v223_v7  ;;  %235 = vst [vmem:[%s143_s22 + $0x18] sm:$0xff] %v229_v8 }
  0xd5 PF: > { %s12_s9 = sadd.s32 1, %s323_s9  }
  0xd6   : > { %p9_p4 = scmp.ge.s32.totalorder %s12_s9, 4  }
  0xd8   :  { %11 = sbr.rel (!%p9_p4) target bundleno = 1 (0x1), region = 58 }

// kernel: hrnet_w48_contrast_forward.10
= control target key start
LH: loop header
LB: loop body
LE: loop exit
PB: predicated region body
PF: predicated region fallthrough
CT: control target
= control target key end

     0   :  { %s340_s9 = smov 0   ;;  %s357_s0 = inlined_call_operand.vmem [shape: f32[16,4], index: 0, kind: input, shape index: {}]   ;;  %s358_s1 = inlined_call_operand.vmem [shape: f32[2,4,128], index: 1, kind: input, shape index: {}]   ;;  %s359_s2 = inlined_call_operand.vmem [shape: f32[2,16,128], index: 2, kind: output, shape index: {}]  }
   0x1 LB: > { %s287_s10 = sadd.s32 4294967295, %s323_s9   ;;  %p291_p0 = scmp.ge.s32.totalorder %s323_s9, 1  ;;  %s323_s9 = sphi %s340_s9, %s12_s9  }
   0x2   : > { %p111_p1 = scmp.lt.s32.totalorder %s323_s9, 3 }
   0x4   : > { %p112_p2 = pnand %p291_p0, %p111_p1 }
   0x5   : > { %p132_p3 = scmp.lt.s32.totalorder (!%p112_p2), %s287_s10, 1 }
   0x6   : > { %115 = sbr.rel (%p112_p2) target bundleno = 213 (0xd5), region = 28 }
   0xb   : > { %v141_v0 = vld [vmem:[%s357_s0] sm:$0xff]  ;;  %vm144_vm0 = vcmask 31744   ;;  %s361_s10 = smov (!%p132_p3, %s287_s10), 1  ;;  %vm151_vm1 = vcmask 1043456   ;;  %v142_v2 = vld [vmem:[%s357_s0 + $0x8] sm:$0xff] }
   0xc   : > { %306 = vmatprep.mubr.msk.f32.mxu0 %vm144_vm0, %v141_v0  ;;  %s292_s13 = sshll.u32 %s361_s10, 2  ;;  %s300_s19 = sshll.u32 %s361_s10, 4 }
   0xd   : > { %s135_s16 = scalar_lea.vmem %s358_s1, %s292_s13  ;;  %s140_s22 = scalar_lea.vmem %s359_s2, %s300_s19 }
   0xe   : > { %v143_v1 = vld [vmem:[%s135_s16] sm:$0xf] }
   0xf   : > { %304 = vmatprep.subr.msk.mxu0 %vm151_vm1, %v143_v1 }
  0x10   : > { %305 = vmatpush3.msk.msra.mxu0 %vm151_vm1, %v143_v1 }
  0x11   : > { %307 = vmatmul.mubr.msk.f32.vlgmr.msra.gmra.mxu0 %vm144_vm0, %v142_v2 }
  0xd1   : > { %v308_v3 = vpop.f32.mrf.mxu0 }
  0xd2   : > { %231 = vst [vmem:[%s140_s22 + $0x8] sm:$0xff] %v308_v3 }
  0xd3   : > { %v221_v4 = vpop.f32.mrf.mxu0 }
  0xd4   : > { %230 = vst [vmem:[%s140_s22] sm:$0xff] %v221_v4 }
  0xd5 PF: > { %s12_s9 = sadd.s32 1, %s323_s9  }
  0xd6   : > { %p9_p4 = scmp.ge.s32.totalorder %s12_s9, 4  }
  0xd8   :  { %11 = sbr.rel (!%p9_p4) target bundleno = 1 (0x1), region = 58 }

// kernel: hrnet_w48_contrast_forward.11
= control target key start
LH: loop header
LB: loop body
LE: loop exit
PB: predicated region body
PF: predicated region fallthrough
CT: control target
= control target key end

     0   :  { %s441_s9 = smov 0   ;;  %s464_s0 = inlined_call_operand.vmem [shape: f32[16,4], index: 0, kind: input, shape index: {}]   ;;  %s465_s1 = inlined_call_operand.vmem [shape: f32[2,4,512], index: 1, kind: input, shape index: {}]   ;;  %s466_s2 = inlined_call_operand.vmem [shape: f32[2,16,512], index: 2, kind: output, shape index: {}]  }
   0x1 LB: > { %s385_s10 = sadd.s32 4294967295, %s423_s9   ;;  %p389_p0 = scmp.ge.s32.totalorder %s423_s9, 1  ;;  %s423_s9 = sphi %s441_s9, %s12_s9  }
   0x2   : > { %p112_p1 = scmp.lt.s32.totalorder %s423_s9, 3 }
   0x4   : > { %p113_p2 = pnand %p389_p0, %p112_p1 }
   0x5   : > { %p134_p3 = scmp.lt.s32.totalorder (!%p113_p2), %s385_s10, 1 }
   0x6   : > { %116 = sbr.rel (%p113_p2) target bundleno = 219 (0xdb), region = 28 }
   0xb   : > { %v425_v0 = vmov 0.0   ;;  %s468_s10 = smov (!%p134_p3, %s385_s10), 1  ;;  %vm159_vm0 = vcmask 1043456   ;;  %v144_v5 = vld [vmem:[%s464_s0] sm:$0xff]  ;;  %vm152_vm1 = vcmask 31744   ;;  %v145_v6 = vld [vmem:[%s464_s0 + $0x8] sm:$0xff] }
   0xc   : > { %232 = vmatprep.mubr.f32.mxu0 %v425_v0  ;;  %309 = vmatprep.mubr.f32.mxu1 %v425_v0  ;;  %s404_s11 = sshll.u32 %s468_s10, 4  ;;  %s405_s19 = sshll.u32 %s468_s10, 6 }
   0xd   : > { %s138_s14 = scalar_lea.vmem %s465_s1, %s404_s11  ;;  %s143_s22 = scalar_lea.vmem %s466_s2, %s405_s19 }
   0xe   : > { %v146_v1 = vld [vmem:[%s138_s14] sm:$0xff]  ;;  %v147_v2 = vld [vmem:[%s138_s14 + $0x8] sm:$0xff] }
   0xf   : > { %v150_v3 = vcombine.high %v146_v1, %v146_v1  ;;  %v151_v4 = vcombine.high %v147_v2, %v147_v2 }
  0x11   : > { %394 = vmatprep.subr.msk.mxu0 %vm159_vm0, %v150_v3  ;;  %398 = vmatprep.subr.msk.mxu1 %vm159_vm0, %v151_v4 }
  0x12   : > { %395 = vmatpush1.msk.msra.mxu0 %vm159_vm0, %v146_v1  ;;  %399 = vmatpush1.msk.msra.mxu1 %vm159_vm0, %v147_v2 }
  0x13   : > { %396 = vmatmul.mubr.msk.f32.vlgmr.msra.gmra.mxu0 %vm152_vm1, %v144_v5  ;;  %400 = vmatmul.mubr.msk.f32.vlgmr.msra.gmra.mxu1 %vm152_vm1, %v144_v5 }
  0x14   : > { %238 = vmatprep.mubr.f32.mxu0 %v425_v0  ;;  %315 = vmatprep.mubr.f32.mxu1 %v425_v0 }
  0x17   : > { %397 = vmatmul.mubr.msk.f32.gmra.mxu0 %vm152_vm1, %v145_v6  ;;  %401 = vmatmul.mubr.msk.f32.gmra.mxu1 %vm152_vm1, %v145_v6 }
  0xd3   : > { %v234_v7 = vpop.f32.mrf.mxu0  ;;  %v311_v8 = vpop.f32.mrf.mxu1 }
  0xd4   : > { %322 = vst [vmem:[%s143_s22] sm:$0xff] %v234_v7  ;;  %324 = vst [vmem:[%s143_s22 + $0x10] sm:$0xff] %v311_v8 }
  0xd5   : > { %v236_v9 = vpop.f32.mrf.mxu0  ;;  %v313_v10 = vpop.f32.mrf.mxu1 }
  0xd6   : > { %323 = vst [vmem:[%s143_s22 + $0x8] sm:$0xff] %v236_v9  ;;  %325 = vst [vmem:[%s143_s22 + $0x18] sm:$0xff] %v313_v10 }
  0xd7   : > { %v240_v11 = vpop.f32.mrf.mxu0  ;;  %v317_v12 = vpop.f32.mrf.mxu1 }
  0xd8   : > { %326 = vst [vmem:[%s143_s22 + $0x20] sm:$0xff] %v240_v11  ;;  %328 = vst [vmem:[%s143_s22 + $0x30] sm:$0xff] %v317_v12 }
  0xd9   : > { %v242_v13 = vpop.f32.mrf.mxu0  ;;  %v319_v14 = vpop.f32.mrf.mxu1 }
  0xda   : > { %327 = vst [vmem:[%s143_s22 + $0x28] sm:$0xff] %v242_v13  ;;  %329 = vst [vmem:[%s143_s22 + $0x38] sm:$0xff] %v319_v14 }
  0xdb PF: > { %s12_s9 = sadd.s32 1, %s423_s9  }
  0xdc   : > { %p9_p4 = scmp.ge.s32.totalorder %s12_s9, 4  }
  0xde   :  { %11 = sbr.rel (!%p9_p4) target bundleno = 1 (0x1), region = 58 }

// kernel: hrnet_w48_contrast_forward.12
= control target key start
LH: loop header
LB: loop body
LE: loop exit
PB: predicated region body
PF: predicated region fallthrough
CT: control target
= control target key end

     0   :  { %s340_s9 = smov 0   ;;  %s357_s0 = inlined_call_operand.vmem [shape: f32[16,2], index: 0, kind: input, shape index: {}]   ;;  %s358_s1 = inlined_call_operand.vmem [shape: f32[2,2,128], index: 1, kind: input, shape index: {}]   ;;  %s359_s2 = inlined_call_operand.vmem [shape: f32[2,16,128], index: 2, kind: output, shape index: {}]  }
   0x1 LB: > { %s287_s10 = sadd.s32 4294967295, %s323_s9   ;;  %p291_p0 = scmp.ge.s32.totalorder %s323_s9, 1  ;;  %s323_s9 = sphi %s340_s9, %s12_s9  }
   0x2   : > { %p111_p1 = scmp.lt.s32.totalorder %s323_s9, 3 }
   0x4   : > { %p112_p2 = pnand %p291_p0, %p111_p1 }
   0x5   : > { %p132_p3 = scmp.lt.s32.totalorder (!%p112_p2), %s287_s10, 1 }
   0x6   : > { %115 = sbr.rel (%p112_p2) target bundleno = 213 (0xd5), region = 28 }
   0xb   : > { %v141_v0 = vld [vmem:[%s357_s0] sm:$0xff]  ;;  %vm144_vm0 = vcmask 15360   ;;  %s361_s10 = smov (!%p132_p3, %s287_s10), 1  ;;  %vm151_vm1 = vcmask 1041408   ;;  %v142_v2 = vld [vmem:[%s357_s0 + $0x8] sm:$0xff] }
   0xc   : > { %306 = vmatprep.mubr.msk.f32.mxu0 %vm144_vm0, %v141_v0  ;;  %s292_s13 = sshll.u32 %s361_s10, 1  ;;  %s300_s19 = sshll.u32 %s361_s10, 4 }
   0xd   : > { %s135_s16 = scalar_lea.vmem %s358_s1, %s292_s13  ;;  %s140_s22 = scalar_lea.vmem %s359_s2, %s300_s19 }
   0xe   : > { %v143_v1 = vld [vmem:[%s135_s16] sm:$0x3] }
   0xf   : > { %304 = vmatprep.subr.msk.mxu0 %vm151_vm1, %v143_v1 }
  0x10   : > { %305 = vmatpush3.msk.msra.mxu0 %vm151_vm1, %v143_v1 }
  0x11   : > { %307 = vmatmul.mubr.msk.f32.vlgmr.msra.gmra.mxu0 %vm144_vm0, %v142_v2 }
  0xd1   : > { %v308_v3 = vpop.f32.mrf.mxu0 }
  0xd2   : > { %231 = vst [vmem:[%s140_s22 + $0x8] sm:$0xff] %v308_v3 }
  0xd3   : > { %v221_v4 = vpop.f32.mrf.mxu0 }
  0xd4   : > { %230 = vst [vmem:[%s140_s22] sm:$0xff] %v221_v4 }
  0xd5 PF: > { %s12_s9 = sadd.s32 1, %s323_s9  }
  0xd6   : > { %p9_p4 = scmp.ge.s32.totalorder %s12_s9, 4  }
  0xd8   :  { %11 = sbr.rel (!%p9_p4) target bundleno = 1 (0x1), region = 58 }

// kernel: hrnet_w48_contrast_forward.13
= control target key start
LH: loop header
LB: loop body
LE: loop exit
PB: predicated region body
PF: predicated region fallthrough
CT: control target
= control target key end

     0   :  { %s653_s9 = smov 0   ;;  %s714_s0 = inlined_call_operand.vmem [shape: f32[16,2], index: 0, kind: input, shape index: {}]   ;;  %s715_s1 = inlined_call_operand.vmem [shape: f32[2,2,1024], index: 1, kind: input, shape index: {}]   ;;  %s716_s2 = inlined_call_operand.vmem [shape: f32[2,16,1024], index: 2, kind: output, shape index: {}]  }
   0x1 LB: > { %s587_s10 = sadd.s32 4294967295, %s634_s9   ;;  %p591_p0 = scmp.ge.s32.totalorder %s634_s9, 1  ;;  %s634_s9 = sphi %s653_s9, %s12_s9  }
   0x2   : > { %p112_p1 = scmp.lt.s32.totalorder %s634_s9, 3 }
   0x4   : > { %p113_p2 = pnand %p591_p0, %p112_p1 }
   0x5   : > { %p134_p3 = scmp.lt.s32.totalorder (!%p113_p2), %s587_s10, 1 }
   0x6   : > { %116 = sbr.rel (%p113_p2) target bundleno = 233 (0xe9), region = 28 }
   0xb   : > { %v154_v0 = vlaneseq  ;;  %v636_v1 = vmov 1983009808   ;;  %v637_v3 = vmov 0.0   ;;  %s718_s10 = smov (!%p134_p3, %s587_s10), 1  ;;  %vm191_vm0 = vcmask 1041408   ;;  %v144_v16 = vld [vmem:[%s714_s0] sm:$0xff] }
   0xc   : > { %v152_v2 = vunpack.c.l.s4 %v636_v1  ;;  %272 = vmatprep.mubr.f32.mxu0 %v637_v3  ;;  %349 = vmatprep.mubr.f32.mxu1 %v637_v3  ;;  %s614_s11 = sshll.u32 %s718_s10, 4  ;;  %vm184_vm1 = vcmask 15360   ;;  %v145_v20 = vld [vmem:[%s714_s0 + $0x8] sm:$0xff]  ;;  %s615_s19 = sshll.u32 %s718_s10, 7 }
   0xd   : > { %v155_v4 = vshrl.u32 %v154_v0, 7  ;;  %s138_s14 = scalar_lea.vmem %s715_s1, %s614_s11  ;;  %s693_s22 = scalar_lea.vmem %s716_s2, %s615_s19 }
   0xe   : > { %v153_v5 = vunpack.c.0.s8 %v152_v2  ;;  %v146_v7 = vld [vmem:[%s138_s14] sm:$0xff]  ;;  %v147_v8 = vld [vmem:[%s138_s14 + $0x8] sm:$0xff] }
   0xf   : > { %v167_v10 = vcombine.high %v147_v8, %v147_v8  ;;  %v150_v12 = vcombine.high %v146_v7, %v146_v7 }
  0x10   : > { %v156_v6 = vsub.s32 %v153_v5, %v155_v4 }
  0x12   : > { %v157_v9 = vrot.slane %v146_v7, %v156_v6  ;;  %v174_v11 = vrot.slane %v147_v8, %v156_v6  ;;  %v164_v14 = vrot.slane %v150_v12, %v156_v6  ;;  %v181_v15 = vrot.slane %v167_v10, %v156_v6 }
  0x14   : > { %v165_v13 = vcombine.high %v157_v9, %v157_v9  ;;  %v182_v17 = vcombine.high %v174_v11, %v174_v11  ;;  %v166_v18 = vcombine.high %v164_v14, %v164_v14  ;;  %v183_v19 = vcombine.high %v181_v15, %v181_v15 }
  0x16   : > { %596 = vmatprep.subr.msk.mxu0 %vm191_vm0, %v165_v13  ;;  %600 = vmatprep.subr.msk.mxu1 %vm191_vm0, %v166_v18 }
  0x17   : > { %597 = vmatpush1.msk.msra.mxu0 %vm191_vm0, %v157_v9  ;;  %601 = vmatpush1.msk.msra.mxu1 %vm191_vm0, %v164_v14 }
  0x18   : > { %598 = vmatmul.mubr.msk.f32.vlgmr.msra.gmra.mxu0 %vm184_vm1, %v144_v16  ;;  %604 = vmatprep.subr.msk.mxu0 %vm191_vm0, %v182_v17 }
  0x19   : > { %602 = vmatmul.mubr.msk.f32.vlgmr.msra.gmra.mxu1 %vm184_vm1, %v144_v16  ;;  %608 = vmatprep.subr.msk.mxu1 %vm191_vm0, %v183_v19 }
  0x1a   : > { %605 = vmatpush1.msk.msra.mxu0 %vm191_vm0, %v174_v11  ;;  %609 = vmatpush1.msk.msra.mxu1 %vm191_vm0, %v181_v15 }
  0x1b   : > { %278 = vmatprep.mubr.f32.mxu0 %v637_v3  ;;  %355 = vmatprep.mubr.f32.mxu1 %v637_v3 }
  0x1c   : > { %599 = vmatmul.mubr.msk.f32.gmra.mxu0 %vm184_vm1, %v145_v20 }
  0x1d   : > { %603 = vmatmul.mubr.msk.f32.gmra.mxu1 %vm184_vm1, %v145_v20  ;;  %426 = vmatprep.mubr.f32.mxu0 %v637_v3 }
  0x1e   : > { %503 = vmatprep.mubr.f32.mxu1 %v637_v3 }
  0x20   : > { %606 = vmatmul.mubr.msk.f32.vlgmr.msra.gmra.mxu0 %vm184_vm1, %v144_v16 }
  0x21   : > { %610 = vmatmul.mubr.msk.f32.vlgmr.msra.gmra.mxu1 %vm184_vm1, %v144_v16  ;;  %432 = vmatprep.mubr.f32.mxu0 %v637_v3 }
  0x22   : > { %509 = vmatprep.mubr.f32.mxu1 %v637_v3 }
  0x24   : > { %607 = vmatmul.mubr.msk.f32.gmra.mxu0 %vm184_vm1, %v145_v20 }
  0x25   : > { %611 = vmatmul.mubr.msk.f32.gmra.mxu1 %vm184_vm1, %v145_v20 }
  0xd8   : > { %v274_v21 = vpop.f32.mrf.mxu0 }
  0xd9   : > { %516 = vst [vmem:[%s693_s22] sm:$0xff] %v274_v21  ;;  %v351_v22 = vpop.f32.mrf.mxu1 }
  0xda   : > { %v276_v23 = vpop.f32.mrf.mxu0  ;;  %518 = vst [vmem:[%s693_s22 + $0x10] sm:$0xff] %v351_v22 }
  0xdb   : > { %517 = vst [vmem:[%s693_s22 + $0x8] sm:$0xff] %v276_v23  ;;  %v353_v24 = vpop.f32.mrf.mxu1 }
  0xdc   : > { %519 = vst [vmem:[%s693_s22 + $0x18] sm:$0xff] %v353_v24  ;;  %v280_v25 = vpop.f32.mrf.mxu0 }
  0xdd   : > { %524 = vst [vmem:[%s693_s22 + $0x40] sm:$0xff] %v280_v25  ;;  %v357_v26 = vpop.f32.mrf.mxu1 }
  0xde   : > { %526 = vst [vmem:[%s693_s22 + $0x50] sm:$0xff] %v357_v26  ;;  %v282_v27 = vpop.f32.mrf.mxu0 }
  0xdf   : > { %525 = vst [vmem:[%s693_s22 + $0x48] sm:$0xff] %v282_v27  ;;  %v359_v28 = vpop.f32.mrf.mxu1 }
  0xe0   : > { %527 = vst [vmem:[%s693_s22 + $0x58] sm:$0xff] %v359_v28  ;;  %v428_v29 = vpop.f32.mrf.mxu0 }
  0xe1   : > { %520 = vst [vmem:[%s693_s22 + $0x20] sm:$0xff] %v428_v29  ;;  %v505_v30 = vpop.f32.mrf.mxu1 }
  0xe2   : > { %522 = vst [vmem:[%s693_s22 + $0x30] sm:$0xff] %v505_v30  ;;  %v430_v31 = vpop.f32.mrf.mxu0 }
  0xe3   : > { %521 = vst [vmem:[%s693_s22 + $0x28] sm:$0xff] %v430_v31  ;;  %v507_v32 = vpop.f32.mrf.mxu1 }
  0xe4   : > { %523 = vst [vmem:[%s693_s22 + $0x38] sm:$0xff] %v507_v32  ;;  %v434_v33 = vpop.f32.mrf.mxu0 }
  0xe5   : > { %528 = vst [vmem:[%s693_s22 + $0x60] sm:$0xff] %v434_v33  ;;  %v511_v34 = vpop.f32.mrf.mxu1 }
  0xe6   : > { %530 = vst [vmem:[%s693_s22 + $0x70] sm:$0xff] %v511_v34  ;;  %v436_v35 = vpop.f32.mrf.mxu0 }
  0xe7   : > { %529 = vst [vmem:[%s693_s22 + $0x68] sm:$0xff] %v436_v35  ;;  %v513_v36 = vpop.f32.mrf.mxu1 }
  0xe8   : > { %531 = vst [vmem:[%s693_s22 + $0x78] sm:$0xff] %v513_v36 }
  0xe9 PF: > { %s12_s9 = sadd.s32 1, %s634_s9  }
  0xea   : > { %p9_p4 = scmp.ge.s32.totalorder %s12_s9, 4  }
  0xec   :  { %11 = sbr.rel (!%p9_p4) target bundleno = 1 (0x1), region = 58 }

// kernel: hrnet_w48_contrast_forward.15
= control target key start
LH: loop header
LB: loop body
LE: loop exit
PB: predicated region body
PF: predicated region fallthrough
CT: control target
= control target key end

     0   :  { %vm410_vm0 = vcmask 1043456   ;;  %vm313_vm1 = vcmask 982016   ;;  %s2981_s0 = inlined_call_operand.vmem [shape: bf16[512,120], index: 0, kind: input, shape index: {}]   ;;  %s2982_s1 = inlined_call_operand.vmem [shape: bf16[120,120], index: 1, kind: input, shape index: {}]   ;;  %s2983_s2 = inlined_call_operand.vmem [shape: f32[1,120], index: 2, kind: input, shape index: {}]   ;;  %s2984_s3 = inlined_call_operand.vmem [shape: bf16[120,128], index: 3, kind: input, shape index: {}]   ;;  %s2985_s4 = inlined_call_operand.vmem [shape: f32[1,128], index: 4, kind: input, shape index: {}]   ;;  %s2986_s5 = inlined_call_operand.hbm [shape: f32[512,128], index: 5, kind: output, shape index: {}]  }
   0x1   :  { %v2077_v0 = vld [vmem:[%s2982_s1 + $0x38] ss:$0 sps:$4 sm:$0xff]   ;;  %v2078_v1 = vld [vmem:[%s2982_s1 + $0x30] sm:$0xff]   ;;  %v2079_v3 = vld [vmem:[%s2982_s1 + $0x28] sm:$0xff]  }
   0x2   :  { %2072 = vmatprep.subr.msk.bf16.mxu0 %vm410_vm0, %v2077_v0  ;;  %v412_v2 = vsel %vm410_vm0, %v2077_v0, 0  ;;  %v2080_v4 = vld [vmem:[%s2982_s1 + $0x20] sm:$0xff]   ;;  %v2081_v6 = vld [vmem:[%s2982_s1 + $0x18] sm:$0xff]   ;;  %v2082_v7 = vld [vmem:[%s2982_s1 + $0x10] sm:$0xff]  }
   0x3   :  { %1913 = vmatpush3.bf16.msra.mxu0 %v412_v2  ;;  %v2085_v5 = vld [vmem:[%s2981_s0] sm:$0xff]   ;;  %v2083_v8 = vld [vmem:[%s2982_s1 + $0x8] sm:$0xff]   ;;  %v2087_v11 = vld [vmem:[%s2981_s0 + $0x10] sm:$0xff]  }
   0x4   :  { %1914 = vmatprep.subr.bf16.mxu0 %v2078_v1  ;;  %1928 = vmatprep.mubr.msk.bf16.mxu0 %vm313_vm1, %v2085_v5  ;;  %v2084_v9 = vld [vmem:[%s2982_s1] sm:$0xff]   ;;  %v2086_v10 = vld [vmem:[%s2981_s0 + $0x8] sm:$0xff]   ;;  %v2088_v12 = vld [vmem:[%s2981_s0 + $0x18] sm:$0xff]  }
   0x5   :  { %v2089_v13 = vld [vmem:[%s2981_s0 + $0x20] sm:$0xff]   ;;  %v2117_v14 = vld [vmem:[%s2984_s3 + $0x38] ss:$0 sps:$4 sm:$0xff]   ;;  %v2118_v15 = vld [vmem:[%s2984_s3 + $0x30] sm:$0xff]  }
   0x6   :  { %2073 = vmatprep.subr.msk.bf16.mxu1 %vm410_vm0, %v2117_v14  ;;  %v963_v16 = vsel %vm410_vm0, %v2117_v14, 0  ;;  %v2119_v17 = vld [vmem:[%s2984_s3 + $0x28] sm:$0xff]  }
   0x7   :  { %1915 = vmatpush3.bf16.msra.mxu0 %v2078_v1  ;;  %1993 = vmatpush3.bf16.msra.mxu1 %v963_v16  ;;  %v2090_v18 = vld [vmem:[%s2981_s0 + $0x28] sm:$0xff]  }
   0x8   :  { %1916 = vmatprep.subr.bf16.mxu0 %v2079_v3  ;;  %1994 = vmatprep.subr.bf16.mxu1 %v2118_v15 }
   0xb   :  { %1917 = vmatpush3.bf16.msra.mxu0 %v2079_v3 }
   0xc   :  { %1918 = vmatprep.subr.bf16.mxu0 %v2080_v4 }
   0xf   :  { %1919 = vmatpush3.bf16.msra.mxu0 %v2080_v4 }
  0x10   :  { %1920 = vmatprep.subr.bf16.mxu0 %v2081_v6 }
  0x13   :  { %1921 = vmatpush3.bf16.msra.mxu0 %v2081_v6 }
  0x14   :  { %1922 = vmatprep.subr.bf16.mxu0 %v2082_v7 }
  0x17   :  { %1923 = vmatpush3.bf16.msra.mxu0 %v2082_v7 }
  0x18   :  { %1924 = vmatprep.subr.bf16.mxu0 %v2083_v8 }
  0x1b   :  { %1925 = vmatpush3.bf16.msra.mxu0 %v2083_v8 }
  0x1c   :  { %1926 = vmatprep.subr.bf16.mxu0 %v2084_v9 }
  0x1f   :  { %1927 = vmatpush3.bf16.msra.mxu0 %v2084_v9 }
  0x22   :  { %1929 = vmatmul.mubr.msk.bf16.vlgmr.msra.gmra.mxu0 %vm313_vm1, %v2086_v10 }
  0x23   :  { %1932 = vmatprep.mubr.msk.bf16.mxu0 %vm313_vm1, %v2087_v11 }
  0x2a   :  { %1933 = vmatmul.mubr.msk.bf16.gmra.mxu0 %vm313_vm1, %v2088_v12 }
  0x2b   :  { %1936 = vmatprep.mubr.msk.bf16.mxu0 %vm313_vm1, %v2089_v13 }
  0x2c   :  { %10 = vsyncpa [#allocation3], 0  ;;  %v2091_v19 = vld [vmem:[%s2981_s0 + $0x30] sm:$0xff]   ;;  %1995 = vmatpush3.bf16.msra.mxu1 %v2118_v15  ;;  %v2120_v20 = vld [vmem:[%s2984_s3 + $0x20] sm:$0xff]  }
  0x2d   :  { %1996 = vmatprep.subr.bf16.mxu1 %v2119_v17  ;;  %v2121_v21 = vld [vmem:[%s2984_s3 + $0x18] sm:$0xff]   ;;  %v2093_v23 = vld [vmem:[%s2981_s0 + $0x40] sm:$0xff]   ;;  %v2094_v24 = vld [vmem:[%s2981_s0 + $0x48] sm:$0xff]  }
  0x2e   :  { %v2092_v22 = vld [vmem:[%s2981_s0 + $0x38] sm:$0xff]   ;;  %v2095_v25 = vld [vmem:[%s2981_s0 + $0x50] sm:$0xff]   ;;  %v2097_v27 = vld [vmem:[%s2981_s0 + $0x60] sm:$0xff]  }
  0x2f   :  { %v2096_v26 = vld [vmem:[%s2981_s0 + $0x58] sm:$0xff]   ;;  %v2098_v28 = vld [vmem:[%s2981_s0 + $0x68] sm:$0xff]   ;;  %v2099_v29 = vld [vmem:[%s2981_s0 + $0x70] sm:$0xff]  }
  0x30   :  { %1997 = vmatpush3.bf16.msra.mxu1 %v2119_v17  ;;  %v2100_v30 = vld [vmem:[%s2981_s0 + $0x78] sm:$0xff]   ;;  %v2101_v31 = vld [vmem:[%s2981_s0 + $0x80] sm:$0xff]   ;;  %v2102_v32 = vld [vmem:[%s2981_s0 + $0x88] sm:$0xff]  }
  0x31   :  { %1998 = vmatprep.subr.bf16.mxu1 %v2120_v20  ;;  %v2103_v33 = vld [vmem:[%s2981_s0 + $0x90] sm:$0xff]   ;;  %v2104_v35 = vld [vmem:[%s2981_s0 + $0x98] sm:$0xff]   ;;  %v2123_v36 = vld [vmem:[%s2984_s3 + $0x8] sm:$0xff]  }
  0x32   :  { %1937 = vmatmul.mubr.msk.bf16.gmra.mxu0 %vm313_vm1, %v2090_v18  ;;  %v2122_v34 = vld [vmem:[%s2984_s3 + $0x10] sm:$0xff]   ;;  %v2105_v37 = vld [vmem:[%s2981_s0 + $0xa0] sm:$0xff]   ;;  %v2106_v39 = vld [vmem:[%s2981_s0 + $0xa8] sm:$0xff]  }
  0x33   :  { %1940 = vmatprep.mubr.msk.bf16.mxu0 %vm313_vm1, %v2091_v19  ;;  %v2124_v38 = vld [vmem:[%s2984_s3] sm:$0xff]   ;;  %v2107_v40 = vld [vmem:[%s2981_s0 + $0xb0] sm:$0xff]   ;;  %v2108_v41 = vld [vmem:[%s2981_s0 + $0xb8] sm:$0xff]  }
  0x34   :  { %1999 = vmatpush3.bf16.msra.mxu1 %v2120_v20  ;;  %v2109_v42 = vld [vmem:[%s2981_s0 + $0xc0] sm:$0xff]   ;;  %v2110_v43 = vld [vmem:[%s2981_s0 + $0xc8] sm:$0xff]   ;;  %v2111_v44 = vld [vmem:[%s2981_s0 + $0xd0] sm:$0xff]  }
  0x35   :  { %2000 = vmatprep.subr.bf16.mxu1 %v2121_v21  ;;  %v2112_v45 = vld [vmem:[%s2981_s0 + $0xd8] sm:$0xff]   ;;  %v2113_v46 = vld [vmem:[%s2981_s0 + $0xe0] sm:$0xff]   ;;  %v2114_v47 = vld [vmem:[%s2981_s0 + $0xe8] sm:$0xff]  }
  0x36   :  { %v2115_v48 = vld [vmem:[%s2981_s0 + $0xf0] sm:$0xff]   ;;  %v2116_v49 = vld [vmem:[%s2981_s0 + $0xf8] sm:$0xff]   ;;  %v2491_v52 = vld [vmem:[%s2983_s2] ss:$0 sm:$0xff] }
  0x38   :  { %2001 = vmatpush3.bf16.msra.mxu1 %v2121_v21 }
  0x39   :  { %2002 = vmatprep.subr.bf16.mxu1 %v2122_v34 }
  0x3a   :  { %1941 = vmatmul.mubr.msk.bf16.gmra.mxu0 %vm313_vm1, %v2092_v22 }
  0x3b   :  { %1944 = vmatprep.mubr.msk.bf16.mxu0 %vm313_vm1, %v2093_v23 }
  0x3c   :  { %2003 = vmatpush3.bf16.msra.mxu1 %v2122_v34 }
  0x3d   :  { %2004 = vmatprep.subr.bf16.mxu1 %v2123_v36 }
  0x40   :  { %2005 = vmatpush3.bf16.msra.mxu1 %v2123_v36 }
  0x41   :  { %2006 = vmatprep.subr.bf16.mxu1 %v2124_v38 }
  0x42   :  { %1945 = vmatmul.mubr.msk.bf16.gmra.mxu0 %vm313_vm1, %v2094_v24 }
  0x43   :  { %1948 = vmatprep.mubr.msk.bf16.mxu0 %vm313_vm1, %v2095_v25 }
  0x44   :  { %2007 = vmatpush3.bf16.msra.mxu1 %v2124_v38 }
  0x4a   :  { %1949 = vmatmul.mubr.msk.bf16.gmra.mxu0 %vm313_vm1, %v2096_v26 }
  0x4b   :  { %1952 = vmatprep.mubr.msk.bf16.mxu0 %vm313_vm1, %v2097_v27 }
  0x52   :  { %1953 = vmatmul.mubr.msk.bf16.gmra.mxu0 %vm313_vm1, %v2098_v28 }
  0x53   :  { %1956 = vmatprep.mubr.msk.bf16.mxu0 %vm313_vm1, %v2099_v29 }
  0x5a   :  { %1957 = vmatmul.mubr.msk.bf16.gmra.mxu0 %vm313_vm1, %v2100_v30 }
  0x5b   :  { %1960 = vmatprep.mubr.msk.bf16.mxu0 %vm313_vm1, %v2101_v31 }
  0x62   :  { %1961 = vmatmul.mubr.msk.bf16.gmra.mxu0 %vm313_vm1, %v2102_v32 }
  0x63   :  { %1964 = vmatprep.mubr.msk.bf16.mxu0 %vm313_vm1, %v2103_v33 }
  0x6a   :  { %1965 = vmatmul.mubr.msk.bf16.gmra.mxu0 %vm313_vm1, %v2104_v35 }
  0x6b   :  { %1968 = vmatprep.mubr.msk.bf16.mxu0 %vm313_vm1, %v2105_v37 }
  0x72   :  { %1969 = vmatmul.mubr.msk.bf16.gmra.mxu0 %vm313_vm1, %v2106_v39 }
  0x73   :  { %1972 = vmatprep.mubr.msk.bf16.mxu0 %vm313_vm1, %v2107_v40 }
  0x7a   :  { %1973 = vmatmul.mubr.msk.bf16.gmra.mxu0 %vm313_vm1, %v2108_v41 }
  0x7b   :  { %1976 = vmatprep.mubr.msk.bf16.mxu0 %vm313_vm1, %v2109_v42 }
  0x82   :  { %1977 = vmatmul.mubr.msk.bf16.gmra.mxu0 %vm313_vm1, %v2110_v43 }
  0x83   :  { %1980 = vmatprep.mubr.msk.bf16.mxu0 %vm313_vm1, %v2111_v44 }
  0x8a   :  { %1981 = vmatmul.mubr.msk.bf16.gmra.mxu0 %vm313_vm1, %v2112_v45 }
  0x8b   :  { %1984 = vmatprep.mubr.msk.bf16.mxu0 %vm313_vm1, %v2113_v46 }
  0x92   :  { %1985 = vmatmul.mubr.msk.bf16.gmra.mxu0 %vm313_vm1, %v2114_v47 }
  0x93   :  { %1988 = vmatprep.mubr.msk.bf16.mxu0 %vm313_vm1, %v2115_v48 }
  0x9a   :  { %1989 = vmatmul.mubr.msk.bf16.gmra.mxu0 %vm313_vm1, %v2116_v49 }
  0xe2   :  { %v1930_v50 = vpop.f32.mrf.mxu0 }
  0xe3   :  { %v457_v56 = vadd.f32 %v1930_v50, %v2491_v52 }
  0xe4   :  { %v448_v51 = vpop.f32.mrf.mxu0 }
  0xe5   :  { %v449_v54 = vadd.f32 %v2491_v52, %v448_v51  ;;  %v705_v63 = vmax.f32 %v457_v56, 0.0 }
  0xe6   :  { %v1931_v53 = vpop.f32.mrf.mxu0 }
  0xe7   :  { %v460_v55 = vadd.f32 %v1931_v53, %v2491_v52  ;;  %v703_v61 = vmax.f32 %v449_v54, 0.0 }
  0xe8   :  { %v451_v57 = vpop.f32.mrf.mxu0 }
  0xe9   :  { %v452_v58 = vadd.f32 %v2491_v52, %v451_v57  ;;  %v706_v59 = vmax.f32 %v460_v55, 0.0 }
  0xea   :  { %v1934_v60 = vpop.f32.mrf.mxu0 }
  0xeb   :  { %v704_v62 = vmax.f32 %v452_v58, 0.0  ;;  %v768_v2 = vpack.c.bf16 %v706_v59, %v705_v63  ;;  %v473_v6 = vadd.f32 %v1934_v60, %v2491_v52 }
  0xec   :  { %v464_v0 = vpop.f32.mrf.mxu0 }
  0xed   :  { %v767_v1 = vpack.c.bf16 %v704_v62, %v703_v61  ;;  %v465_v4 = vadd.f32 %v2491_v52, %v464_v0  ;;  %v709_v13 = vmax.f32 %v473_v6, 0.0 }
  0xee   :  { %v1935_v3 = vpop.f32.mrf.mxu0 }
  0xef   :  { %v476_v5 = vadd.f32 %v1935_v3, %v2491_v52  ;;  %2008 = vmatprep.mubr.msk.bf16.mxu1 %vm313_vm1, %v767_v1  ;;  %v707_v11 = vmax.f32 %v465_v4, 0.0 }
  0xf0   :  { %v467_v7 = vpop.f32.mrf.mxu0  ;;  %2009 = vmatmul.mubr.msk.bf16.vlgmr.msra.gmra.mxu1 %vm313_vm1, %v768_v2 }
  0xf1   :  { %v468_v8 = vadd.f32 %v2491_v52, %v467_v7  ;;  %v710_v9 = vmax.f32 %v476_v5, 0.0 }
  0xf2   :  { %v1938_v10 = vpop.f32.mrf.mxu0 }
  0xf3   :  { %v708_v12 = vmax.f32 %v468_v8, 0.0  ;;  %v770_v16 = vpack.c.bf16 %v710_v9, %v709_v13  ;;  %v489_v20 = vadd.f32 %v1938_v10, %v2491_v52 }
  0xf4   :  { %v480_v14 = vpop.f32.mrf.mxu0 }
  0xf5   :  { %v769_v15 = vpack.c.bf16 %v708_v12, %v707_v11  ;;  %v481_v18 = vadd.f32 %v2491_v52, %v480_v14  ;;  %v713_v27 = vmax.f32 %v489_v20, 0.0 }
  0xf6   :  { %v1939_v17 = vpop.f32.mrf.mxu0 }
  0xf7   :  { %v492_v19 = vadd.f32 %v1939_v17, %v2491_v52  ;;  %2012 = vmatprep.mubr.msk.bf16.mxu1 %vm313_vm1, %v769_v15  ;;  %v711_v25 = vmax.f32 %v481_v18, 0.0 }
  0xf8   :  { %v483_v21 = vpop.f32.mrf.mxu0  ;;  %2013 = vmatmul.mubr.msk.bf16.gmra.mxu1 %vm313_vm1, %v770_v16 }
  0xf9   :  { %v484_v22 = vadd.f32 %v2491_v52, %v483_v21  ;;  %v714_v23 = vmax.f32 %v492_v19, 0.0 }
  0xfa   :  { %v1942_v24 = vpop.f32.mrf.mxu0 }
  0xfb   :  { %v712_v26 = vmax.f32 %v484_v22, 0.0  ;;  %v772_v30 = vpack.c.bf16 %v714_v23, %v713_v27  ;;  %v505_v34 = vadd.f32 %v1942_v24, %v2491_v52 }
  0xfc   :  { %v496_v28 = vpop.f32.mrf.mxu0 }
  0xfd   :  { %v771_v29 = vpack.c.bf16 %v712_v26, %v711_v25  ;;  %v497_v32 = vadd.f32 %v2491_v52, %v496_v28  ;;  %v717_v41 = vmax.f32 %v505_v34, 0.0 }
  0xfe   :  { %v1943_v31 = vpop.f32.mrf.mxu0 }
  0xff   :  { %v508_v33 = vadd.f32 %v1943_v31, %v2491_v52  ;;  %2016 = vmatprep.mubr.msk.bf16.mxu1 %vm313_vm1, %v771_v29  ;;  %v715_v39 = vmax.f32 %v497_v32, 0.0 }
 0x100   :  { %v499_v35 = vpop.f32.mrf.mxu0  ;;  %2017 = vmatmul.mubr.msk.bf16.gmra.mxu1 %vm313_vm1, %v772_v30 }
 0x101   :  { %v500_v36 = vadd.f32 %v2491_v52, %v499_v35  ;;  %v718_v37 = vmax.f32 %v508_v33, 0.0 }
 0x102   :  { %v1946_v38 = vpop.f32.mrf.mxu0 }
 0x103   :  { %v716_v40 = vmax.f32 %v500_v36, 0.0  ;;  %v774_v44 = vpack.c.bf16 %v718_v37, %v717_v41  ;;  %v521_v48 = vadd.f32 %v1946_v38, %v2491_v52 }
 0x104   :  { %v512_v42 = vpop.f32.mrf.mxu0 }
 0x105   :  { %v773_v43 = vpack.c.bf16 %v716_v40, %v715_v39  ;;  %v513_v46 = vadd.f32 %v2491_v52, %v512_v42  ;;  %v721_v56 = vmax.f32 %v521_v48, 0.0 }
 0x106   :  { %v1947_v45 = vpop.f32.mrf.mxu0 }
 0x107   :  { %v524_v47 = vadd.f32 %v1947_v45, %v2491_v52  ;;  %2020 = vmatprep.mubr.msk.bf16.mxu1 %vm313_vm1, %v773_v43  ;;  %v719_v54 = vmax.f32 %v513_v46, 0.0 }
 0x108   :  { %v515_v49 = vpop.f32.mrf.mxu0  ;;  %2021 = vmatmul.mubr.msk.bf16.gmra.mxu1 %vm313_vm1, %v774_v44 }
 0x109   :  { %v516_v50 = vadd.f32 %v2491_v52, %v515_v49  ;;  %v722_v51 = vmax.f32 %v524_v47, 0.0 }
 0x10a   :  { %v1950_v53 = vpop.f32.mrf.mxu0 }
 0x10b   :  { %v720_v55 = vmax.f32 %v516_v50, 0.0  ;;  %v776_v59 = vpack.c.bf16 %v722_v51, %v721_v56  ;;  %v537_v63 = vadd.f32 %v1950_v53, %v2491_v52 }
 0x10c   :  { %v528_v57 = vpop.f32.mrf.mxu0 }
 0x10d   :  { %v775_v58 = vpack.c.bf16 %v720_v55, %v719_v54  ;;  %v529_v61 = vadd.f32 %v2491_v52, %v528_v57  ;;  %v725_v6 = vmax.f32 %v537_v63, 0.0 }
 0x10e   :  { %v1951_v60 = vpop.f32.mrf.mxu0 }
 0x10f   :  { %v540_v62 = vadd.f32 %v1951_v60, %v2491_v52  ;;  %2024 = vmatprep.mubr.msk.bf16.mxu1 %vm313_vm1, %v775_v58  ;;  %v723_v4 = vmax.f32 %v529_v61, 0.0 }
 0x110   :  { %v531_v0 = vpop.f32.mrf.mxu0  ;;  %2025 = vmatmul.mubr.msk.bf16.gmra.mxu1 %vm313_vm1, %v776_v59 }
 0x111   :  { %v532_v1 = vadd.f32 %v2491_v52, %v531_v0  ;;  %v726_v2 = vmax.f32 %v540_v62, 0.0 }
 0x112   :  { %v1954_v3 = vpop.f32.mrf.mxu0 }
 0x113   :  { %v724_v5 = vmax.f32 %v532_v1, 0.0  ;;  %v778_v9 = vpack.c.bf16 %v726_v2, %v725_v6  ;;  %v553_v13 = vadd.f32 %v1954_v3, %v2491_v52 }
 0x114   :  { %v544_v7 = vpop.f32.mrf.mxu0 }
 0x115   :  { %v777_v8 = vpack.c.bf16 %v724_v5, %v723_v4  ;;  %v545_v11 = vadd.f32 %v2491_v52, %v544_v7  ;;  %v729_v20 = vmax.f32 %v553_v13, 0.0 }
 0x116   :  { %v1955_v10 = vpop.f32.mrf.mxu0 }
 0x117   :  { %v556_v12 = vadd.f32 %v1955_v10, %v2491_v52  ;;  %2028 = vmatprep.mubr.msk.bf16.mxu1 %vm313_vm1, %v777_v8  ;;  %v727_v18 = vmax.f32 %v545_v11, 0.0 }
 0x118   :  { %v547_v14 = vpop.f32.mrf.mxu0  ;;  %2029 = vmatmul.mubr.msk.bf16.gmra.mxu1 %vm313_vm1, %v778_v9 }
 0x119   :  { %v548_v15 = vadd.f32 %v2491_v52, %v547_v14  ;;  %v730_v16 = vmax.f32 %v556_v12, 0.0 }
 0x11a   :  { %v1958_v17 = vpop.f32.mrf.mxu0 }
 0x11b   :  { %v728_v19 = vmax.f32 %v548_v15, 0.0  ;;  %v780_v23 = vpack.c.bf16 %v730_v16, %v729_v20  ;;  %v569_v27 = vadd.f32 %v1958_v17, %v2491_v52 }
 0x11c   :  { %v560_v21 = vpop.f32.mrf.mxu0 }
 0x11d   :  { %v779_v22 = vpack.c.bf16 %v728_v19, %v727_v18  ;;  %v561_v25 = vadd.f32 %v2491_v52, %v560_v21  ;;  %v733_v34 = vmax.f32 %v569_v27, 0.0 }
 0x11e   :  { %v1959_v24 = vpop.f32.mrf.mxu0 }
 0x11f   :  { %v572_v26 = vadd.f32 %v1959_v24, %v2491_v52  ;;  %2032 = vmatprep.mubr.msk.bf16.mxu1 %vm313_vm1, %v779_v22  ;;  %v731_v32 = vmax.f32 %v561_v25, 0.0 }
 0x120   :  { %v563_v28 = vpop.f32.mrf.mxu0  ;;  %2033 = vmatmul.mubr.msk.bf16.gmra.mxu1 %vm313_vm1, %v780_v23 }
 0x121   :  { %v564_v29 = vadd.f32 %v2491_v52, %v563_v28  ;;  %v734_v30 = vmax.f32 %v572_v26, 0.0 }
 0x122   :  { %v1962_v31 = vpop.f32.mrf.mxu0 }
 0x123   :  { %v732_v33 = vmax.f32 %v564_v29, 0.0  ;;  %v782_v37 = vpack.c.bf16 %v734_v30, %v733_v34  ;;  %v585_v41 = vadd.f32 %v1962_v31, %v2491_v52 }
 0x124   :  { %v576_v35 = vpop.f32.mrf.mxu0 }
 0x125   :  { %v781_v36 = vpack.c.bf16 %v732_v33, %v731_v32  ;;  %v577_v39 = vadd.f32 %v2491_v52, %v576_v35  ;;  %v737_v48 = vmax.f32 %v585_v41, 0.0 }
 0x126   :  { %v1963_v38 = vpop.f32.mrf.mxu0 }
 0x127   :  { %v588_v40 = vadd.f32 %v1963_v38, %v2491_v52  ;;  %2036 = vmatprep.mubr.msk.bf16.mxu1 %vm313_vm1, %v781_v36  ;;  %v735_v46 = vmax.f32 %v577_v39, 0.0 }
 0x128   :  { %v579_v42 = vpop.f32.mrf.mxu0  ;;  %2037 = vmatmul.mubr.msk.bf16.gmra.mxu1 %vm313_vm1, %v782_v37 }
 0x129   :  { %v580_v43 = vadd.f32 %v2491_v52, %v579_v42  ;;  %v738_v44 = vmax.f32 %v588_v40, 0.0 }
 0x12a   :  { %v1966_v45 = vpop.f32.mrf.mxu0 }
 0x12b   :  { %v736_v47 = vmax.f32 %v580_v43, 0.0  ;;  %v784_v51 = vpack.c.bf16 %v738_v44, %v737_v48  ;;  %v601_v56 = vadd.f32 %v1966_v45, %v2491_v52 }
 0x12c   :  { %v592_v49 = vpop.f32.mrf.mxu0 }
 0x12d   :  { %v783_v50 = vpack.c.bf16 %v736_v47, %v735_v46  ;;  %v593_v54 = vadd.f32 %v2491_v52, %v592_v49  ;;  %v741_v63 = vmax.f32 %v601_v56, 0.0 }
 0x12e   :  { %v1967_v53 = vpop.f32.mrf.mxu0 }
 0x12f   :  { %v604_v55 = vadd.f32 %v1967_v53, %v2491_v52  ;;  %2040 = vmatprep.mubr.msk.bf16.mxu1 %vm313_vm1, %v783_v50  ;;  %v739_v61 = vmax.f32 %v593_v54, 0.0 }
 0x130   :  { %v595_v57 = vpop.f32.mrf.mxu0  ;;  %2041 = vmatmul.mubr.msk.bf16.gmra.mxu1 %vm313_vm1, %v784_v51 }
 0x131   :  { %v596_v58 = vadd.f32 %v2491_v52, %v595_v57  ;;  %v742_v59 = vmax.f32 %v604_v55, 0.0 }
 0x132   :  { %v1970_v60 = vpop.f32.mrf.mxu0 }
 0x133   :  { %v740_v62 = vmax.f32 %v596_v58, 0.0  ;;  %v786_v2 = vpack.c.bf16 %v742_v59, %v741_v63  ;;  %v617_v6 = vadd.f32 %v1970_v60, %v2491_v52 }
 0x134   :  { %v608_v0 = vpop.f32.mrf.mxu0 }
 0x135   :  { %v785_v1 = vpack.c.bf16 %v740_v62, %v739_v61  ;;  %v609_v4 = vadd.f32 %v2491_v52, %v608_v0  ;;  %v745_v13 = vmax.f32 %v617_v6, 0.0 }
 0x136   :  { %v1971_v3 = vpop.f32.mrf.mxu0 }
 0x137   :  { %v620_v5 = vadd.f32 %v1971_v3, %v2491_v52  ;;  %2044 = vmatprep.mubr.msk.bf16.mxu1 %vm313_vm1, %v785_v1  ;;  %v743_v11 = vmax.f32 %v609_v4, 0.0 }
 0x138   :  { %v611_v7 = vpop.f32.mrf.mxu0  ;;  %2045 = vmatmul.mubr.msk.bf16.gmra.mxu1 %vm313_vm1, %v786_v2 }
 0x139   :  { %v612_v8 = vadd.f32 %v2491_v52, %v611_v7  ;;  %v746_v9 = vmax.f32 %v620_v5, 0.0 }
 0x13a   :  { %v1974_v10 = vpop.f32.mrf.mxu0 }
 0x13b   :  { %v744_v12 = vmax.f32 %v612_v8, 0.0  ;;  %v788_v16 = vpack.c.bf16 %v746_v9, %v745_v13  ;;  %v633_v20 = vadd.f32 %v1974_v10, %v2491_v52 }
 0x13c   :  { %v624_v14 = vpop.f32.mrf.mxu0 }
 0x13d   :  { %v787_v15 = vpack.c.bf16 %v744_v12, %v743_v11  ;;  %v625_v18 = vadd.f32 %v2491_v52, %v624_v14  ;;  %v749_v27 = vmax.f32 %v633_v20, 0.0 }
 0x13e   :  { %v1975_v17 = vpop.f32.mrf.mxu0 }
 0x13f   :  { %v636_v19 = vadd.f32 %v1975_v17, %v2491_v52  ;;  %2048 = vmatprep.mubr.msk.bf16.mxu1 %vm313_vm1, %v787_v15  ;;  %v747_v25 = vmax.f32 %v625_v18, 0.0 }
 0x140   :  { %v627_v21 = vpop.f32.mrf.mxu0  ;;  %2049 = vmatmul.mubr.msk.bf16.gmra.mxu1 %vm313_vm1, %v788_v16 }
 0x141   :  { %v628_v22 = vadd.f32 %v2491_v52, %v627_v21  ;;  %v750_v23 = vmax.f32 %v636_v19, 0.0 }
 0x142   :  { %v1978_v24 = vpop.f32.mrf.mxu0 }
 0x143   :  { %v748_v26 = vmax.f32 %v628_v22, 0.0  ;;  %v790_v30 = vpack.c.bf16 %v750_v23, %v749_v27  ;;  %v649_v34 = vadd.f32 %v1978_v24, %v2491_v52  ;;  %v2592_v22 = vld [vmem:[%s2985_s4] ss:$0 sm:$0xff]  ;;  %s2275_s4 = smov [#allocation2]  }
 0x144   :  { %v640_v28 = vpop.f32.mrf.mxu0  ;;  %s1707_s12 = sshll.u32 %s2275_s4, 4  ;;  %s1708_s12 = int_to_ptr.vmem [resolvable:$true] %s1707_s12 }
 0x145   :  { %v789_v29 = vpack.c.bf16 %v748_v26, %v747_v25  ;;  %v641_v32 = vadd.f32 %v2491_v52, %v640_v28  ;;  %v753_v41 = vmax.f32 %v649_v34, 0.0  ;;  %s2253_s13 = scalar_lea.vmem %s1708_s12, 8192  ;;  %p2258_p1 = scmp.lt.s32.totalorder %s1708_s12, %s1708_s12 }
 0x146   :  { %v1979_v31 = vpop.f32.mrf.mxu0  ;;  %p2254_p0 = scmp.ne.s32.totalorder %s1708_s12, %s2253_s13  ;;  %p2259_p2 = scmp.lt.s32.totalorder %s2253_s13, %s2253_s13 }
 0x147   :  { %v652_v33 = vadd.f32 %v1979_v31, %v2491_v52  ;;  %2052 = vmatprep.mubr.msk.bf16.mxu1 %vm313_vm1, %v789_v29  ;;  %v751_v39 = vmax.f32 %v641_v32, 0.0 }
 0x148   :  { %v643_v35 = vpop.f32.mrf.mxu0  ;;  %2053 = vmatmul.mubr.msk.bf16.gmra.mxu1 %vm313_vm1, %v790_v30  ;;  %p2260_p3 = por %p2259_p2, %p2258_p1 }
 0x149   :  { %v644_v36 = vadd.f32 %v2491_v52, %v643_v35  ;;  %v754_v37 = vmax.f32 %v652_v33, 0.0 }
 0x14a   :  { %v1982_v38 = vpop.f32.mrf.mxu0  ;;  %p2261_p4 = pnand %p2260_p3, %p2254_p0 }
 0x14b   :  { %v752_v40 = vmax.f32 %v644_v36, 0.0  ;;  %v792_v44 = vpack.c.bf16 %v754_v37, %v753_v41  ;;  %v665_v48 = vadd.f32 %v1982_v38, %v2491_v52 }
 0x14c   :  { %v656_v42 = vpop.f32.mrf.mxu0 }
 0x14d   :  { %v791_v43 = vpack.c.bf16 %v752_v40, %v751_v39  ;;  %v657_v46 = vadd.f32 %v2491_v52, %v656_v42  ;;  %v757_v56 = vmax.f32 %v665_v48, 0.0 }
 0x14e   :  { %v1983_v45 = vpop.f32.mrf.mxu0 }
 0x14f   :  { %v668_v47 = vadd.f32 %v1983_v45, %v2491_v52  ;;  %2056 = vmatprep.mubr.msk.bf16.mxu1 %vm313_vm1, %v791_v43  ;;  %v755_v54 = vmax.f32 %v657_v46, 0.0 }
 0x150   :  { %v659_v49 = vpop.f32.mrf.mxu0  ;;  %2057 = vmatmul.mubr.msk.bf16.gmra.mxu1 %vm313_vm1, %v792_v44 }
 0x151   :  { %v660_v50 = vadd.f32 %v2491_v52, %v659_v49  ;;  %v758_v51 = vmax.f32 %v668_v47, 0.0 }
 0x152   :  { %v1986_v53 = vpop.f32.mrf.mxu0 }
 0x153   :  { %v756_v55 = vmax.f32 %v660_v50, 0.0  ;;  %v794_v59 = vpack.c.bf16 %v758_v51, %v757_v56  ;;  %v681_v63 = vadd.f32 %v1986_v53, %v2491_v52 }
 0x154   :  { %v672_v57 = vpop.f32.mrf.mxu0 }
 0x155   :  { %v793_v58 = vpack.c.bf16 %v756_v55, %v755_v54  ;;  %v673_v61 = vadd.f32 %v2491_v52, %v672_v57  ;;  %v761_v6 = vmax.f32 %v681_v63, 0.0 }
 0x156   :  { %v1987_v60 = vpop.f32.mrf.mxu0 }
 0x157   :  { %v684_v62 = vadd.f32 %v1987_v60, %v2491_v52  ;;  %2060 = vmatprep.mubr.msk.bf16.mxu1 %vm313_vm1, %v793_v58  ;;  %v759_v4 = vmax.f32 %v673_v61, 0.0 }
 0x158   :  { %v675_v0 = vpop.f32.mrf.mxu0  ;;  %2061 = vmatmul.mubr.msk.bf16.gmra.mxu1 %vm313_vm1, %v794_v59 }
 0x159   :  { %v676_v1 = vadd.f32 %v2491_v52, %v675_v0  ;;  %v762_v2 = vmax.f32 %v684_v62, 0.0 }
 0x15a   :  { %v1990_v3 = vpop.f32.mrf.mxu0 }
 0x15b   :  { %v760_v5 = vmax.f32 %v676_v1, 0.0  ;;  %v796_v9 = vpack.c.bf16 %v762_v2, %v761_v6  ;;  %v697_v13 = vadd.f32 %v1990_v3, %v2491_v52 }
 0x15c   :  { %v688_v7 = vpop.f32.mrf.mxu0 }
 0x15d   :  { %v795_v8 = vpack.c.bf16 %v760_v5, %v759_v4  ;;  %v689_v11 = vadd.f32 %v2491_v52, %v688_v7  ;;  %v765_v19 = vmax.f32 %v697_v13, 0.0 }
 0x15e   :  { %v1991_v10 = vpop.f32.mrf.mxu0 }
 0x15f   :  { %v700_v12 = vadd.f32 %v1991_v10, %v2491_v52  ;;  %2064 = vmatprep.mubr.msk.bf16.mxu1 %vm313_vm1, %v795_v8  ;;  %v763_v17 = vmax.f32 %v689_v11, 0.0 }
 0x160   :  { %v691_v14 = vpop.f32.mrf.mxu0  ;;  %2065 = vmatmul.mubr.msk.bf16.gmra.mxu1 %vm313_vm1, %v796_v9 }
 0x161   :  { %v692_v15 = vadd.f32 %v2491_v52, %v691_v14  ;;  %v766_v16 = vmax.f32 %v700_v12, 0.0 }
 0x163   :  { %v764_v18 = vmax.f32 %v692_v15, 0.0  ;;  %v798_v21 = vpack.c.bf16 %v766_v16, %v765_v19 }
 0x165   :  { %v797_v20 = vpack.c.bf16 %v764_v18, %v763_v17 }
 0x167   :  { %2068 = vmatprep.mubr.msk.bf16.mxu1 %vm313_vm1, %v797_v20 }
 0x168   :  { %2069 = vmatmul.mubr.msk.bf16.gmra.mxu1 %vm313_vm1, %v798_v21 }
 0x1b0   :  { %v2010_v23 = vpop.f32.mrf.mxu1 }
 0x1b1   :  { %v2595_v24 = vadd.f32 %v2010_v23, %v2592_v22 }
 0x1b2   :  { %v999_v52 = vpop.f32.mrf.mxu1 }
 0x1b3   :  { %v2598_v25 = vadd.f32 %v2592_v22, %v999_v52  ;;  %v1256_v26 = vmul.f32 %v2595_v24, %v2595_v24 }
 0x1b4   :  { %v2011_v27 = vpop.f32.mrf.mxu1 }
 0x1b5   :  { %v2603_v28 = vadd.f32 %v2011_v27, %v2592_v22  ;;  %1322 = vadd.xlane.f32.xlu1 %v1256_v26  ;;  %v1254_v29 = vmul.f32 %v2598_v25, %v2598_v25 }
 0x1b6   :  { %v1002_v30 = vpop.f32.mrf.mxu1 }
 0x1b7   :  { %v2608_v31 = vadd.f32 %v2592_v22, %v1002_v30  ;;  %1318 = vadd.xlane.f32.xlu0 %v1254_v29  ;;  %v1257_v32 = vmul.f32 %v2603_v28, %v2603_v28 }
 0x1b8   :  { %v2014_v33 = vpop.f32.mrf.mxu1 }
 0x1b9   :  { %v2613_v34 = vadd.f32 %v2014_v33, %v2592_v22  ;;  %1324 = vadd.xlane.f32.xlu1 %v1257_v32  ;;  %v1255_v35 = vmul.f32 %v2608_v31, %v2608_v31 }
 0x1ba   :  { %v1015_v36 = vpop.f32.mrf.mxu1 }
 0x1bb   :  { %1320 = vadd.xlane.f32.xlu0 %v1255_v35  ;;  %v2618_v38 = vadd.f32 %v2592_v22, %v1015_v36  ;;  %v1260_v40 = vmul.f32 %v2613_v34, %v2613_v34 }
 0x1bc   :  { %v2015_v37 = vpop.f32.mrf.mxu1 }
 0x1bd   :  { %v2621_v39 = vadd.f32 %v2015_v37, %v2592_v22  ;;  %v1258_v46 = vmul.f32 %v2618_v38, %v2618_v38 }
 0x1be   :  { %v1018_v41 = vpop.f32.mrf.mxu1 }
 0x1bf   :  { %v2626_v42 = vadd.f32 %v2592_v22, %v1018_v41  ;;  %1330 = vadd.xlane.f32.xlu0 %v1260_v40  ;;  %v1261_v43 = vmul.f32 %v2621_v39, %v2621_v39 }
 0x1c0   :  { %v2018_v44 = vpop.f32.mrf.mxu1 }
 0x1c1   :  { %v2631_v45 = vadd.f32 %v2018_v44, %v2592_v22  ;;  %1332 = vadd.xlane.f32.xlu1 %v1261_v43  ;;  %v1259_v48 = vmul.f32 %v2626_v42, %v2626_v42 }
 0x1c2   :  { %v1031_v47 = vpop.f32.mrf.mxu1 }
 0x1c3   :  { %1326 = vadd.xlane.f32.xlu0 %v1258_v46  ;;  %v2638_v50 = vadd.f32 %v2592_v22, %v1031_v47  ;;  %v1264_v53 = vmul.f32 %v2631_v45, %v2631_v45 }
 0x1c4   :  { %v2019_v49 = vpop.f32.mrf.mxu1 }
 0x1c5   :  { %v2641_v51 = vadd.f32 %v2019_v49, %v2592_v22  ;;  %1328 = vadd.xlane.f32.xlu1 %v1259_v48  ;;  %v1262_v59 = vmul.f32 %v2638_v50, %v2638_v50 }
 0x1c6   :  { %v1034_v54 = vpop.f32.mrf.mxu1 }
 0x1c7   :  { %v2646_v55 = vadd.f32 %v2592_v22, %v1034_v54  ;;  %1338 = vadd.xlane.f32.xlu0 %v1264_v53  ;;  %v1265_v56 = vmul.f32 %v2641_v51, %v2641_v51 }
 0x1c8   :  { %v2022_v57 = vpop.f32.mrf.mxu1 }
 0x1c9   :  { %v2651_v58 = vadd.f32 %v2022_v57, %v2592_v22  ;;  %1340 = vadd.xlane.f32.xlu1 %v1265_v56  ;;  %v1263_v61 = vmul.f32 %v2646_v55, %v2646_v55 }
 0x1ca   :  { %v1047_v60 = vpop.f32.mrf.mxu1 }
 0x1cb   :  { %1334 = vadd.xlane.f32.xlu0 %v1262_v59  ;;  %v2658_v63 = vadd.f32 %v2592_v22, %v1047_v60  ;;  %v1268_v1 = vmul.f32 %v2651_v58, %v2651_v58 }
 0x1cc   :  { %v2023_v62 = vpop.f32.mrf.mxu1 }
 0x1cd   :  { %v2661_v0 = vadd.f32 %v2023_v62, %v2592_v22  ;;  %1336 = vadd.xlane.f32.xlu1 %v1263_v61  ;;  %v1266_v7 = vmul.f32 %v2658_v63, %v2658_v63 }
 0x1ce   :  { %v1050_v2 = vpop.f32.mrf.mxu1 }
 0x1cf   :  { %v2666_v3 = vadd.f32 %v2592_v22, %v1050_v2  ;;  %1346 = vadd.xlane.f32.xlu0 %v1268_v1  ;;  %v1269_v4 = vmul.f32 %v2661_v0, %v2661_v0 }
 0x1d0   :  { %v2026_v5 = vpop.f32.mrf.mxu1 }
 0x1d1   :  { %v2671_v6 = vadd.f32 %v2026_v5, %v2592_v22  ;;  %1348 = vadd.xlane.f32.xlu1 %v1269_v4  ;;  %v1267_v9 = vmul.f32 %v2666_v3, %v2666_v3 }
 0x1d2   :  { %v1063_v8 = vpop.f32.mrf.mxu1 }
 0x1d3   :  { %1342 = vadd.xlane.f32.xlu0 %v1266_v7  ;;  %v2678_v11 = vadd.f32 %v2592_v22, %v1063_v8  ;;  %v1272_v13 = vmul.f32 %v2671_v6, %v2671_v6 }
 0x1d4   :  { %v2027_v10 = vpop.f32.mrf.mxu1 }
 0x1d5   :  { %v2681_v12 = vadd.f32 %v2027_v10, %v2592_v22  ;;  %1344 = vadd.xlane.f32.xlu1 %v1267_v9  ;;  %v1270_v19 = vmul.f32 %v2678_v11, %v2678_v11 }
 0x1d6   :  { %v1066_v14 = vpop.f32.mrf.mxu1 }
 0x1d7   :  { %v2686_v15 = vadd.f32 %v2592_v22, %v1066_v14  ;;  %1354 = vadd.xlane.f32.xlu0 %v1272_v13  ;;  %v1273_v16 = vmul.f32 %v2681_v12, %v2681_v12 }
 0x1d8   :  { %v2030_v17 = vpop.f32.mrf.mxu1 }
 0x1d9   :  { %v2691_v18 = vadd.f32 %v2030_v17, %v2592_v22  ;;  %1356 = vadd.xlane.f32.xlu1 %v1273_v16  ;;  %v1271_v21 = vmul.f32 %v2686_v15, %v2686_v15 }
 0x1da   :  { %v1079_v20 = vpop.f32.mrf.mxu1 }
 0x1db   :  { %1350 = vadd.xlane.f32.xlu0 %v1270_v19  ;;  %v2698_v52 = vadd.f32 %v2592_v22, %v1079_v20  ;;  %v1276_v27 = vmul.f32 %v2691_v18, %v2691_v18 }
 0x1dc   :  { %v2031_v23 = vpop.f32.mrf.mxu1 }
 0x1dd   :  { %v2701_v26 = vadd.f32 %v2031_v23, %v2592_v22  ;;  %1352 = vadd.xlane.f32.xlu1 %v1271_v21  ;;  %v1274_v36 = vmul.f32 %v2698_v52, %v2698_v52 }
 0x1de   :  { %v1082_v29 = vpop.f32.mrf.mxu1 }
 0x1df   :  { %v2706_v30 = vadd.f32 %v2592_v22, %v1082_v29  ;;  %1362 = vadd.xlane.f32.xlu0 %v1276_v27  ;;  %v1277_v32 = vmul.f32 %v2701_v26, %v2701_v26 }
 0x1e0   :  { %v2034_v33 = vpop.f32.mrf.mxu1 }
 0x1e1   :  { %v2711_v35 = vadd.f32 %v2034_v33, %v2592_v22  ;;  %1364 = vadd.xlane.f32.xlu1 %v1277_v32  ;;  %v1275_v40 = vmul.f32 %v2706_v30, %v2706_v30 }
 0x1e2   :  { %v1095_v37 = vpop.f32.mrf.mxu1 }
 0x1e3   :  { %1358 = vadd.xlane.f32.xlu0 %v1274_v36  ;;  %v2718_v43 = vadd.f32 %v2592_v22, %v1095_v37  ;;  %v1280_v46 = vmul.f32 %v2711_v35, %v2711_v35 }
 0x1e4   :  { %v2035_v41 = vpop.f32.mrf.mxu1 }
 0x1e5   :  { %v2721_v44 = vadd.f32 %v2035_v41, %v2592_v22  ;;  %1360 = vadd.xlane.f32.xlu1 %v1275_v40  ;;  %v1278_v56 = vmul.f32 %v2718_v43, %v2718_v43 }
 0x1e6   :  { %v1098_v47 = vpop.f32.mrf.mxu1 }
 0x1e7   :  { %v2726_v48 = vadd.f32 %v2592_v22, %v1098_v47  ;;  %1370 = vadd.xlane.f32.xlu0 %v1280_v46  ;;  %v1281_v49 = vmul.f32 %v2721_v44, %v2721_v44 }
 0x1e8   :  { %v2038_v53 = vpop.f32.mrf.mxu1 }
 0x1e9   :  { %v2731_v54 = vadd.f32 %v2038_v53, %v2592_v22  ;;  %1372 = vadd.xlane.f32.xlu1 %v1281_v49  ;;  %v1279_v59 = vmul.f32 %v2726_v48, %v2726_v48 }
 0x1ea   :  { %v1111_v57 = vpop.f32.mrf.mxu1 }
 0x1eb   :  { %1366 = vadd.xlane.f32.xlu0 %v1278_v56  ;;  %v2738_v61 = vadd.f32 %v2592_v22, %v1111_v57  ;;  %v1284_v1 = vmul.f32 %v2731_v54, %v2731_v54 }
 0x1ec   :  { %v2039_v60 = vpop.f32.mrf.mxu1 }
 0x1ed   :  { %v2741_v62 = vadd.f32 %v2039_v60, %v2592_v22  ;;  %1368 = vadd.xlane.f32.xlu1 %v1279_v59  ;;  %v1282_v9 = vmul.f32 %v2738_v61, %v2738_v61 }
 0x1ee   :  { %v1114_v2 = vpop.f32.mrf.mxu1 }
 0x1ef   :  { %v2746_v4 = vadd.f32 %v2592_v22, %v1114_v2  ;;  %1378 = vadd.xlane.f32.xlu0 %v1284_v1  ;;  %v1285_v5 = vmul.f32 %v2741_v62, %v2741_v62 }
 0x1f0   :  { %v2042_v7 = vpop.f32.mrf.mxu1 }
 0x1f1   :  { %v2751_v8 = vadd.f32 %v2042_v7, %v2592_v22  ;;  %1380 = vadd.xlane.f32.xlu1 %v1285_v5  ;;  %v1283_v13 = vmul.f32 %v2746_v4, %v2746_v4 }
 0x1f2   :  { %v1127_v10 = vpop.f32.mrf.mxu1 }
 0x1f3   :  { %1374 = vadd.xlane.f32.xlu0 %v1282_v9  ;;  %v2758_v16 = vadd.f32 %v2592_v22, %v1127_v10  ;;  %v1288_v19 = vmul.f32 %v2751_v8, %v2751_v8 }
 0x1f4   :  { %v2043_v14 = vpop.f32.mrf.mxu1 }
 0x1f5   :  { %v2761_v17 = vadd.f32 %v2043_v14, %v2592_v22  ;;  %1376 = vadd.xlane.f32.xlu1 %v1283_v13  ;;  %v1286_v32 = vmul.f32 %v2758_v16, %v2758_v16 }
 0x1f6   :  { %v1130_v20 = vpop.f32.mrf.mxu1 }
 0x1f7   :  { %v2766_v21 = vadd.f32 %v2592_v22, %v1130_v20  ;;  %1386 = vadd.xlane.f32.xlu0 %v1288_v19  ;;  %v1289_v23 = vmul.f32 %v2761_v17, %v2761_v17 }
 0x1f8   :  { %v2046_v27 = vpop.f32.mrf.mxu1 }
 0x1f9   :  { %v2771_v29 = vadd.f32 %v2046_v27, %v2592_v22  ;;  %1388 = vadd.xlane.f32.xlu1 %v1289_v23  ;;  %v1287_v36 = vmul.f32 %v2766_v21, %v2766_v21 }
 0x1fa   :  { %v1143_v33 = vpop.f32.mrf.mxu1 }
 0x1fb   :  { %1382 = vadd.xlane.f32.xlu0 %v1286_v32  ;;  %v2778_v40 = vadd.f32 %v2592_v22, %v1143_v33  ;;  %v1292_v46 = vmul.f32 %v2771_v29, %v2771_v29 }
 0x1fc   :  { %v2047_v37 = vpop.f32.mrf.mxu1 }
 0x1fd   :  { %v2781_v41 = vadd.f32 %v2047_v37, %v2592_v22  ;;  %1384 = vadd.xlane.f32.xlu1 %v1287_v36  ;;  %v1290_v59 = vmul.f32 %v2778_v40, %v2778_v40 }
 0x1fe   :  { %v1146_v47 = vpop.f32.mrf.mxu1 }
 0x1ff   :  { %v2786_v49 = vadd.f32 %v2592_v22, %v1146_v47  ;;  %1394 = vadd.xlane.f32.xlu0 %v1292_v46  ;;  %v1293_v53 = vmul.f32 %v2781_v41, %v2781_v41 }
 0x200   :  { %v2050_v56 = vpop.f32.mrf.mxu1 }
 0x201   :  { %v2791_v57 = vadd.f32 %v2050_v56, %v2592_v22  ;;  %1396 = vadd.xlane.f32.xlu1 %v1293_v53  ;;  %v1291_v1 = vmul.f32 %v2786_v49, %v2786_v49 }
 0x202   :  { %v1159_v60 = vpop.f32.mrf.mxu1 }
 0x203   :  { %1390 = vadd.xlane.f32.xlu0 %v1290_v59  ;;  %v2798_v5 = vadd.f32 %v2592_v22, %v1159_v60  ;;  %v1296_v9 = vmul.f32 %v2791_v57, %v2791_v57 }
 0x204   :  { %v2051_v2 = vpop.f32.mrf.mxu1 }
 0x205   :  { %v2801_v7 = vadd.f32 %v2051_v2, %v2592_v22  ;;  %1392 = vadd.xlane.f32.xlu1 %v1291_v1  ;;  %v1294_v23 = vmul.f32 %v2798_v5, %v2798_v5 }
 0x206   :  { %v1162_v10 = vpop.f32.mrf.mxu1 }
 0x207   :  { %v2806_v13 = vadd.f32 %v2592_v22, %v1162_v10  ;;  %1402 = vadd.xlane.f32.xlu0 %v1296_v9  ;;  %v1297_v14 = vmul.f32 %v2801_v7, %v2801_v7 }
 0x208   :  { %v2054_v19 = vpop.f32.mrf.mxu1 }
 0x209   :  { %v2811_v20 = vadd.f32 %v2054_v19, %v2592_v22  ;;  %1404 = vadd.xlane.f32.xlu1 %v1297_v14  ;;  %v1295_v32 = vmul.f32 %v2806_v13, %v2806_v13 }
 0x20a   :  { %v1175_v27 = vpop.f32.mrf.mxu1 }
 0x20b   :  { %1398 = vadd.xlane.f32.xlu0 %v1294_v23  ;;  %v2818_v36 = vadd.f32 %v2592_v22, %v1175_v27  ;;  %v1300_v46 = vmul.f32 %v2811_v20, %v2811_v20 }
 0x20c   :  { %v2055_v33 = vpop.f32.mrf.mxu1 }
 0x20d   :  { %v2821_v37 = vadd.f32 %v2055_v33, %v2592_v22  ;;  %1400 = vadd.xlane.f32.xlu1 %v1295_v32  ;;  %v1298_v1 = vmul.f32 %v2818_v36, %v2818_v36 }
 0x20e   :  { %v1178_v47 = vpop.f32.mrf.mxu1 }
 0x20f   :  { %v2826_v53 = vadd.f32 %v2592_v22, %v1178_v47  ;;  %1410 = vadd.xlane.f32.xlu0 %v1300_v46  ;;  %v1301_v56 = vmul.f32 %v2821_v37, %v2821_v37 }
 0x210   :  { %v2058_v59 = vpop.f32.mrf.mxu1 }
 0x211   :  { %v2831_v60 = vadd.f32 %v2058_v59, %v2592_v22  ;;  %1412 = vadd.xlane.f32.xlu1 %v1301_v56  ;;  %v1299_v9 = vmul.f32 %v2826_v53, %v2826_v53 }
 0x212   :  { %v1191_v2 = vpop.f32.mrf.mxu1 }
 0x213   :  { %1406 = vadd.xlane.f32.xlu0 %v1298_v1  ;;  %v2838_v14 = vadd.f32 %v2592_v22, %v1191_v2  ;;  %v1304_v23 = vmul.f32 %v2831_v60, %v2831_v60 }
 0x214   :  { %v2059_v10 = vpop.f32.mrf.mxu1 }
 0x215   :  { %3002 = vst [vmem:[#allocation5_spill] sm:$0xff] %v2838_v14  ;;  %v2841_v19 = vadd.f32 %v2059_v10, %v2592_v22  ;;  %1408 = vadd.xlane.f32.xlu1 %v1299_v9  ;;  %v1302_v56 = vmul.f32 %v2838_v14, %v2838_v14 }
 0x216   :  { %v1194_v27 = vpop.f32.mrf.mxu1 }
 0x217   :  { %3003 = vst [vmem:[#allocation6_spill] sm:$0xff] %v2841_v19  ;;  %v2846_v32 = vadd.f32 %v2592_v22, %v1194_v27  ;;  %1418 = vadd.xlane.f32.xlu0 %v1304_v23  ;;  %v1305_v33 = vmul.f32 %v2841_v19, %v2841_v19 }
 0x218   :  { %v2062_v46 = vpop.f32.mrf.mxu1 }
 0x219   :  { %3004 = vst [vmem:[#allocation7_spill] sm:$0xff] %v2846_v32  ;;  %v2851_v47 = vadd.f32 %v2062_v46, %v2592_v22  ;;  %1420 = vadd.xlane.f32.xlu1 %v1305_v33  ;;  %v1303_v1 = vmul.f32 %v2846_v32, %v2846_v32 }
 0x21a   :  { %v1207_v59 = vpop.f32.mrf.mxu1 }
 0x21b   :  { %3005 = vst [vmem:[#allocation8_spill] sm:$0xff] %v2851_v47  ;;  %1414 = vadd.xlane.f32.xlu0 %v1302_v56  ;;  %v2858_v9 = vadd.f32 %v2592_v22, %v1207_v59  ;;  %v1308_v23 = vmul.f32 %v2851_v47, %v2851_v47 }
 0x21c   :  { %v2063_v2 = vpop.f32.mrf.mxu1 }
 0x21d   :  { %3006 = vst [vmem:[#allocation9_spill] sm:$0xff] %v2858_v9  ;;  %v2861_v10 = vadd.f32 %v2063_v2, %v2592_v22  ;;  %1416 = vadd.xlane.f32.xlu1 %v1303_v1  ;;  %v1306_v59 = vmul.f32 %v2858_v9, %v2858_v9 }
 0x21e   :  { %v1210_v27 = vpop.f32.mrf.mxu1 }
 0x21f   :  { %3007 = vst [vmem:[#allocation10_spill] sm:$0xff] %v2861_v10  ;;  %v2866_v33 = vadd.f32 %v2592_v22, %v1210_v27  ;;  %1426 = vadd.xlane.f32.xlu0 %v1308_v23  ;;  %v1309_v46 = vmul.f32 %v2861_v10, %v2861_v10 }
 0x220   :  { %v2066_v56 = vpop.f32.mrf.mxu1 }
 0x221   :  { %3008 = vst [vmem:[#allocation11_spill] sm:$0xff] %v2866_v33  ;;  %v2871_v32 = vadd.f32 %v2066_v56, %v2592_v22  ;;  %1428 = vadd.xlane.f32.xlu1 %v1309_v46  ;;  %v1307_v2 = vmul.f32 %v2866_v33, %v2866_v33 }
 0x222   :  { %v1223_v1 = vpop.f32.mrf.mxu1 }
 0x223   :  { %3009 = vst [vmem:[#allocation12_spill] sm:$0xff] %v2871_v32  ;;  %1422 = vadd.xlane.f32.xlu0 %v1306_v59  ;;  %v2878_v27 = vadd.f32 %v2592_v22, %v1223_v1  ;;  %v1312_v56 = vmul.f32 %v2871_v32, %v2871_v32 }
 0x224   :  { %v2067_v47 = vpop.f32.mrf.mxu1 }
 0x225   :  { %3010 = vst [vmem:[#allocation13_spill] sm:$0xff] %v2878_v27  ;;  %v2881_v23 = vadd.f32 %v2067_v47, %v2592_v22  ;;  %1424 = vadd.xlane.f32.xlu1 %v1307_v2  ;;  %v1310_v1 = vmul.f32 %v2878_v27, %v2878_v27 }
 0x226   :  { %v1226_v46 = vpop.f32.mrf.mxu1 }
 0x227   :  { %3011 = vst [vmem:[#allocation14_spill] sm:$0xff] %v2881_v23  ;;  %v2886_v10 = vadd.f32 %v2592_v22, %v1226_v46  ;;  %1434 = vadd.xlane.f32.xlu0 %v1312_v56  ;;  %v1313_v59 = vmul.f32 %v2881_v23, %v2881_v23 }
 0x228   :  { %v2070_v33 = vpop.f32.mrf.mxu1 }
 0x229   :  { %3012 = vst [vmem:[#allocation15_spill] sm:$0xff] %v2886_v10  ;;  %1436 = vadd.xlane.f32.xlu1 %v1313_v59  ;;  %v1311_v2 = vmul.f32 %v2886_v10, %v2886_v10  ;;  %v2898_v46 = vadd.f32 %v2070_v33, %v2592_v22 }
 0x22a   :  { %v1239_v9 = vpop.f32.mrf.mxu1 }
 0x22b   :  { %v2893_v47 = vadd.f32 %v2592_v22, %v1239_v9  ;;  %1430 = vadd.xlane.f32.xlu0 %v1310_v1  ;;  %3014 = vst [vmem:[#allocation17_spill] sm:$0xff] %v2898_v46  ;;  %v1316_v10 = vmul.f32 %v2898_v46, %v2898_v46 }
 0x22c   :  { %v2071_v32 = vpop.f32.mrf.mxu1 }
 0x22d   :  { %3013 = vst [vmem:[#allocation16_spill] sm:$0xff] %v2893_v47  ;;  %1432 = vadd.xlane.f32.xlu1 %v1311_v2  ;;  %v1314_v56 = vmul.f32 %v2893_v47, %v2893_v47  ;;  %v2906_v9 = vadd.f32 %v2071_v32, %v2592_v22 }
 0x22e   :  { %v1242_v59 = vpop.f32.mrf.mxu1 }
 0x22f   :  { %v2903_v23 = vadd.f32 %v2592_v22, %v1242_v59  ;;  %1438 = vadd.xlane.f32.xlu0 %v1314_v56  ;;  %3016 = vst [vmem:[#allocation19_spill] sm:$0xff] %v2906_v9  ;;  %v1317_v33 = vmul.f32 %v2906_v9, %v2906_v9 }
 0x231   :  { %3015 = vst [vmem:[#allocation18_spill] sm:$0xff] %v2903_v23  ;;  %v1315_v1 = vmul.f32 %v2903_v23, %v2903_v23 }
 0x233   :  { %1440 = vadd.xlane.f32.xlu1 %v1315_v1  ;;  %1442 = vadd.xlane.f32.xlu0 %v1316_v10 }
 0x237   :  { %1444 = vadd.xlane.f32.xlu1 %v1317_v33 }
 0x23e   :  { %v1323_v2 = vpop.xlane.xlu1 %1322 }
 0x23f   :  { %v1448_v47 = vmax.f32 %v1323_v2, 1e-24 }
 0x240   :  { %v1319_v59 = vpop.xlane.xlu0 %1318 }
 0x241   :  { %2125 = vrsqrt.f32 %v1448_v47  ;;  %v1446_v56 = vmax.f32 %v1319_v59, 1e-24 }
 0x242   :  { %v1325_v27 = vpop.xlane.xlu1 %1324 }
 0x243   :  { %2127 = vrsqrt.f32 %v1446_v56  ;;  %v1449_v22 = vmax.f32 %v1325_v27, 1e-24 }
 0x244   :  { %v1321_v32 = vpop.xlane.xlu0 %1320 }
 0x245   :  { %2129 = vrsqrt.f32 %v1449_v22  ;;  %v1447_v23 = vmax.f32 %v1321_v32, 1e-24 }
 0x247   :  { %2131 = vrsqrt.f32 %v1447_v23 }
 0x248   :  { %v1331_v14 = vpop.xlane.xlu0 %1330 }
 0x249   :  { %v1452_v46 = vmax.f32 %v1331_v14, 1e-24 }
 0x24a   :  { %v1333_v1 = vpop.xlane.xlu1 %1332 }
 0x24b   :  { %2133 = vrsqrt.f32 %v1452_v46  ;;  %v1453_v10 = vmax.f32 %v1333_v1, 1e-24 }
 0x24c   :  { %v1327_v19 = vpop.xlane.xlu0 %1326 }
 0x24d   :  { %2135 = vrsqrt.f32 %v1453_v10  ;;  %v1450_v33 = vmax.f32 %v1327_v19, 1e-24 }
 0x24e   :  { %v2126_v9 = vpop.eup %2125  ;;  %v1329_v2 = vpop.xlane.xlu1 %1328 }
 0x24f   :  { %v1576_v47 = vmul.f32 %v2126_v9, %v2595_v24  ;;  %2137 = vrsqrt.f32 %v1450_v33  ;;  %v1451_v59 = vmax.f32 %v1329_v2, 1e-24 }
 0x250   :  { %v2128_v56 = vpop.eup %2127  ;;  %v1339_v27 = vpop.xlane.xlu0 %1338 }
 0x251   :  { %1640 = vst [vmem:[#allocation2 + $0x10] sm:$0xff] %v1576_v47  ;;  %v1574_v22 = vmul.f32 %v2128_v56, %v2598_v25  ;;  %2139 = vrsqrt.f32 %v1451_v59  ;;  %v1456_v23 = vmax.f32 %v1339_v27, 1e-24 }
 0x252   :  { %v2130_v14 = vpop.eup %2129  ;;  %v1341_v32 = vpop.xlane.xlu1 %1340 }
 0x253   :  { %1638 = vst [vmem:[#allocation2] sm:$0xff] %v1574_v22  ;;  %v1577_v46 = vmul.f32 %v2130_v14, %v2603_v28  ;;  %2141 = vrsqrt.f32 %v1456_v23  ;;  %v1457_v19 = vmax.f32 %v1341_v32, 1e-24 }
 0x254   :  { %v2132_v1 = vpop.eup %2131  ;;  %v1335_v10 = vpop.xlane.xlu0 %1334 }
 0x255   :  { %1641 = vst [vmem:[#allocation2 + $0x18] sm:$0xff] %v1577_v46  ;;  %v1575_v24 = vmul.f32 %v2132_v1, %v2608_v31  ;;  %2143 = vrsqrt.f32 %v1457_v19  ;;  %v1454_v9 = vmax.f32 %v1335_v10, 1e-24 }
 0x256   :  { %v1337_v33 = vpop.xlane.xlu1 %1336 }
 0x257   :  { %1639 = vst [vmem:[#allocation2 + $0x8] sm:$0xff] %v1575_v24  ;;  %2145 = vrsqrt.f32 %v1454_v9  ;;  %v1455_v25 = vmax.f32 %v1337_v33, 1e-24 }
 0x258   :  { %v2134_v2 = vpop.eup %2133  ;;  %v1347_v47 = vpop.xlane.xlu0 %1346 }
 0x259   :  { %v1580_v59 = vmul.f32 %v2134_v2, %v2613_v34  ;;  %2147 = vrsqrt.f32 %v1455_v25  ;;  %v1460_v56 = vmax.f32 %v1347_v47, 1e-24 }
 0x25a   :  { %v2136_v28 = vpop.eup %2135  ;;  %v1349_v27 = vpop.xlane.xlu1 %1348 }
 0x25b   :  { %1644 = vst [vmem:[#allocation2 + $0x30] sm:$0xff] %v1580_v59  ;;  %v1581_v22 = vmul.f32 %v2136_v28, %v2621_v39  ;;  %2149 = vrsqrt.f32 %v1460_v56  ;;  %v1461_v23 = vmax.f32 %v1349_v27, 1e-24 }
 0x25c   :  { %v2138_v31 = vpop.eup %2137  ;;  %v1343_v14 = vpop.xlane.xlu0 %1342 }
 0x25d   :  { %1645 = vst [vmem:[#allocation2 + $0x38] sm:$0xff] %v1581_v22  ;;  %v1578_v32 = vmul.f32 %v2138_v31, %v2618_v38  ;;  %2151 = vrsqrt.f32 %v1461_v23  ;;  %v1458_v46 = vmax.f32 %v1343_v14, 1e-24 }
 0x25e   :  { %v2140_v19 = vpop.eup %2139  ;;  %v1345_v1 = vpop.xlane.xlu1 %1344 }
 0x25f   :  { %1642 = vst [vmem:[#allocation2 + $0x20] sm:$0xff] %v1578_v32  ;;  %v1579_v34 = vmul.f32 %v2140_v19, %v2626_v42  ;;  %2153 = vrsqrt.f32 %v1458_v46  ;;  %v1459_v10 = vmax.f32 %v1345_v1, 1e-24 }
 0x260   :  { %v2142_v24 = vpop.eup %2141  ;;  %v1355_v9 = vpop.xlane.xlu0 %1354 }
 0x261   :  { %1643 = vst [vmem:[#allocation2 + $0x28] sm:$0xff] %v1579_v34  ;;  %v1584_v39 = vmul.f32 %v2142_v24, %v2631_v45  ;;  %2155 = vrsqrt.f32 %v1459_v10  ;;  %v1464_v33 = vmax.f32 %v1355_v9, 1e-24 }
 0x262   :  { %v2144_v25 = vpop.eup %2143  ;;  %v1357_v2 = vpop.xlane.xlu1 %1356 }
 0x263   :  { %1648 = vst [vmem:[#allocation2 + $0x50] sm:$0xff] %v1584_v39  ;;  %v1585_v38 = vmul.f32 %v2144_v25, %v2641_v51  ;;  %2157 = vrsqrt.f32 %v1464_v33  ;;  %v1465_v47 = vmax.f32 %v1357_v2, 1e-24 }
 0x264   :  { %v2146_v59 = vpop.eup %2145  ;;  %v1351_v56 = vpop.xlane.xlu0 %1350 }
 0x265   :  { %1649 = vst [vmem:[#allocation2 + $0x58] sm:$0xff] %v1585_v38  ;;  %v1582_v42 = vmul.f32 %v2146_v59, %v2638_v50  ;;  %2159 = vrsqrt.f32 %v1465_v47  ;;  %v1462_v28 = vmax.f32 %v1351_v56, 1e-24 }
 0x266   :  { %v2148_v27 = vpop.eup %2147  ;;  %v1353_v22 = vpop.xlane.xlu1 %1352 }
 0x267   :  { %1646 = vst [vmem:[#allocation2 + $0x40] sm:$0xff] %v1582_v42  ;;  %v1583_v45 = vmul.f32 %v2148_v27, %v2646_v55  ;;  %2161 = vrsqrt.f32 %v1462_v28  ;;  %v1463_v23 = vmax.f32 %v1353_v22, 1e-24 }
 0x268   :  { %v2150_v31 = vpop.eup %2149  ;;  %v1363_v14 = vpop.xlane.xlu0 %1362 }
 0x269   :  { %1647 = vst [vmem:[#allocation2 + $0x48] sm:$0xff] %v1583_v45  ;;  %v1588_v51 = vmul.f32 %v2150_v31, %v2651_v58  ;;  %2163 = vrsqrt.f32 %v1463_v23  ;;  %v1468_v32 = vmax.f32 %v1363_v14, 1e-24 }
 0x26a   :  { %v2152_v46 = vpop.eup %2151  ;;  %v1365_v19 = vpop.xlane.xlu1 %1364 }
 0x26b   :  { %1652 = vst [vmem:[#allocation2 + $0x70] sm:$0xff] %v1588_v51  ;;  %v1589_v50 = vmul.f32 %v2152_v46, %v2661_v0  ;;  %2165 = vrsqrt.f32 %v1468_v32  ;;  %v1469_v1 = vmax.f32 %v1365_v19, 1e-24 }
 0x26c   :  { %v2154_v34 = vpop.eup %2153  ;;  %v1359_v10 = vpop.xlane.xlu0 %1358 }
 0x26d   :  { %1653 = vst [vmem:[#allocation2 + $0x78] sm:$0xff] %v1589_v50  ;;  %v1586_v55 = vmul.f32 %v2154_v34, %v2658_v63  ;;  %2167 = vrsqrt.f32 %v1469_v1  ;;  %v1466_v24 = vmax.f32 %v1359_v10, 1e-24 }
 0x26e   :  { %v2156_v9 = vpop.eup %2155  ;;  %v1361_v39 = vpop.xlane.xlu1 %1360 }
 0x26f   :  { %1650 = vst [vmem:[#allocation2 + $0x60] sm:$0xff] %v1586_v55  ;;  %v1587_v58 = vmul.f32 %v2156_v9, %v2666_v3  ;;  %2169 = vrsqrt.f32 %v1466_v24  ;;  %v1467_v33 = vmax.f32 %v1361_v39, 1e-24 }
 0x270   :  { %v2158_v25 = vpop.eup %2157  ;;  %v1371_v2 = vpop.xlane.xlu0 %1370 }
 0x271   :  { %1651 = vst [vmem:[#allocation2 + $0x68] sm:$0xff] %v1587_v58  ;;  %v1592_v0 = vmul.f32 %v2158_v25, %v2671_v6  ;;  %2171 = vrsqrt.f32 %v1467_v33  ;;  %v1472_v38 = vmax.f32 %v1371_v2, 1e-24 }
 0x272   :  { %v2160_v47 = vpop.eup %2159  ;;  %v1373_v59 = vpop.xlane.xlu1 %1372 }
 0x273   :  { %1656 = vst [vmem:[#allocation2 + $0x90] sm:$0xff] %v1592_v0  ;;  %v1593_v63 = vmul.f32 %v2160_v47, %v2681_v12  ;;  %2173 = vrsqrt.f32 %v1472_v38  ;;  %v1473_v56 = vmax.f32 %v1373_v59, 1e-24 }
 0x274   :  { %v2162_v42 = vpop.eup %2161  ;;  %v1367_v28 = vpop.xlane.xlu0 %1366 }
 0x275   :  { %1657 = vst [vmem:[#allocation2 + $0x98] sm:$0xff] %v1593_v63  ;;  %v1590_v3 = vmul.f32 %v2162_v42, %v2678_v11  ;;  %2175 = vrsqrt.f32 %v1473_v56  ;;  %v1470_v27 = vmax.f32 %v1367_v28, 1e-24 }
 0x276   :  { %v2164_v22 = vpop.eup %2163  ;;  %v1369_v45 = vpop.xlane.xlu1 %1368 }
 0x277   :  { %1654 = vst [vmem:[#allocation2 + $0x80] sm:$0xff] %v1590_v3  ;;  %v1591_v6 = vmul.f32 %v2164_v22, %v2686_v15  ;;  %2177 = vrsqrt.f32 %v1470_v27  ;;  %v1471_v23 = vmax.f32 %v1369_v45, 1e-24 }
 0x278   :  { %v2166_v31 = vpop.eup %2165  ;;  %v1379_v14 = vpop.xlane.xlu0 %1378 }
 0x279   :  { %1655 = vst [vmem:[#allocation2 + $0x88] sm:$0xff] %v1591_v6  ;;  %v1596_v12 = vmul.f32 %v2166_v31, %v2691_v18  ;;  %2179 = vrsqrt.f32 %v1471_v23  ;;  %v1476_v51 = vmax.f32 %v1379_v14, 1e-24 }
 0x27a   :  { %v2168_v32 = vpop.eup %2167  ;;  %v1381_v46 = vpop.xlane.xlu1 %1380 }
 0x27b   :  { %1660 = vst [vmem:[#allocation2 + $0xb0] sm:$0xff] %v1596_v12  ;;  %v1597_v11 = vmul.f32 %v2168_v32, %v2701_v26  ;;  %2181 = vrsqrt.f32 %v1476_v51  ;;  %v1477_v19 = vmax.f32 %v1381_v46, 1e-24 }
 0x27c   :  { %v2170_v50 = vpop.eup %2169  ;;  %v1375_v1 = vpop.xlane.xlu0 %1374 }
 0x27d   :  { %1661 = vst [vmem:[#allocation2 + $0xb8] sm:$0xff] %v1597_v11  ;;  %v1594_v15 = vmul.f32 %v2170_v50, %v2698_v52  ;;  %2183 = vrsqrt.f32 %v1477_v19  ;;  %v1474_v34 = vmax.f32 %v1375_v1, 1e-24 }
 0x27e   :  { %v2172_v10 = vpop.eup %2171  ;;  %v1377_v55 = vpop.xlane.xlu1 %1376 }
 0x27f   :  { %1658 = vst [vmem:[#allocation2 + $0xa0] sm:$0xff] %v1594_v15  ;;  %v1595_v18 = vmul.f32 %v2172_v10, %v2706_v30  ;;  %2185 = vrsqrt.f32 %v1474_v34  ;;  %v1475_v24 = vmax.f32 %v1377_v55, 1e-24 }
 0x280   :  { %v2174_v9 = vpop.eup %2173  ;;  %v1387_v39 = vpop.xlane.xlu0 %1386 }
 0x281   :  { %1659 = vst [vmem:[#allocation2 + $0xa8] sm:$0xff] %v1595_v18  ;;  %v1600_v26 = vmul.f32 %v2174_v9, %v2711_v35  ;;  %2187 = vrsqrt.f32 %v1475_v24  ;;  %v1480_v58 = vmax.f32 %v1387_v39, 1e-24 }
 0x282   :  { %v2176_v33 = vpop.eup %2175  ;;  %v1389_v25 = vpop.xlane.xlu1 %1388 }
 0x283   :  { %1664 = vst [vmem:[#allocation2 + $0xd0] sm:$0xff] %v1600_v26  ;;  %v1601_v52 = vmul.f32 %v2176_v33, %v2721_v44  ;;  %2189 = vrsqrt.f32 %v1480_v58  ;;  %v1481_v2 = vmax.f32 %v1389_v25, 1e-24 }
 0x284   :  { %v2178_v0 = vpop.eup %2177  ;;  %v1383_v38 = vpop.xlane.xlu0 %1382 }
 0x285   :  { %1665 = vst [vmem:[#allocation2 + $0xd8] sm:$0xff] %v1601_v52  ;;  %v1598_v30 = vmul.f32 %v2178_v0, %v2718_v43  ;;  %2191 = vrsqrt.f32 %v1481_v2  ;;  %v1478_v47 = vmax.f32 %v1383_v38, 1e-24 }
 0x286   :  { %v2180_v59 = vpop.eup %2179  ;;  %v1385_v63 = vpop.xlane.xlu1 %1384 }
 0x287   :  { %1662 = vst [vmem:[#allocation2 + $0xc0] sm:$0xff] %v1598_v30  ;;  %v1599_v35 = vmul.f32 %v2180_v59, %v2726_v48  ;;  %2193 = vrsqrt.f32 %v1478_v47  ;;  %v1479_v56 = vmax.f32 %v1385_v63, 1e-24 }
 0x288   :  { %v2182_v42 = vpop.eup %2181  ;;  %v1395_v28 = vpop.xlane.xlu0 %1394 }
 0x289   :  { %1663 = vst [vmem:[#allocation2 + $0xc8] sm:$0xff] %v1599_v35  ;;  %v1604_v44 = vmul.f32 %v2182_v42, %v2731_v54  ;;  %2195 = vrsqrt.f32 %v1479_v56  ;;  %v1484_v3 = vmax.f32 %v1395_v28, 1e-24 }
 0x28a   :  { %v2184_v27 = vpop.eup %2183  ;;  %v1397_v22 = vpop.xlane.xlu1 %1396 }
 0x28b   :  { %1668 = vst [vmem:[#allocation2 + $0xf0] sm:$0xff] %v1604_v44  ;;  %v1605_v43 = vmul.f32 %v2184_v27, %v2741_v62  ;;  %2197 = vrsqrt.f32 %v1484_v3  ;;  %v1485_v45 = vmax.f32 %v1397_v22, 1e-24 }
 0x28c   :  { %v2186_v6 = vpop.eup %2185  ;;  %v1391_v23 = vpop.xlane.xlu0 %1390 }
 0x28d   :  { %1669 = vst [vmem:[#allocation2 + $0xf8] sm:$0xff] %v1605_v43  ;;  %v1602_v48 = vmul.f32 %v2186_v6, %v2738_v61  ;;  %2199 = vrsqrt.f32 %v1485_v45  ;;  %v1482_v31 = vmax.f32 %v1391_v23, 1e-24 }
 0x28e   :  { %v2188_v14 = vpop.eup %2187  ;;  %v1393_v12 = vpop.xlane.xlu1 %1392 }
 0x28f   :  { %1666 = vst [vmem:[#allocation2 + $0xe0] sm:$0xff] %v1602_v48  ;;  %v1603_v54 = vmul.f32 %v2188_v14, %v2746_v4  ;;  %2201 = vrsqrt.f32 %v1482_v31  ;;  %v1483_v51 = vmax.f32 %v1393_v12, 1e-24 }
 0x290   :  { %v2190_v32 = vpop.eup %2189  ;;  %v1403_v46 = vpop.xlane.xlu0 %1402 }
 0x291   :  { %1667 = vst [vmem:[#allocation2 + $0xe8] sm:$0xff] %v1603_v54  ;;  %v1608_v62 = vmul.f32 %v2190_v32, %v2751_v8  ;;  %2203 = vrsqrt.f32 %v1483_v51  ;;  %v1488_v11 = vmax.f32 %v1403_v46, 1e-24 }
 0x292   :  { %v2192_v19 = vpop.eup %2191  ;;  %v1405_v50 = vpop.xlane.xlu1 %1404 }
 0x293   :  { %1672 = vst [vmem:[#allocation2 + $0x110] sm:$0xff] %v1608_v62  ;;  %v1609_v61 = vmul.f32 %v2192_v19, %v2761_v17  ;;  %2205 = vrsqrt.f32 %v1488_v11  ;;  %v1489_v1 = vmax.f32 %v1405_v50, 1e-24 }
 0x294   :  { %v2194_v15 = vpop.eup %2193  ;;  %v1399_v34 = vpop.xlane.xlu0 %1398 }
 0x295   :  { %1673 = vst [vmem:[#allocation2 + $0x118] sm:$0xff] %v1609_v61  ;;  %v1606_v4 = vmul.f32 %v2194_v15, %v2758_v16  ;;  %2207 = vrsqrt.f32 %v1489_v1  ;;  %v1486_v10 = vmax.f32 %v1399_v34, 1e-24 }
 0x296   :  { %v2196_v55 = vpop.eup %2195  ;;  %v1401_v18 = vpop.xlane.xlu1 %1400 }
 0x297   :  { %1670 = vst [vmem:[#allocation2 + $0x100] sm:$0xff] %v1606_v4  ;;  %v1607_v8 = vmul.f32 %v2196_v55, %v2766_v21  ;;  %2209 = vrsqrt.f32 %v1486_v10  ;;  %v1487_v24 = vmax.f32 %v1401_v18, 1e-24 }
 0x298   :  { %v2198_v9 = vpop.eup %2197  ;;  %v1411_v39 = vpop.xlane.xlu0 %1410 }
 0x299   :  { %1671 = vst [vmem:[#allocation2 + $0x108] sm:$0xff] %v1607_v8  ;;  %v1612_v17 = vmul.f32 %v2198_v9, %v2771_v29  ;;  %2211 = vrsqrt.f32 %v1487_v24  ;;  %v1492_v26 = vmax.f32 %v1411_v39, 1e-24 }
 0x29a   :  { %v2200_v58 = vpop.eup %2199  ;;  %v1413_v33 = vpop.xlane.xlu1 %1412 }
 0x29b   :  { %1676 = vst [vmem:[#allocation2 + $0x130] sm:$0xff] %v1612_v17  ;;  %v1613_v16 = vmul.f32 %v2200_v58, %v2781_v41  ;;  %2213 = vrsqrt.f32 %v1492_v26  ;;  %v1493_v25 = vmax.f32 %v1413_v33, 1e-24  ;;  %v3020_v33 = vld [vmem:[#allocation8_spill] sm:$0xff] }
 0x29c   :  { %v2202_v52 = vpop.eup %2201  ;;  %v1407_v2 = vpop.xlane.xlu0 %1406 }
 0x29d   :  { %1677 = vst [vmem:[#allocation2 + $0x138] sm:$0xff] %v1613_v16  ;;  %v1610_v21 = vmul.f32 %v2202_v52, %v2778_v40  ;;  %2215 = vrsqrt.f32 %v1493_v25  ;;  %v1490_v0 = vmax.f32 %v1407_v2, 1e-24  ;;  %v3021_v2 = vld [vmem:[#allocation10_spill] sm:$0xff] }
 0x29e   :  { %v2204_v38 = vpop.eup %2203  ;;  %v1409_v30 = vpop.xlane.xlu1 %1408 }
 0x29f   :  { %1674 = vst [vmem:[#allocation2 + $0x120] sm:$0xff] %v1610_v21  ;;  %v1611_v29 = vmul.f32 %v2204_v38, %v2786_v49  ;;  %2217 = vrsqrt.f32 %v1490_v0  ;;  %v1491_v47 = vmax.f32 %v1409_v30, 1e-24 }
 0x2a0   :  { %v2206_v59 = vpop.eup %2205  ;;  %v1419_v63 = vpop.xlane.xlu0 %1418 }
 0x2a1   :  { %1675 = vst [vmem:[#allocation2 + $0x128] sm:$0xff] %v1611_v29  ;;  %v1616_v41 = vmul.f32 %v2206_v59, %v2791_v57  ;;  %2219 = vrsqrt.f32 %v1491_v47  ;;  %v1496_v35 = vmax.f32 %v1419_v63, 1e-24  ;;  %v3022_v29 = vld [vmem:[#allocation9_spill] sm:$0xff] }
 0x2a2   :  { %v2208_v56 = vpop.eup %2207  ;;  %v1421_v42 = vpop.xlane.xlu1 %1420 }
 0x2a3   :  { %1680 = vst [vmem:[#allocation2 + $0x150] sm:$0xff] %v1616_v41  ;;  %v1617_v40 = vmul.f32 %v2208_v56, %v2801_v7  ;;  %2221 = vrsqrt.f32 %v1496_v35  ;;  %v1497_v28 = vmax.f32 %v1421_v42, 1e-24  ;;  %v3023_v35 = vld [vmem:[#allocation11_spill] sm:$0xff] }
 0x2a4   :  { %v2210_v44 = vpop.eup %2209  ;;  %v1415_v3 = vpop.xlane.xlu0 %1414 }
 0x2a5   :  { %1681 = vst [vmem:[#allocation2 + $0x158] sm:$0xff] %v1617_v40  ;;  %v1614_v49 = vmul.f32 %v2210_v44, %v2798_v5  ;;  %2223 = vrsqrt.f32 %v1497_v28  ;;  %v1494_v27 = vmax.f32 %v1415_v3, 1e-24  ;;  %v3024_v28 = vld [vmem:[#allocation12_spill] sm:$0xff] }
 0x2a6   :  { %v2212_v22 = vpop.eup %2211  ;;  %v1417_v43 = vpop.xlane.xlu1 %1416 }
 0x2a7   :  { %1678 = vst [vmem:[#allocation2 + $0x140] sm:$0xff] %v1614_v49  ;;  %v1615_v57 = vmul.f32 %v2212_v22, %v2806_v13  ;;  %2225 = vrsqrt.f32 %v1494_v27  ;;  %v1495_v45 = vmax.f32 %v1417_v43, 1e-24  ;;  %v3025_v27 = vld [vmem:[#allocation14_spill] sm:$0xff] }
 0x2a8   :  { %v2214_v6 = vpop.eup %2213  ;;  %v1427_v23 = vpop.xlane.xlu0 %1426 }
 0x2a9   :  { %1679 = vst [vmem:[#allocation2 + $0x148] sm:$0xff] %v1615_v57  ;;  %v1620_v7 = vmul.f32 %v2214_v6, %v2811_v20  ;;  %2227 = vrsqrt.f32 %v1495_v45  ;;  %v1500_v48 = vmax.f32 %v1427_v23, 1e-24  ;;  %v3026_v57 = vld [vmem:[#allocation13_spill] sm:$0xff]  ;;  %v3027_v23 = vld [vmem:[#allocation15_spill] sm:$0xff] }
 0x2aa   :  { %v2216_v31 = vpop.eup %2215  ;;  %v1429_v14 = vpop.xlane.xlu1 %1428 }
 0x2ab   :  { %1684 = vst [vmem:[#allocation2 + $0x170] sm:$0xff] %v1620_v7  ;;  %v1621_v5 = vmul.f32 %v2216_v31, %v2821_v37  ;;  %2229 = vrsqrt.f32 %v1500_v48  ;;  %v1501_v12 = vmax.f32 %v1429_v14, 1e-24  ;;  %v3028_v31 = vld [vmem:[#allocation16_spill] sm:$0xff] }
 0x2ac   :  { %v2218_v54 = vpop.eup %2217  ;;  %v1423_v51 = vpop.xlane.xlu0 %1422 }
 0x2ad   :  { %1685 = vst [vmem:[#allocation2 + $0x178] sm:$0xff] %v1621_v5  ;;  %v1618_v13 = vmul.f32 %v2218_v54, %v2818_v36  ;;  %2231 = vrsqrt.f32 %v1501_v12  ;;  %v1498_v32 = vmax.f32 %v1423_v51, 1e-24  ;;  %v3017_v36 = vld [vmem:[#allocation6_spill] sm:$0xff] }
 0x2ae   :  { %v2220_v46 = vpop.eup %2219  ;;  %v1425_v62 = vpop.xlane.xlu1 %1424  ;;  %v3029_v54 = vld [vmem:[#allocation18_spill] sm:$0xff] }
 0x2af   :  { %1682 = vst [vmem:[#allocation2 + $0x160] sm:$0xff] %v1618_v13  ;;  %v1619_v20 = vmul.f32 %v2220_v46, %v2826_v53  ;;  %2233 = vrsqrt.f32 %v1498_v32  ;;  %v1499_v11 = vmax.f32 %v1425_v62, 1e-24  ;;  %v3018_v53 = vld [vmem:[#allocation5_spill] sm:$0xff]  ;;  %v3031_v62 = vld [vmem:[#allocation19_spill] sm:$0xff] }
 0x2b0   :  { %v2222_v19 = vpop.eup %2221  ;;  %v1435_v50 = vpop.xlane.xlu0 %1434  ;;  %v3030_v13 = vld [vmem:[#allocation17_spill] sm:$0xff] }
 0x2b1   :  { %1683 = vst [vmem:[#allocation2 + $0x168] sm:$0xff] %v1619_v20  ;;  %v1624_v37 = vmul.f32 %v2222_v19, %v2831_v60  ;;  %2235 = vrsqrt.f32 %v1499_v11  ;;  %v1504_v61 = vmax.f32 %v1435_v50, 1e-24  ;;  %v3019_v60 = vld [vmem:[#allocation7_spill] sm:$0xff] }
 0x2b2   :  { %v2224_v1 = vpop.eup %2223  ;;  %v1437_v15 = vpop.xlane.xlu1 %1436 }
 0x2b3   :  { %1688 = vst [vmem:[#allocation2 + $0x190] sm:$0xff] %v1624_v37  ;;  %v1625_v34 = vmul.f32 %v2224_v1, %v3017_v36  ;;  %2237 = vrsqrt.f32 %v1504_v61  ;;  %v1505_v4 = vmax.f32 %v1437_v15, 1e-24 }
 0x2b4   :  { %v2226_v10 = vpop.eup %2225  ;;  %v1431_v55 = vpop.xlane.xlu0 %1430 }
 0x2b5   :  { %1689 = vst [vmem:[#allocation2 + $0x198] sm:$0xff] %v1625_v34  ;;  %v1622_v18 = vmul.f32 %v2226_v10, %v3018_v53  ;;  %2239 = vrsqrt.f32 %v1505_v4  ;;  %v1502_v8 = vmax.f32 %v1431_v55, 1e-24 }
 0x2b6   :  { %v2228_v24 = vpop.eup %2227  ;;  %v1433_v9 = vpop.xlane.xlu1 %1432 }
 0x2b7   :  { %1686 = vst [vmem:[#allocation2 + $0x180] sm:$0xff] %v1622_v18  ;;  %v1623_v39 = vmul.f32 %v2228_v24, %v3019_v60  ;;  %2241 = vrsqrt.f32 %v1502_v8  ;;  %v1503_v17 = vmax.f32 %v1433_v9, 1e-24 }
 0x2b8   :  { %v2230_v26 = vpop.eup %2229  ;;  %v1439_v58 = vpop.xlane.xlu0 %1438 }
 0x2b9   :  { %1687 = vst [vmem:[#allocation2 + $0x188] sm:$0xff] %v1623_v39  ;;  %v1628_v16 = vmul.f32 %v2230_v26, %v3020_v33  ;;  %2243 = vrsqrt.f32 %v1503_v17  ;;  %v1506_v25 = vmax.f32 %v1439_v58, 1e-24 }
 0x2ba   :  { %v2232_v52 = vpop.eup %2231 }
 0x2bb   :  { %1692 = vst [vmem:[#allocation2 + $0x1b0] sm:$0xff] %v1628_v16  ;;  %v1629_v21 = vmul.f32 %v2232_v52, %v3021_v2  ;;  %2245 = vrsqrt.f32 %v1506_v25 }
 0x2bc   :  { %v2234_v0 = vpop.eup %2233  ;;  %v1441_v38 = vpop.xlane.xlu1 %1440 }
 0x2bd   :  { %v1443_v30 = vpop.xlane.xlu0 %1442  ;;  %1693 = vst [vmem:[#allocation2 + $0x1b8] sm:$0xff] %v1629_v21  ;;  %v1626_v47 = vmul.f32 %v2234_v0, %v3022_v29  ;;  %v1507_v59 = vmax.f32 %v1441_v38, 1e-24 }
 0x2be   :  { %v1508_v63 = vmax.f32 %v1443_v30, 1e-24  ;;  %v2236_v41 = vpop.eup %2235 }
 0x2bf   :  { %1690 = vst [vmem:[#allocation2 + $0x1a0] sm:$0xff] %v1626_v47  ;;  %v1627_v56 = vmul.f32 %v2236_v41, %v3023_v35  ;;  %2247 = vrsqrt.f32 %v1507_v59 }
 0x2c0   :  { %v2238_v42 = vpop.eup %2237  ;;  %2249 = vrsqrt.f32 %v1508_v63  ;;  %v1445_v40 = vpop.xlane.xlu1 %1444 }
 0x2c1   :  { %1691 = vst [vmem:[#allocation2 + $0x1a8] sm:$0xff] %v1627_v56  ;;  %v1632_v44 = vmul.f32 %v2238_v42, %v3024_v28  ;;  %v1509_v3 = vmax.f32 %v1445_v40, 1e-24 }
 0x2c2   :  { %v2240_v49 = vpop.eup %2239 }
 0x2c3   :  { %1696 = vst [vmem:[#allocation2 + $0x1d0] sm:$0xff] %v1632_v44  ;;  %v1633_v22 = vmul.f32 %v2240_v49, %v3025_v27  ;;  %2251 = vrsqrt.f32 %v1509_v3 }
 0x2c4   :  { %v2242_v43 = vpop.eup %2241 }
 0x2c5   :  { %1697 = vst [vmem:[#allocation2 + $0x1d8] sm:$0xff] %v1633_v22  ;;  %v1630_v45 = vmul.f32 %v2242_v43, %v3026_v57 }
 0x2c6   :  { %v2244_v6 = vpop.eup %2243 }
 0x2c7   :  { %1694 = vst [vmem:[#allocation2 + $0x1c0] sm:$0xff] %v1630_v45  ;;  %v1631_v7 = vmul.f32 %v2244_v6, %v3027_v23 }
 0x2c8   :  { %v2246_v48 = vpop.eup %2245 }
 0x2c9   :  { %1695 = vst [vmem:[#allocation2 + $0x1c8] sm:$0xff] %v1631_v7  ;;  %v1634_v14 = vmul.f32 %v2246_v48, %v3028_v31 }
 0x2cb   :  { %1698 = vst [vmem:[#allocation2 + $0x1e0] sm:$0xff] %v1634_v14 }
 0x2cc   :  { %v2248_v5 = vpop.eup %2247 }
 0x2cd   :  { %v2250_v12 = vpop.eup %2249  ;;  %v1635_v51 = vmul.f32 %v2248_v5, %v3029_v54 }
 0x2ce   :  { %v1636_v32 = vmul.f32 %v2250_v12, %v3030_v13 }
 0x2cf   :  { %1699 = vst [vmem:[#allocation2 + $0x1e8] sm:$0xff] %v1635_v51 }
 0x2d0   :  { %v2252_v46 = vpop.eup %2251  ;;  %1700 = vst [vmem:[#allocation2 + $0x1f0] sm:$0xff] %v1636_v32 }
 0x2d1   :  { %v1637_v20 = vmul.f32 %v2252_v46, %v3031_v62 }
 0x2d3   :  { %1701 = vst [vmem:[#allocation2 + $0x1f8] sm:$0xff] %v1637_v20 }
 0x2d4   :  { %2264 = shalt.err (!%p2261_p4)
}
 0x2d5   :  { %s2276_s14 = smov 128   ;;  %s2277_s15 = smov 8  }
 0x2d6   :  { %1713 = dma.vmem_to_hbm [thread:$0]  %s1708_s12, 8192, %s2986_s5, [#allocation3], %s2276_s14, %s2276_s14, %s2277_s15  }
 0x2d7   :  { %2273 = dma.done.wait [#allocation3], 8192  }
 0x2d8   :  { %2274 = vsyncadd [#allocation3], 4294959104 }
 0x2d9   :  { %1717 = vsyncpa [#allocation3], 1 }

// kernel: hrnet_w48_contrast_forward.14
= control target key start
LH: loop header
LB: loop body
LE: loop exit
PB: predicated region body
PF: predicated region fallthrough
CT: control target
= control target key end

     0   :  { %s5177_s15 = smov 0   ;;  %s6608_s0 = inlined_call_operand.vmem [shape: f32[2,18,18,120], index: 0, kind: input, shape index: {}]   ;;  %s6609_s1 = inlined_call_operand.vmem [shape: bf16[9,120,120], index: 1, kind: input, shape index: {}]   ;;  %s6610_s2 = inlined_call_operand.vmem [shape: f32[1,120], index: 2, kind: input, shape index: {}]   ;;  %s6611_s3 = inlined_call_operand.vmem [shape: bf16[120,128], index: 3, kind: input, shape index: {}]   ;;  %s6612_s4 = inlined_call_operand.vmem [shape: f32[2,16,16,128], index: 4, kind: output, shape index: {}]  }
   0x1 LB: > { %s3761_s16 = sadd.s32 4294967295, %s5150_s15   ;;  %p3765_p0 = scmp.ge.s32.totalorder %s5150_s15, 1  ;;  %s5150_s15 = sphi %s5177_s15, %s14_s15  }
   0x2   : > { %p162_p1 = scmp.lt.s32.totalorder %s5150_s15, 3 }
   0x4   : > { %p163_p2 = pnand %p3765_p0, %p162_p1 }
   0x6   : > { %166 = sbr.rel (%p163_p2) target bundleno = 764 (0x2fc), region = 36 }
   0xb   : > { %v5064_v0 = vld [vmem:[%s6609_s1 + $0x74] ss:$0 sps:$4 sm:$0xff]   ;;  %vm420_vm0 = vcmask 1043456   ;;  %v5066_v1 = vld [vmem:[%s6609_s1 + $0x6c] sm:$0xff]   ;;  %v5065_v2 = vld [vmem:[%s6609_s1 + $0x38] ss:$0 sps:$4 sm:$0xff]  }
   0xc   : > { %5045 = vmatprep.subr.msk.bf16.mxu0 %vm420_vm0, %v5064_v0  ;;  %v422_v3 = vsel %vm420_vm0, %v5064_v0, 0  ;;  %v5067_v4 = vld [vmem:[%s6609_s1 + $0x30] sm:$0xff]   ;;  %5046 = vmatprep.subr.msk.bf16.mxu1 %vm420_vm0, %v5065_v2  ;;  %v679_v5 = vsel %vm420_vm0, %v5065_v2, 0  ;;  %v5068_v6 = vld [vmem:[%s6609_s1 + $0x64] sm:$0xff]   ;;  %p188_p3 = scmp.lt.s32.totalorder %s3761_s16, 1  ;;  %v5070_v8 = vld [vmem:[%s6609_s1 + $0x5c] sm:$0xff]  }
   0xd   : > { %4566 = vmatpush3.bf16.msra.mxu0 %v422_v3  ;;  %4614 = vmatpush3.bf16.msra.mxu1 %v679_v5  ;;  %v5069_v7 = vld [vmem:[%s6609_s1 + $0x28] sm:$0xff]   ;;  %v5071_v9 = vld [vmem:[%s6609_s1 + $0x20] sm:$0xff]   ;;  %v5072_v10 = vld [vmem:[%s6609_s1 + $0x54] sm:$0xff]   ;;  %vm371_vm1 = vcmask 982016  }
   0xe   : > { %4567 = vmatprep.subr.bf16.mxu0 %v5066_v1  ;;  %4615 = vmatprep.subr.bf16.mxu1 %v5067_v4  ;;  %s6666_s16 = smov (!%p188_p3, %s3761_s16), 1  ;;  %v5073_v11 = vld [vmem:[%s6609_s1 + $0x18] sm:$0xff]   ;;  %v5074_v14 = vld [vmem:[%s6609_s1 + $0x4c] sm:$0xff]   ;;  %v5076_v20 = vld [vmem:[%s6609_s1 + $0x44] sm:$0xff]  }
   0xf   : > { %s5055_s7 = smul.u32 432, %s6666_s16  ;;  %v5075_v18 = vld [vmem:[%s6609_s1 + $0x10] sm:$0xff]   ;;  %v5077_v21 = vld [vmem:[%s6609_s1 + $0x8] sm:$0xff]   ;;  %v5078_v22 = vld [vmem:[%s6609_s1 + $0x3c] sm:$0xff]   ;;  %s4324_s20 = sshll.u32 %s6666_s16, 8 }
  0x10   : > { %v5079_v23 = vld [vmem:[%s6609_s1] sm:$0xff]   ;;  %v5080_v28 = vld [vmem:[%s6609_s1 + $0xb0] ss:$0 sps:$4 sm:$0xff]   ;;  %v5081_v39 = vld [vmem:[%s6609_s1 + $0xa8] sm:$0xff]   ;;  %s6571_s23 = scalar_lea.vmem %s6612_s4, %s4324_s20 }
  0x11   : > { %4568 = vmatpush3.bf16.msra.mxu0 %v5066_v1  ;;  %4616 = vmatpush3.bf16.msra.mxu1 %v5067_v4  ;;  %s5222_s12 = scalar_lea.vmem %s6608_s0, %s5055_s7  ;;  %v1000_v35 = vsel %vm420_vm0, %v5080_v28, 0  ;;  %v5085_v40 = vld [vmem:[%s6609_s1 + $0xec] ss:$0 sps:$4 sm:$0xff]   ;;  %v5086_v45 = vld [vmem:[%s6609_s1 + $0xe4] sm:$0xff]   ;;  %v5083_v57 = vld [vmem:[%s6609_s1 + $0x98] sm:$0xff]  }
  0x12   : > { %4569 = vmatprep.subr.bf16.mxu0 %v5068_v6  ;;  %4617 = vmatprep.subr.bf16.mxu1 %v5069_v7  ;;  %v262_v12 = vld [vmem:[%s5222_s12 + $0x1] sm:$0xff]  ;;  %v263_v13 = vld [vmem:[%s5222_s12 + $0x9] sm:$0xff]  ;;  %v264_v24 = vld [vmem:[%s5222_s12 + $0x19] sm:$0xff]  ;;  %v1354_v44 = vsel %vm420_vm0, %v5085_v40, 0 }
  0x13   : > { %v294_v15 = vpack.c.bf16 %v263_v13, %v262_v12  ;;  %v199_v16 = vld [vmem:[%s5222_s12] sm:$0xff]  ;;  %v200_v17 = vld [vmem:[%s5222_s12 + $0x8] sm:$0xff]  ;;  %v201_v26 = vld [vmem:[%s5222_s12 + $0x18] sm:$0xff] }
  0x14   : > { %v231_v19 = vpack.c.bf16 %v200_v17, %v199_v16  ;;  %v265_v25 = vld [vmem:[%s5222_s12 + $0x21] sm:$0xff]  ;;  %v266_v29 = vld [vmem:[%s5222_s12 + $0x31] sm:$0xff]  ;;  %v267_v30 = vld [vmem:[%s5222_s12 + $0x39] sm:$0xff] }
  0x15   : > { %4570 = vmatpush3.bf16.msra.mxu0 %v5068_v6  ;;  %4618 = vmatpush3.bf16.msra.mxu1 %v5069_v7  ;;  %v202_v27 = vld [vmem:[%s5222_s12 + $0x20] sm:$0xff]  ;;  %v203_v31 = vld [vmem:[%s5222_s12 + $0x30] sm:$0xff]  ;;  %v204_v32 = vld [vmem:[%s5222_s12 + $0x38] sm:$0xff]  ;;  %v5262_v33 = vpack.c.bf16 %v265_v25, %v264_v24  ;;  %v5268_v36 = vpack.c.bf16 %v267_v30, %v266_v29 }
  0x16   : > { %4571 = vmatprep.subr.bf16.mxu0 %v5070_v8  ;;  %4619 = vmatprep.subr.bf16.mxu1 %v5071_v9  ;;  %v5264_v34 = vpack.c.bf16 %v202_v27, %v201_v26  ;;  %v5270_v37 = vpack.c.bf16 %v204_v32, %v203_v31  ;;  %v268_v38 = vld [vmem:[%s5222_s12 + $0x49] sm:$0xff]  ;;  %v269_v41 = vld [vmem:[%s5222_s12 + $0x51] sm:$0xff]  ;;  %v270_v46 = vld [vmem:[%s5222_s12 + $0x61] sm:$0xff] }
  0x17   : > { %4581 = vmatprep.mubr.msk.bf16.mxu0 %vm371_vm1, %v294_v15  ;;  %4629 = vmatprep.mubr.msk.bf16.mxu1 %vm371_vm1, %v231_v19  ;;  %v205_v42 = vld [vmem:[%s5222_s12 + $0x48] sm:$0xff]  ;;  %v206_v43 = vld [vmem:[%s5222_s12 + $0x50] sm:$0xff]  ;;  %v5082_v48 = vld [vmem:[%s6609_s1 + $0xa0] sm:$0xff]   ;;  %v5302_v51 = vpack.c.bf16 %v269_v41, %v268_v38 }
  0x18   : > { %v271_v47 = vld [vmem:[%s5222_s12 + $0x69] sm:$0xff]  ;;  %v207_v49 = vld [vmem:[%s5222_s12 + $0x60] sm:$0xff]  ;;  %v5304_v52 = vpack.c.bf16 %v206_v43, %v205_v42  ;;  %v209_v59 = vld [vmem:[%s5222_s12 + $0x78] sm:$0xff] }
  0x19   : > { %4572 = vmatpush3.bf16.msra.mxu0 %v5070_v8  ;;  %4620 = vmatpush3.bf16.msra.mxu1 %v5071_v9  ;;  %v208_v50 = vld [vmem:[%s5222_s12 + $0x68] sm:$0xff]  ;;  %v5306_v53 = vpack.c.bf16 %v271_v47, %v270_v46  ;;  %v272_v55 = vld [vmem:[%s5222_s12 + $0x79] sm:$0xff]  ;;  %v274_v61 = vld [vmem:[%s5222_s12 + $0x91] sm:$0xff] }
  0x1a   : > { %4573 = vmatprep.subr.bf16.mxu0 %v5072_v10  ;;  %4621 = vmatprep.subr.bf16.mxu1 %v5073_v11  ;;  %v5308_v54 = vpack.c.bf16 %v208_v50, %v207_v49  ;;  %v273_v56 = vld [vmem:[%s5222_s12 + $0x81] sm:$0xff]  ;;  %v275_v62 = vld [vmem:[%s5222_s12 + $0x99] sm:$0xff]  ;;  %v211_v63 = vld [vmem:[%s5222_s12 + $0x90] sm:$0xff] }
  0x1b   : > { %v5088_v58 = vld [vmem:[%s6609_s1 + $0xdc] sm:$0xff]   ;;  %v5089_v0 = vld [vmem:[%s6609_s1 + $0xd4] sm:$0xff]   ;;  %v5338_v3 = vpack.c.bf16 %v273_v56, %v272_v55  ;;  %v5342_v5 = vpack.c.bf16 %v275_v62, %v274_v61  ;;  %v5087_v7 = vld [vmem:[%s6609_s1 + $0x88] sm:$0xff]  }
  0x1c   : > { %v210_v60 = vld [vmem:[%s5222_s12 + $0x80] sm:$0xff]  ;;  %v212_v1 = vld [vmem:[%s5222_s12 + $0x98] sm:$0xff]  ;;  %v5084_v2 = vld [vmem:[%s6609_s1 + $0x90] sm:$0xff]  }
  0x1d   : > { %4574 = vmatpush3.bf16.msra.mxu0 %v5072_v10  ;;  %4622 = vmatpush3.bf16.msra.mxu1 %v5073_v11  ;;  %v5340_v4 = vpack.c.bf16 %v210_v60, %v209_v59  ;;  %v5344_v6 = vpack.c.bf16 %v212_v1, %v211_v63  ;;  %v276_v8 = vld [vmem:[%s5222_s12 + $0xa9] sm:$0xff]  ;;  %v277_v9 = vld [vmem:[%s5222_s12 + $0xb1] sm:$0xff]  ;;  %v215_v16 = vld [vmem:[%s5222_s12 + $0xc0] sm:$0xff] }
  0x1e   : > { %4575 = vmatprep.subr.bf16.mxu0 %v5074_v14  ;;  %4623 = vmatprep.subr.bf16.mxu1 %v5075_v18  ;;  %v5091_v10 = vld [vmem:[%s6609_s1 + $0xcc] sm:$0xff]   ;;  %v5092_v13 = vld [vmem:[%s6609_s1 + $0xc4] sm:$0xff]   ;;  %v5374_v19 = vpack.c.bf16 %v277_v9, %v276_v8  ;;  %v5093_v24 = vld [vmem:[%s6609_s1 + $0x78] sm:$0xff]  }
  0x1f   : > { %v213_v11 = vld [vmem:[%s5222_s12 + $0xa8] sm:$0xff]  ;;  %v214_v12 = vld [vmem:[%s5222_s12 + $0xb0] sm:$0xff]  ;;  %v5094_v25 = vld [vmem:[%s6609_s1 + $0xbc] sm:$0xff]  }
  0x20   : > { %v279_v15 = vld [vmem:[%s5222_s12 + $0xc9] sm:$0xff]  ;;  %v281_v26 = vld [vmem:[%s5222_s12 + $0xe1] sm:$0xff]  ;;  %v217_v27 = vld [vmem:[%s5222_s12 + $0xd8] sm:$0xff] }
  0x21   : > { %4576 = vmatpush3.bf16.msra.mxu0 %v5074_v14  ;;  %4624 = vmatpush3.bf16.msra.mxu1 %v5075_v18  ;;  %v278_v14 = vld [vmem:[%s5222_s12 + $0xc1] sm:$0xff]  ;;  %v282_v29 = vld [vmem:[%s5222_s12 + $0xf1] sm:$0xff]  ;;  %v283_v31 = vld [vmem:[%s5222_s12 + $0xf9] sm:$0xff] }
  0x22   : > { %4577 = vmatprep.subr.bf16.mxu0 %v5076_v20  ;;  %4625 = vmatprep.subr.bf16.mxu1 %v5077_v21  ;;  %v216_v17 = vld [vmem:[%s5222_s12 + $0xc8] sm:$0xff]  ;;  %v5090_v18 = vld [vmem:[%s6609_s1 + $0x80] sm:$0xff]   ;;  %v5095_v30 = vld [vmem:[%s6609_s1 + $0xb4] sm:$0xff]   ;;  %v5416_v41 = vpack.c.bf16 %v283_v31, %v282_v29 }
  0x23   : > { %v219_v32 = vld [vmem:[%s5222_s12 + $0xf0] sm:$0xff]  ;;  %v5410_v38 = vld [vmem:[%s6609_s1 + $0x128] ss:$0 sps:$4 sm:$0xff]   ;;  %v5423_v43 = vld [vmem:[%s6609_s1 + $0x164] ss:$0 sps:$4 sm:$0xff]  }
  0x24   : > { %v221_v46 = vld [vmem:[%s5222_s12 + $0x108] sm:$0xff]  ;;  %v222_v47 = vld [vmem:[%s5222_s12 + $0x110] sm:$0xff]  ;;  %v223_v50 = vld [vmem:[%s5222_s12 + $0x120] sm:$0xff] }
  0x25   : > { %4578 = vmatpush3.bf16.msra.mxu0 %v5076_v20  ;;  %4626 = vmatpush3.bf16.msra.mxu1 %v5077_v21  ;;  %v5376_v20 = vpack.c.bf16 %v214_v12, %v213_v11  ;;  %v5378_v21 = vpack.c.bf16 %v279_v15, %v278_v14  ;;  %v287_v49 = vld [vmem:[%s5222_s12 + $0x129] sm:$0xff]  ;;  %v288_v60 = vld [vmem:[%s5222_s12 + $0x139] sm:$0xff]  ;;  %v289_v61 = vld [vmem:[%s5222_s12 + $0x141] sm:$0xff] }
  0x26   : > { %4579 = vmatprep.subr.bf16.mxu0 %v5078_v22  ;;  %4627 = vmatprep.subr.bf16.mxu1 %v5079_v23  ;;  %v224_v55 = vld [vmem:[%s5222_s12 + $0x128] sm:$0xff]  ;;  %v225_v62 = vld [vmem:[%s5222_s12 + $0x138] sm:$0xff]  ;;  %v226_v63 = vld [vmem:[%s5222_s12 + $0x140] sm:$0xff]  ;;  %v5469_v8 = vpack.c.bf16 %v289_v61, %v288_v60 }
  0x27   : > { %v5451_v59 = vpack.c.bf16 %v224_v55, %v223_v50  ;;  %v291_v1 = vld [vmem:[%s5222_s12 + $0x159] sm:$0xff]  ;;  %v5471_v9 = vpack.c.bf16 %v226_v63, %v225_v62  ;;  %v292_v12 = vld [vmem:[%s5222_s12 + $0x169] sm:$0xff] }
  0x28   : > { %v229_v14 = vld [vmem:[%s5222_s12 + $0x168] sm:$0xff]  ;;  %v230_v15 = vld [vmem:[%s5222_s12 + $0x170] sm:$0xff]  ;;  %v855_v60 = vld [vmem:[%s5222_s12 + $0x9a] sm:$0xff] }
  0x29   : > { %4580 = vmatpush3.bf16.msra.mxu0 %v5078_v22  ;;  %4628 = vmatpush3.bf16.msra.mxu1 %v5079_v23  ;;  %v5380_v22 = vpack.c.bf16 %v216_v17, %v215_v16  ;;  %v280_v23 = vld [vmem:[%s5222_s12 + $0xd9] sm:$0xff]  ;;  %v842_v16 = vld [vmem:[%s5222_s12 + $0x2] sm:$0xff]  ;;  %v843_v17 = vld [vmem:[%s5222_s12 + $0xa] sm:$0xff] }
  0x2a   : > { %5047 = vmatprep.subr.msk.bf16.mxu0 %vm420_vm0, %v5080_v28  ;;  %5048 = vmatprep.subr.msk.bf16.mxu1 %vm420_vm0, %v5085_v40  ;;  %v218_v28 = vld [vmem:[%s5222_s12 + $0xe0] sm:$0xff]  ;;  %v5099_v55 = vld [vmem:[%s6609_s1 + $0x110] sm:$0xff]   ;;  %v5100_v62 = vld [vmem:[%s6609_s1 + $0x108] sm:$0xff]  }
  0x2b   : > { %v5414_v40 = vpack.c.bf16 %v218_v28, %v217_v27  ;;  %v846_v27 = vld [vmem:[%s5222_s12 + $0x32] sm:$0xff]  ;;  %v847_v28 = vld [vmem:[%s5222_s12 + $0x3a] sm:$0xff]  ;;  %v853_v50 = vld [vmem:[%s5222_s12 + $0x82] sm:$0xff] }
  0x2c   : > { %4582 = vmatmul.mubr.msk.bf16.vlgmr.msra.gmra.mxu0 %vm371_vm1, %v5262_v33  ;;  %4630 = vmatmul.mubr.msk.bf16.vlgmr.msra.gmra.mxu1 %vm371_vm1, %v5264_v34  ;;  %v5510_v31 = vpack.c.bf16 %v847_v28, %v846_v27  ;;  %v5105_v61 = vld [vmem:[%s6609_s1 + $0x14c] sm:$0xff]   ;;  %v5107_v63 = vld [vmem:[%s6609_s1 + $0x144] sm:$0xff]   ;;  %v863_v27 = vld [vmem:[%s5222_s12 + $0xfa] sm:$0xff] }
  0x2d   : > { %4662 = vmatpush3.bf16.msra.mxu0 %v1000_v35  ;;  %4585 = vmatprep.mubr.msk.bf16.mxu0 %vm371_vm1, %v5268_v36  ;;  %v220_v35 = vld [vmem:[%s5222_s12 + $0xf8] sm:$0xff] }
  0x2e   : > { %4633 = vmatprep.mubr.msk.bf16.mxu1 %vm371_vm1, %v5270_v37  ;;  %4663 = vmatprep.subr.bf16.mxu0 %v5081_v39  ;;  %v5418_v42 = vpack.c.bf16 %v220_v35, %v219_v32  ;;  %v5097_v32 = vld [vmem:[%s6609_s1 + $0x120] sm:$0xff]   ;;  %v848_v35 = vld [vmem:[%s5222_s12 + $0x4a] sm:$0xff] }
  0x2f   : > { %4710 = vmatpush3.bf16.msra.mxu1 %v1354_v44  ;;  %v284_v44 = vld [vmem:[%s5222_s12 + $0x109] sm:$0xff] }
  0x30   : > { %4711 = vmatprep.subr.bf16.mxu1 %v5086_v45 }
  0x31   : > { %4664 = vmatpush3.bf16.msra.mxu0 %v5081_v39  ;;  %v5412_v39 = vpack.c.bf16 %v281_v26, %v280_v23  ;;  %v5493_v23 = vpack.c.bf16 %v230_v15, %v229_v14  ;;  %v845_v26 = vld [vmem:[%s5222_s12 + $0x22] sm:$0xff]  ;;  %v5106_v14 = vld [vmem:[%s6609_s1 + $0xf8] sm:$0xff]  }
  0x32   : > { %4665 = vmatprep.subr.bf16.mxu0 %v5082_v48 }
  0x33   : > { %4712 = vmatpush3.bf16.msra.mxu1 %v5086_v45  ;;  %v285_v45 = vld [vmem:[%s5222_s12 + $0x111] sm:$0xff] }
  0x34   : > { %4586 = vmatmul.mubr.msk.bf16.gmra.mxu0 %vm371_vm1, %v5302_v51  ;;  %4634 = vmatmul.mubr.msk.bf16.gmra.mxu1 %vm371_vm1, %v5304_v52  ;;  %v5445_v56 = vpack.c.bf16 %v285_v45, %v284_v44  ;;  %v849_v44 = vld [vmem:[%s5222_s12 + $0x52] sm:$0xff]  ;;  %v850_v45 = vld [vmem:[%s5222_s12 + $0x62] sm:$0xff] }
  0x35   : > { %4589 = vmatprep.mubr.msk.bf16.mxu0 %vm371_vm1, %v5306_v53  ;;  %4637 = vmatprep.mubr.msk.bf16.mxu1 %vm371_vm1, %v5308_v54 }
  0x36   : > { %4666 = vmatpush3.bf16.msra.mxu0 %v5082_v48  ;;  %4713 = vmatprep.subr.bf16.mxu1 %v5088_v58  ;;  %v286_v48 = vld [vmem:[%s5222_s12 + $0x121] sm:$0xff] }
  0x37   : > { %4667 = vmatprep.subr.bf16.mxu0 %v5083_v57  ;;  %4714 = vmatpush3.bf16.msra.mxu1 %v5088_v58  ;;  %v5449_v58 = vpack.c.bf16 %v287_v49, %v286_v48  ;;  %v852_v49 = vld [vmem:[%s5222_s12 + $0x7a] sm:$0xff] }
  0x38   : > { %4715 = vmatprep.subr.bf16.mxu1 %v5089_v0 }
  0x3a   : > { %4668 = vmatpush3.bf16.msra.mxu0 %v5083_v57  ;;  %v5447_v57 = vpack.c.bf16 %v222_v47, %v221_v46  ;;  %v2060_v46 = vsel %vm420_vm0, %v5423_v43, 0  ;;  %v5098_v47 = vld [vmem:[%s6609_s1 + $0x118] sm:$0xff]  }
  0x3b   : > { %4669 = vmatprep.subr.bf16.mxu0 %v5084_v2  ;;  %4716 = vmatpush3.bf16.msra.mxu1 %v5089_v0  ;;  %v290_v0 = vld [vmem:[%s5222_s12 + $0x151] sm:$0xff] }
  0x3c   : > { %4590 = vmatmul.mubr.msk.bf16.gmra.mxu0 %vm371_vm1, %v5338_v3  ;;  %4638 = vmatmul.mubr.msk.bf16.gmra.mxu1 %vm371_vm1, %v5340_v4 }
  0x3d   : > { %4593 = vmatprep.mubr.msk.bf16.mxu0 %vm371_vm1, %v5342_v5  ;;  %4641 = vmatprep.mubr.msk.bf16.mxu1 %vm371_vm1, %v5344_v6 }
  0x3e   : > { %4670 = vmatpush3.bf16.msra.mxu0 %v5084_v2  ;;  %4717 = vmatprep.subr.bf16.mxu1 %v5091_v10  ;;  %v227_v2 = vld [vmem:[%s5222_s12 + $0x150] sm:$0xff] }
  0x3f   : > { %4671 = vmatprep.subr.bf16.mxu0 %v5087_v7  ;;  %4718 = vmatpush3.bf16.msra.mxu1 %v5091_v10  ;;  %v5473_v10 = vpack.c.bf16 %v291_v1, %v290_v0  ;;  %v5108_v1 = vld [vmem:[%s6609_s1 + $0x13c] sm:$0xff]  }
  0x40   : > { %4719 = vmatprep.subr.bf16.mxu1 %v5092_v13 }
  0x42   : > { %4672 = vmatpush3.bf16.msra.mxu0 %v5087_v7  ;;  %v228_v7 = vld [vmem:[%s5222_s12 + $0x158] sm:$0xff] }
  0x43   : > { %4673 = vmatprep.subr.bf16.mxu0 %v5090_v18  ;;  %4720 = vmatpush3.bf16.msra.mxu1 %v5092_v13  ;;  %v5475_v11 = vpack.c.bf16 %v228_v7, %v227_v2  ;;  %v293_v13 = vld [vmem:[%s5222_s12 + $0x171] sm:$0xff] }
  0x44   : > { %4594 = vmatmul.mubr.msk.bf16.gmra.mxu0 %vm371_vm1, %v5374_v19  ;;  %4642 = vmatmul.mubr.msk.bf16.gmra.mxu1 %vm371_vm1, %v5376_v20  ;;  %v856_v2 = vld [vmem:[%s5222_s12 + $0xaa] sm:$0xff]  ;;  %v857_v7 = vld [vmem:[%s5222_s12 + $0xb2] sm:$0xff] }
  0x45   : > { %4597 = vmatprep.mubr.msk.bf16.mxu0 %vm371_vm1, %v5378_v21  ;;  %4645 = vmatprep.mubr.msk.bf16.mxu1 %vm371_vm1, %v5380_v22 }
  0x46   : > { %4674 = vmatpush3.bf16.msra.mxu0 %v5090_v18  ;;  %4721 = vmatprep.subr.bf16.mxu1 %v5094_v25  ;;  %v5491_v18 = vpack.c.bf16 %v293_v13, %v292_v12  ;;  %v858_v12 = vld [vmem:[%s5222_s12 + $0xc2] sm:$0xff]  ;;  %v859_v13 = vld [vmem:[%s5222_s12 + $0xca] sm:$0xff] }
  0x47   : > { %4675 = vmatprep.subr.bf16.mxu0 %v5093_v24  ;;  %4722 = vmatpush3.bf16.msra.mxu1 %v5094_v25  ;;  %v844_v25 = vld [vmem:[%s5222_s12 + $0x1a] sm:$0xff]  ;;  %v5596_v15 = vpack.c.bf16 %v859_v13, %v858_v12  ;;  %v4087_v12 = vld [vmem:[%s5222_s12 + $0x50] sm:$0xff] }
  0x48   : > { %4723 = vmatprep.subr.bf16.mxu1 %v5095_v30  ;;  %v5506_v29 = vpack.c.bf16 %v845_v26, %v844_v25  ;;  %v861_v25 = vld [vmem:[%s5222_s12 + $0xe2] sm:$0xff]  ;;  %v862_v26 = vld [vmem:[%s5222_s12 + $0xf2] sm:$0xff] }
  0x49   : > { %v4157_v13 = vld [vmem:[%s5222_s12 + $0x49] sm:$0xff] }
  0x4a   : > { %4676 = vmatpush3.bf16.msra.mxu0 %v5093_v24  ;;  %v874_v24 = vpack.c.bf16 %v843_v17, %v842_v16  ;;  %v5109_v16 = vld [vmem:[%s6609_s1 + $0xf0] sm:$0xff]  }
  0x4b   : > { %5049 = vmatprep.subr.msk.bf16.mxu0 %vm420_vm0, %v5410_v38  ;;  %4724 = vmatpush3.bf16.msra.mxu1 %v5095_v30  ;;  %v1707_v30 = vsel %vm420_vm0, %v5410_v38, 0  ;;  %v5102_v38 = vld [vmem:[%s6609_s1 + $0x15c] sm:$0xff]   ;;  %v5111_v17 = vld [vmem:[%s6609_s1 + $0x12c] sm:$0xff]  }
  0x4c   : > { %4598 = vmatmul.mubr.msk.bf16.gmra.mxu0 %vm371_vm1, %v5412_v39  ;;  %4646 = vmatmul.mubr.msk.bf16.gmra.mxu1 %vm371_vm1, %v5414_v40 }
  0x4d   : > { %4601 = vmatprep.mubr.msk.bf16.mxu0 %vm371_vm1, %v5416_v41  ;;  %4649 = vmatprep.mubr.msk.bf16.mxu1 %vm371_vm1, %v5418_v42 }
  0x4e   : > { %5050 = vmatprep.subr.msk.bf16.mxu1 %vm420_vm0, %v5423_v43  ;;  %v5535_v43 = vpack.c.bf16 %v849_v44, %v848_v35  ;;  %v865_v35 = vld [vmem:[%s5222_s12 + $0x112] sm:$0xff]  ;;  %v866_v44 = vld [vmem:[%s5222_s12 + $0x122] sm:$0xff] }
  0x54   : > { %4602 = vmatmul.mubr.msk.bf16.gmra.mxu0 %vm371_vm1, %v5445_v56  ;;  %4650 = vmatmul.mubr.msk.bf16.gmra.mxu1 %vm371_vm1, %v5447_v57 }
  0x55   : > { %4605 = vmatprep.mubr.msk.bf16.mxu0 %vm371_vm1, %v5449_v58  ;;  %4653 = vmatprep.mubr.msk.bf16.mxu1 %vm371_vm1, %v5451_v59 }
  0x5c   : > { %4606 = vmatmul.mubr.msk.bf16.gmra.mxu0 %vm371_vm1, %v5469_v8  ;;  %4654 = vmatmul.mubr.msk.bf16.gmra.mxu1 %vm371_vm1, %v5471_v9 }
  0x5d   : > { %4609 = vmatprep.mubr.msk.bf16.mxu0 %vm371_vm1, %v5473_v10  ;;  %4657 = vmatprep.mubr.msk.bf16.mxu1 %vm371_vm1, %v5475_v11 }
  0x64   : > { %4610 = vmatmul.mubr.msk.bf16.gmra.mxu0 %vm371_vm1, %v5491_v18  ;;  %4658 = vmatmul.mubr.msk.bf16.gmra.mxu1 %vm371_vm1, %v5493_v23 }
  0x65   : > { %4677 = vmatprep.mubr.msk.bf16.mxu0 %vm371_vm1, %v874_v24  ;;  %4725 = vmatprep.mubr.msk.bf16.mxu1 %vm371_vm1, %v5264_v34  ;;  %v851_v34 = vld [vmem:[%s5222_s12 + $0x6a] sm:$0xff]  ;;  %v860_v24 = vld [vmem:[%s5222_s12 + $0xda] sm:$0xff] }
  0x66   : > { %v5540_v48 = vpack.c.bf16 %v851_v34, %v850_v45  ;;  %v5619_v28 = vpack.c.bf16 %v861_v25, %v860_v24  ;;  %v867_v45 = vld [vmem:[%s5222_s12 + $0x12a] sm:$0xff] }
  0x6c   : > { %4678 = vmatmul.mubr.msk.bf16.vlgmr.msra.gmra.mxu0 %vm371_vm1, %v5506_v29  ;;  %4726 = vmatmul.mubr.msk.bf16.vlgmr.msra.gmra.mxu1 %vm371_vm1, %v5270_v37  ;;  %v5104_v37 = vld [vmem:[%s6609_s1 + $0x154] sm:$0xff]  }
  0x6d   : > { %4758 = vmatpush3.bf16.msra.mxu0 %v1707_v30  ;;  %4681 = vmatprep.mubr.msk.bf16.mxu0 %vm371_vm1, %v5510_v31  ;;  %v5624_v30 = vpack.c.bf16 %v863_v27, %v862_v26  ;;  %v5129_v27 = vld [vmem:[%s6609_s1 + $0x210] sm:$0xff]  }
  0x6e   : > { %4759 = vmatprep.subr.bf16.mxu0 %v5097_v32  ;;  %4729 = vmatprep.mubr.msk.bf16.mxu1 %vm371_vm1, %v5304_v52  ;;  %v854_v52 = vld [vmem:[%s5222_s12 + $0x92] sm:$0xff] }
  0x6f   : > { %4806 = vmatpush3.bf16.msra.mxu1 %v2060_v46  ;;  %v5568_v0 = vpack.c.bf16 %v855_v60, %v854_v52  ;;  %v5642_v46 = vpack.c.bf16 %v867_v45, %v866_v44  ;;  %v4162_v44 = vld [vmem:[%s5222_s12 + $0x81] sm:$0xff] }
  0x70   : > { %4807 = vmatprep.subr.bf16.mxu1 %v5102_v38 }
  0x71   : > { %4760 = vmatpush3.bf16.msra.mxu0 %v5097_v32  ;;  %v864_v32 = vld [vmem:[%s5222_s12 + $0x10a] sm:$0xff] }
  0x72   : > { %4761 = vmatprep.subr.bf16.mxu0 %v5098_v47  ;;  %v5640_v34 = vpack.c.bf16 %v865_v35, %v864_v32  ;;  %v4091_v32 = vld [vmem:[%s5222_s12 + $0x80] sm:$0xff] }
  0x73   : > { %4808 = vmatpush3.bf16.msra.mxu1 %v5102_v38  ;;  %v870_v38 = vld [vmem:[%s5222_s12 + $0x152] sm:$0xff] }
  0x74   : > { %4682 = vmatmul.mubr.msk.bf16.gmra.mxu0 %vm371_vm1, %v5535_v43  ;;  %4809 = vmatprep.subr.bf16.mxu1 %v5104_v37  ;;  %v4161_v35 = vld [vmem:[%s5222_s12 + $0x79] sm:$0xff] }
  0x75   : > { %4730 = vmatmul.mubr.msk.bf16.gmra.mxu1 %vm371_vm1, %v5308_v54  ;;  %4685 = vmatprep.mubr.msk.bf16.mxu0 %vm371_vm1, %v5540_v48  ;;  %v5566_v54 = vpack.c.bf16 %v853_v50, %v852_v49  ;;  %v873_v50 = vld [vmem:[%s5222_s12 + $0x172] sm:$0xff] }
  0x76   : > { %4733 = vmatprep.mubr.msk.bf16.mxu1 %vm371_vm1, %v5340_v4  ;;  %4762 = vmatpush3.bf16.msra.mxu0 %v5098_v47  ;;  %v5103_v4 = vld [vmem:[%s6609_s1 + $0x100] sm:$0xff]  }
  0x77   : > { %4763 = vmatprep.subr.bf16.mxu0 %v5099_v55  ;;  %4810 = vmatpush3.bf16.msra.mxu1 %v5104_v37  ;;  %v871_v47 = vld [vmem:[%s5222_s12 + $0x15a] sm:$0xff] }
  0x78   : > { %4811 = vmatprep.subr.bf16.mxu1 %v5105_v61  ;;  %v5658_v49 = vpack.c.bf16 %v871_v47, %v870_v38  ;;  %v4163_v47 = vld [vmem:[%s5222_s12 + $0x91] sm:$0xff] }
  0x7a   : > { %4764 = vmatpush3.bf16.msra.mxu0 %v5099_v55  ;;  %v3902_v55 = vld [vmem:[%s5222_s12 + $0x188] sm:$0xff] }
  0x7b   : > { %4765 = vmatprep.subr.bf16.mxu0 %v5100_v62  ;;  %4812 = vmatpush3.bf16.msra.mxu1 %v5105_v61 }
  0x7c   : > { %4686 = vmatmul.mubr.msk.bf16.gmra.mxu0 %vm371_vm1, %v5566_v54  ;;  %4813 = vmatprep.subr.bf16.mxu1 %v5107_v63 }
  0x7d   : > { %4734 = vmatmul.mubr.msk.bf16.gmra.mxu1 %vm371_vm1, %v5344_v6  ;;  %4689 = vmatprep.mubr.msk.bf16.mxu0 %vm371_vm1, %v5568_v0  ;;  %v5591_v6 = vpack.c.bf16 %v857_v7, %v856_v2  ;;  %v4086_v7 = vld [vmem:[%s5222_s12 + $0x48] sm:$0xff] }
  0x7e   : > { %4737 = vmatprep.mubr.msk.bf16.mxu1 %vm371_vm1, %v5376_v20  ;;  %4766 = vmatpush3.bf16.msra.mxu0 %v5100_v62  ;;  %v5110_v20 = vld [vmem:[%s6609_s1 + $0x134] sm:$0xff]  }
  0x7f   : > { %4767 = vmatprep.subr.bf16.mxu0 %v5103_v4  ;;  %4814 = vmatpush3.bf16.msra.mxu1 %v5107_v63  ;;  %v5118_v62 = vld [vmem:[%s6609_s1 + $0x1d4] sm:$0xff]   ;;  %v5127_v63 = vld [vmem:[%s6609_s1 + $0x1a4] sm:$0xff]  }
  0x80   : > { %4815 = vmatprep.subr.bf16.mxu1 %v5108_v1 }
  0x82   : > { %4768 = vmatpush3.bf16.msra.mxu0 %v5103_v4 }
  0x83   : > { %4769 = vmatprep.subr.bf16.mxu0 %v5106_v14  ;;  %4816 = vmatpush3.bf16.msra.mxu1 %v5108_v1 }
  0x84   : > { %4690 = vmatmul.mubr.msk.bf16.gmra.mxu0 %vm371_vm1, %v5591_v6  ;;  %4817 = vmatprep.subr.bf16.mxu1 %v5110_v20 }
  0x85   : > { %4738 = vmatmul.mubr.msk.bf16.gmra.mxu1 %vm371_vm1, %v5380_v22  ;;  %4693 = vmatprep.mubr.msk.bf16.mxu0 %vm371_vm1, %v5596_v15  ;;  %v5112_v22 = vld [vmem:[%s6609_s1 + $0x1a0] ss:$0 sps:$4 sm:$0xff]  }
  0x86   : > { %4741 = vmatprep.mubr.msk.bf16.mxu1 %vm371_vm1, %v5414_v40  ;;  %4770 = vmatpush3.bf16.msra.mxu0 %v5106_v14  ;;  %v5117_v40 = vld [vmem:[%s6609_s1 + $0x1dc] ss:$0 sps:$4 sm:$0xff]   ;;  %v4158_v14 = vld [vmem:[%s5222_s12 + $0x51] sm:$0xff] }
  0x87   : > { %4771 = vmatprep.subr.bf16.mxu0 %v5109_v16  ;;  %4818 = vmatpush3.bf16.msra.mxu1 %v5110_v20  ;;  %v2767_v61 = vsel %vm420_vm0, %v5117_v40, 0  ;;  %v4089_v20 = vld [vmem:[%s5222_s12 + $0x68] sm:$0xff]  ;;  %v2642_v24 = vpack.c.bf16 %v4158_v14, %v4157_v13  ;;  %v5133_v14 = vld [vmem:[%s6609_s1 + $0x1f0] sm:$0xff]  }
  0x88   : > { %4819 = vmatprep.subr.bf16.mxu1 %v5111_v17 }
  0x8a   : > { %4772 = vmatpush3.bf16.msra.mxu0 %v5109_v16  ;;  %v4159_v16 = vld [vmem:[%s5222_s12 + $0x61] sm:$0xff] }
  0x8b   : > { %4820 = vmatpush3.bf16.msra.mxu1 %v5111_v17  ;;  %5051 = vmatprep.subr.msk.bf16.mxu0 %vm420_vm0, %v5112_v22  ;;  %v4160_v17 = vld [vmem:[%s5222_s12 + $0x69] sm:$0xff] }
  0x8c   : > { %4694 = vmatmul.mubr.msk.bf16.gmra.mxu0 %vm371_vm1, %v5619_v28  ;;  %5052 = vmatprep.subr.msk.bf16.mxu1 %vm420_vm0, %v5117_v40  ;;  %v4090_v40 = vld [vmem:[%s5222_s12 + $0x78] sm:$0xff] }
  0x8d   : > { %4742 = vmatmul.mubr.msk.bf16.gmra.mxu1 %vm371_vm1, %v5418_v42  ;;  %4697 = vmatprep.mubr.msk.bf16.mxu0 %vm371_vm1, %v5624_v30  ;;  %v868_v42 = vld [vmem:[%s5222_s12 + $0x13a] sm:$0xff] }
  0x8e   : > { %4745 = vmatprep.mubr.msk.bf16.mxu1 %vm371_vm1, %v5447_v57  ;;  %v869_v57 = vld [vmem:[%s5222_s12 + $0x142] sm:$0xff] }
  0x8f   : > { %v5656_v37 = vpack.c.bf16 %v869_v57, %v868_v42  ;;  %v4093_v42 = vld [vmem:[%s5222_s12 + $0x98] sm:$0xff]  ;;  %v5130_v57 = vld [vmem:[%s6609_s1 + $0x208] sm:$0xff]  }
  0x94   : > { %4698 = vmatmul.mubr.msk.bf16.gmra.mxu0 %vm371_vm1, %v5640_v34 }
  0x95   : > { %4746 = vmatmul.mubr.msk.bf16.gmra.mxu1 %vm371_vm1, %v5451_v59  ;;  %4701 = vmatprep.mubr.msk.bf16.mxu0 %vm371_vm1, %v5642_v46  ;;  %v872_v59 = vld [vmem:[%s5222_s12 + $0x16a] sm:$0xff] }
  0x96   : > { %4749 = vmatprep.mubr.msk.bf16.mxu1 %vm371_vm1, %v5471_v9  ;;  %v3901_v9 = vld [vmem:[%s5222_s12 + $0x180] sm:$0xff]  ;;  %v5672_v52 = vpack.c.bf16 %v873_v50, %v872_v59  ;;  %v2291_v50 = vpack.c.bf16 %v4091_v32, %v4090_v40 }
  0x97   : > { %v5674_v60 = vpack.c.bf16 %v3902_v55, %v3901_v9  ;;  %v2644_v55 = vpack.c.bf16 %v4162_v44, %v4161_v35  ;;  %v4172_v32 = vld [vmem:[%s5222_s12 + $0xf9] sm:$0xff]  ;;  %v5134_v35 = vld [vmem:[%s6609_s1 + $0x1e8] sm:$0xff]  }
  0x9c   : > { %4702 = vmatmul.mubr.msk.bf16.gmra.mxu0 %vm371_vm1, %v5656_v37 }
  0x9d   : > { %4750 = vmatmul.mubr.msk.bf16.gmra.mxu1 %vm371_vm1, %v5475_v11  ;;  %4705 = vmatprep.mubr.msk.bf16.mxu0 %vm371_vm1, %v5658_v49  ;;  %v2414_v11 = vsel %vm420_vm0, %v5112_v22, 0  ;;  %v2643_v22 = vpack.c.bf16 %v4160_v17, %v4159_v16  ;;  %v4098_v16 = vld [vmem:[%s5222_s12 + $0xd8] sm:$0xff]  ;;  %v4099_v17 = vld [vmem:[%s5222_s12 + $0xe0] sm:$0xff] }
  0x9e   : > { %4753 = vmatprep.mubr.msk.bf16.mxu1 %vm371_vm1, %v5493_v23  ;;  %v5113_v23 = vld [vmem:[%s6609_s1 + $0x198] sm:$0xff]  }
  0xa4   : > { %4706 = vmatmul.mubr.msk.bf16.gmra.mxu0 %vm371_vm1, %v5672_v52 }
  0xa5   : > { %4754 = vmatmul.mubr.msk.bf16.gmra.mxu1 %vm371_vm1, %v5674_v60  ;;  %4773 = vmatprep.mubr.msk.bf16.mxu0 %vm371_vm1, %v5262_v33  ;;  %v5114_v33 = vld [vmem:[%s6609_s1 + $0x190] sm:$0xff]  }
  0xa6   : > { %4821 = vmatprep.mubr.msk.bf16.mxu1 %vm371_vm1, %v5506_v29  ;;  %v5121_v29 = vld [vmem:[%s6609_s1 + $0x1c4] sm:$0xff]  }
  0xac   : > { %4774 = vmatmul.mubr.msk.bf16.vlgmr.msra.gmra.mxu0 %vm371_vm1, %v5268_v36  ;;  %v5120_v36 = vld [vmem:[%s6609_s1 + $0x1cc] sm:$0xff]  }
  0xad   : > { %4854 = vmatpush3.bf16.msra.mxu0 %v2414_v11  ;;  %4822 = vmatmul.mubr.msk.bf16.vlgmr.msra.gmra.mxu1 %vm371_vm1, %v5510_v31  ;;  %v5123_v31 = vld [vmem:[%s6609_s1 + $0x1bc] sm:$0xff]  }
  0xae   : > { %4777 = vmatprep.mubr.msk.bf16.mxu0 %vm371_vm1, %v5302_v51  ;;  %4855 = vmatprep.subr.bf16.mxu0 %v5113_v23  ;;  %v5115_v51 = vld [vmem:[%s6609_s1 + $0x188] sm:$0xff]  }
  0xaf   : > { %4825 = vmatprep.mubr.msk.bf16.mxu1 %vm371_vm1, %v5535_v43  ;;  %4902 = vmatpush3.bf16.msra.mxu1 %v2767_v61  ;;  %v5124_v43 = vld [vmem:[%s6609_s1 + $0x1b4] sm:$0xff]  }
  0xb0   : > { %4903 = vmatprep.subr.bf16.mxu1 %v5118_v62 }
  0xb1   : > { %4856 = vmatpush3.bf16.msra.mxu0 %v5113_v23 }
  0xb2   : > { %4857 = vmatprep.subr.bf16.mxu0 %v5114_v33 }
  0xb3   : > { %4904 = vmatpush3.bf16.msra.mxu1 %v5118_v62 }
  0xb4   : > { %4778 = vmatmul.mubr.msk.bf16.gmra.mxu0 %vm371_vm1, %v5306_v53  ;;  %4905 = vmatprep.subr.bf16.mxu1 %v5120_v36  ;;  %v5116_v53 = vld [vmem:[%s6609_s1 + $0x180] sm:$0xff]  }
  0xb5   : > { %4826 = vmatmul.mubr.msk.bf16.gmra.mxu1 %vm371_vm1, %v5540_v48  ;;  %4781 = vmatprep.mubr.msk.bf16.mxu0 %vm371_vm1, %v5338_v3  ;;  %v5119_v3 = vld [vmem:[%s6609_s1 + $0x178] sm:$0xff]   ;;  %v5126_v48 = vld [vmem:[%s6609_s1 + $0x1ac] sm:$0xff]  }
  0xb6   : > { %4829 = vmatprep.mubr.msk.bf16.mxu1 %vm371_vm1, %v5566_v54  ;;  %4858 = vmatpush3.bf16.msra.mxu0 %v5114_v33  ;;  %v4155_v54 = vld [vmem:[%s5222_s12 + $0x31] sm:$0xff]  ;;  %v5131_v33 = vld [vmem:[%s6609_s1 + $0x200] sm:$0xff]  }
  0xb7   : > { %4859 = vmatprep.subr.bf16.mxu0 %v5115_v51  ;;  %4906 = vmatpush3.bf16.msra.mxu1 %v5120_v36 }
  0xb8   : > { %4907 = vmatprep.subr.bf16.mxu1 %v5121_v29 }
  0xba   : > { %4860 = vmatpush3.bf16.msra.mxu0 %v5115_v51 }
  0xbb   : > { %4861 = vmatprep.subr.bf16.mxu0 %v5116_v53  ;;  %4908 = vmatpush3.bf16.msra.mxu1 %v5121_v29 }
  0xbc   : > { %4782 = vmatmul.mubr.msk.bf16.gmra.mxu0 %vm371_vm1, %v5342_v5  ;;  %4909 = vmatprep.subr.bf16.mxu1 %v5123_v31  ;;  %v5122_v5 = vld [vmem:[%s6609_s1 + $0x170] sm:$0xff]  }
  0xbd   : > { %4830 = vmatmul.mubr.msk.bf16.gmra.mxu1 %vm371_vm1, %v5568_v0  ;;  %4785 = vmatprep.mubr.msk.bf16.mxu0 %vm371_vm1, %v5374_v19  ;;  %v5125_v19 = vld [vmem:[%s6609_s1 + $0x168] sm:$0xff]   ;;  %v4156_v0 = vld [vmem:[%s5222_s12 + $0x39] sm:$0xff] }
  0xbe   : > { %4833 = vmatprep.mubr.msk.bf16.mxu1 %vm371_vm1, %v5591_v6  ;;  %4862 = vmatpush3.bf16.msra.mxu0 %v5116_v53  ;;  %v2641_v2 = vpack.c.bf16 %v4156_v0, %v4155_v54  ;;  %v4088_v6 = vld [vmem:[%s5222_s12 + $0x60] sm:$0xff]  ;;  %v4094_v53 = vld [vmem:[%s5222_s12 + $0xa8] sm:$0xff] }
  0xbf   : > { %4863 = vmatprep.subr.bf16.mxu0 %v5119_v3  ;;  %4910 = vmatpush3.bf16.msra.mxu1 %v5123_v31  ;;  %v2290_v26 = vpack.c.bf16 %v4089_v20, %v4088_v6  ;;  %v4095_v31 = vld [vmem:[%s5222_s12 + $0xb0] sm:$0xff] }
  0xc0   : > { %4911 = vmatprep.subr.bf16.mxu1 %v5124_v43 }
  0xc2   : > { %4864 = vmatpush3.bf16.msra.mxu0 %v5119_v3  ;;  %v4165_v3 = vld [vmem:[%s5222_s12 + $0xa9] sm:$0xff] }
  0xc3   : > { %4865 = vmatprep.subr.bf16.mxu0 %v5122_v5  ;;  %4912 = vmatpush3.bf16.msra.mxu1 %v5124_v43 }
  0xc4   : > { %4786 = vmatmul.mubr.msk.bf16.gmra.mxu0 %vm371_vm1, %v5378_v21  ;;  %4913 = vmatprep.subr.bf16.mxu1 %v5126_v48  ;;  %v5128_v21 = vld [vmem:[%s6609_s1 + $0x218] ss:$0 sps:$4 sm:$0xff]  }
  0xc5   : > { %4834 = vmatmul.mubr.msk.bf16.gmra.mxu1 %vm371_vm1, %v5596_v15  ;;  %4789 = vmatprep.mubr.msk.bf16.mxu0 %vm371_vm1, %v5412_v39  ;;  %v3972_v39 = vld [vmem:[%s5222_s12 + $0x181] sm:$0xff]  ;;  %v2289_v15 = vpack.c.bf16 %v4087_v12, %v4086_v7  ;;  %v3120_v25 = vsel %vm420_vm0, %v5128_v21, 0 }
  0xc6   : > { %4837 = vmatprep.mubr.msk.bf16.mxu1 %vm371_vm1, %v5619_v28  ;;  %4866 = vmatpush3.bf16.msra.mxu0 %v5122_v5 }
  0xc7   : > { %4867 = vmatprep.subr.bf16.mxu0 %v5125_v19  ;;  %4914 = vmatpush3.bf16.msra.mxu1 %v5126_v48  ;;  %v4166_v48 = vld [vmem:[%s5222_s12 + $0xb1] sm:$0xff] }
  0xc8   : > { %4915 = vmatprep.subr.bf16.mxu1 %v5127_v63  ;;  %v2646_v0 = vpack.c.bf16 %v4166_v48, %v4165_v3  ;;  %v4105_v3 = vld [vmem:[%s5222_s12 + $0x128] sm:$0xff] }
  0xc9   : > { %v4175_v48 = vld [vmem:[%s5222_s12 + $0x121] sm:$0xff] }
  0xca   : > { %4868 = vmatpush3.bf16.msra.mxu0 %v5125_v19  ;;  %v4096_v19 = vld [vmem:[%s5222_s12 + $0xc0] sm:$0xff] }
  0xcb   : > { %4916 = vmatpush3.bf16.msra.mxu1 %v5127_v63  ;;  %5053 = vmatprep.subr.msk.bf16.mxu0 %vm420_vm0, %v5128_v21  ;;  %v4097_v63 = vld [vmem:[%s5222_s12 + $0xc8] sm:$0xff] }
  0xcc   : > { %4790 = vmatmul.mubr.msk.bf16.gmra.mxu0 %vm371_vm1, %v5416_v41  ;;  %v3973_v41 = vld [vmem:[%s5222_s12 + $0x189] sm:$0xff] }
  0xcd   : > { %4838 = vmatmul.mubr.msk.bf16.gmra.mxu1 %vm371_vm1, %v5624_v30  ;;  %4793 = vmatprep.mubr.msk.bf16.mxu0 %vm371_vm1, %v5445_v56  ;;  %v4043_v56 = vld [vmem:[%s5222_s12 + $0x182] sm:$0xff]  ;;  %v5796_v4 = vpack.c.bf16 %v3973_v41, %v3972_v39 }
  0xce   : > { %4841 = vmatprep.mubr.msk.bf16.mxu1 %vm371_vm1, %v5640_v34  ;;  %v4167_v39 = vld [vmem:[%s5222_s12 + $0xc1] sm:$0xff]  ;;  %v4168_v41 = vld [vmem:[%s5222_s12 + $0xc9] sm:$0xff] }
  0xcf   : > { %v2647_v12 = vpack.c.bf16 %v4168_v41, %v4167_v39 }
  0xd4   : > { %4794 = vmatmul.mubr.msk.bf16.gmra.mxu0 %vm371_vm1, %v5449_v58  ;;  %v4044_v58 = vld [vmem:[%s5222_s12 + $0x18a] sm:$0xff] }
  0xd5   : > { %4842 = vmatmul.mubr.msk.bf16.gmra.mxu1 %vm371_vm1, %v5642_v46  ;;  %4797 = vmatprep.mubr.msk.bf16.mxu0 %vm371_vm1, %v5469_v8  ;;  %v4084_v8 = vld [vmem:[%s5222_s12 + $0x30] sm:$0xff] }
  0xd6   : > { %4845 = vmatprep.mubr.msk.bf16.mxu1 %vm371_vm1, %v5656_v37  ;;  %v4092_v46 = vld [vmem:[%s5222_s12 + $0x90] sm:$0xff]  ;;  %v4164_v37 = vld [vmem:[%s5222_s12 + $0x99] sm:$0xff] }
  0xd7   : > { %v2645_v61 = vpack.c.bf16 %v4164_v37, %v4163_v47 }
  0xdc   : > { %4798 = vmatmul.mubr.msk.bf16.gmra.mxu0 %vm371_vm1, %v5473_v10  ;;  %v4085_v10 = vld [vmem:[%s5222_s12 + $0x38] sm:$0xff] }
  0xdd   : > { %4846 = vmatmul.mubr.msk.bf16.gmra.mxu1 %vm371_vm1, %v5658_v49  ;;  %4801 = vmatprep.mubr.msk.bf16.mxu0 %vm371_vm1, %v5491_v18  ;;  %v5798_v18 = vpack.c.bf16 %v4044_v58, %v4043_v56  ;;  %v2288_v1 = vpack.c.bf16 %v4085_v10, %v4084_v8  ;;  %v5132_v56 = vld [vmem:[%s6609_s1 + $0x1f8] sm:$0xff]   ;;  %v2293_v10 = vpack.c.bf16 %v4095_v31, %v4094_v53  ;;  %v4104_v31 = vld [vmem:[%s5222_s12 + $0x120] sm:$0xff] }
  0xde   : > { %4849 = vmatprep.mubr.msk.bf16.mxu1 %vm371_vm1, %v5672_v52  ;;  %v2292_v52 = vpack.c.bf16 %v4093_v42, %v4092_v46  ;;  %v2295_v46 = vpack.c.bf16 %v4099_v17, %v4098_v16  ;;  %v4174_v53 = vld [vmem:[%s5222_s12 + $0x111] sm:$0xff] }
  0xe4   : > { %4802 = vmatmul.mubr.msk.bf16.gmra.mxu0 %vm371_vm1, %v5796_v4 }
  0xe5   : > { %4850 = vmatmul.mubr.msk.bf16.gmra.mxu1 %vm371_vm1, %v5798_v18  ;;  %4869 = vmatprep.mubr.msk.bf16.mxu0 %vm371_vm1, %v2288_v1  ;;  %v2294_v1 = vpack.c.bf16 %v4097_v63, %v4096_v19  ;;  %v4176_v19 = vld [vmem:[%s5222_s12 + $0x129] sm:$0xff] }
  0xe6   : > { %4917 = vmatprep.mubr.msk.bf16.mxu1 %vm371_vm1, %v2641_v2 }
  0xec   : > { %v4583_v28 = vpop.f32.mrf.mxu0  ;;  %4870 = vmatmul.mubr.msk.bf16.vlgmr.msra.gmra.mxu0 %vm371_vm1, %v2289_v15  ;;  %v4631_v30 = vpop.f32.mrf.mxu1 }
  0xed   : > { %4950 = vmatpush3.bf16.msra.mxu0 %v3120_v25  ;;  %4918 = vmatmul.mubr.msk.bf16.vlgmr.msra.gmra.mxu1 %vm371_vm1, %v2642_v24  ;;  %v5824_v45 = vadd.f32 %v4631_v30, %v4583_v28  ;;  %v4169_v24 = vld [vmem:[%s5222_s12 + $0xd9] sm:$0xff]  ;;  %v4171_v30 = vld [vmem:[%s5222_s12 + $0xf1] sm:$0xff] }
  0xee   : > { %v458_v34 = vpop.f32.mrf.mxu0  ;;  %4873 = vmatprep.mubr.msk.bf16.mxu0 %vm371_vm1, %v2290_v26  ;;  %4951 = vmatprep.subr.bf16.mxu0 %v5129_v27  ;;  %v715_v38 = vpop.f32.mrf.mxu1  ;;  %v4101_v28 = vld [vmem:[%s5222_s12 + $0xf8] sm:$0xff] }
  0xef   : > { %4921 = vmatprep.mubr.msk.bf16.mxu1 %vm371_vm1, %v2643_v22  ;;  %v5835_v49 = vadd.f32 %v715_v38, %v458_v34  ;;  %v4100_v22 = vld [vmem:[%s5222_s12 + $0xf0] sm:$0xff] }
  0xf0   : > { %v4584_v59 = vpop.f32.mrf.mxu0  ;;  %v4632_v9 = vpop.f32.mrf.mxu1  ;;  %v2296_v38 = vpack.c.bf16 %v4101_v28, %v4100_v22  ;;  %v4179_v28 = vld [vmem:[%s5222_s12 + $0x151] sm:$0xff] }
  0xf1   : > { %4952 = vmatpush3.bf16.msra.mxu0 %v5129_v27  ;;  %v5837_v11 = vadd.f32 %v4632_v9, %v4584_v59  ;;  %v4170_v27 = vld [vmem:[%s5222_s12 + $0xe1] sm:$0xff]  ;;  %v2649_v59 = vpack.c.bf16 %v4172_v32, %v4171_v30 }
  0xf2   : > { %v461_v23 = vpop.f32.mrf.mxu0  ;;  %4953 = vmatprep.subr.bf16.mxu0 %v5130_v57  ;;  %v718_v62 = vpop.f32.mrf.mxu1  ;;  %v5135_v9 = vld [vmem:[%s6609_s1 + $0x1e0] sm:$0xff]  }
  0xf3   : > { %v5842_v36 = vadd.f32 %v718_v62, %v461_v23  ;;  %v4103_v62 = vld [vmem:[%s5222_s12 + $0x110] sm:$0xff] }
  0xf4   : > { %v4587_v51 = vpop.f32.mrf.mxu0  ;;  %4874 = vmatmul.mubr.msk.bf16.gmra.mxu0 %vm371_vm1, %v2291_v50  ;;  %v4635_v29 = vpop.f32.mrf.mxu1 }
  0xf5   : > { %4922 = vmatmul.mubr.msk.bf16.gmra.mxu1 %vm371_vm1, %v2644_v55  ;;  %4877 = vmatprep.mubr.msk.bf16.mxu0 %vm371_vm1, %v2292_v52  ;;  %v5850_v43 = vadd.f32 %v4635_v29, %v4587_v51 }
  0xf6   : > { %v474_v5 = vpop.f32.mrf.mxu0  ;;  %4925 = vmatprep.mubr.msk.bf16.mxu1 %vm371_vm1, %v2645_v61  ;;  %4954 = vmatpush3.bf16.msra.mxu0 %v5130_v57  ;;  %v731_v21 = vpop.f32.mrf.mxu1  ;;  %v2648_v57 = vpack.c.bf16 %v4170_v27, %v4169_v24  ;;  %v4102_v61 = vld [vmem:[%s5222_s12 + $0x108] sm:$0xff]  ;;  %v4109_v27 = vld [vmem:[%s5222_s12 + $0x158] sm:$0xff] }
  0xf7   : > { %4955 = vmatprep.subr.bf16.mxu0 %v5131_v33  ;;  %v5861_v58 = vadd.f32 %v731_v21, %v474_v5  ;;  %v2297_v39 = vpack.c.bf16 %v4103_v62, %v4102_v61  ;;  %v4178_v24 = vld [vmem:[%s5222_s12 + $0x141] sm:$0xff] }
  0xf8   : > { %v4588_v8 = vpop.f32.mrf.mxu0  ;;  %v4636_v54 = vpop.f32.mrf.mxu1 }
  0xf9   : > { %v5863_v2 = vadd.f32 %v4636_v54, %v4588_v8  ;;  %v2298_v8 = vpack.c.bf16 %v4105_v3, %v4104_v31 }
  0xfa   : > { %v477_v7 = vpop.f32.mrf.mxu0  ;;  %4956 = vmatpush3.bf16.msra.mxu0 %v5131_v33  ;;  %v734_v13 = vpop.f32.mrf.mxu1  ;;  %v4173_v33 = vld [vmem:[%s5222_s12 + $0x109] sm:$0xff] }
  0xfb   : > { %4957 = vmatprep.subr.bf16.mxu0 %v5132_v56  ;;  %v5868_v6 = vadd.f32 %v734_v13, %v477_v7 }
  0xfc   : > { %v4591_v20 = vpop.f32.mrf.mxu0  ;;  %4878 = vmatmul.mubr.msk.bf16.gmra.mxu0 %vm371_vm1, %v2293_v10  ;;  %v4639_v15 = vpop.f32.mrf.mxu1 }
  0xfd   : > { %4926 = vmatmul.mubr.msk.bf16.gmra.mxu1 %vm371_vm1, %v2646_v0  ;;  %4881 = vmatprep.mubr.msk.bf16.mxu0 %vm371_vm1, %v2294_v1  ;;  %v5876_v25 = vadd.f32 %v4639_v15, %v4591_v20  ;;  %v2651_v0 = vpack.c.bf16 %v4176_v19, %v4175_v48  ;;  %v4107_v20 = vld [vmem:[%s5222_s12 + $0x140] sm:$0xff] }
  0xfe   : > { %v490_v26 = vpop.f32.mrf.mxu0  ;;  %4929 = vmatprep.mubr.msk.bf16.mxu1 %vm371_vm1, %v2647_v12  ;;  %4958 = vmatpush3.bf16.msra.mxu0 %v5132_v56  ;;  %v747_v40 = vpop.f32.mrf.mxu1  ;;  %v2650_v56 = vpack.c.bf16 %v4174_v53, %v4173_v33  ;;  %v4177_v15 = vld [vmem:[%s5222_s12 + $0x139] sm:$0xff]  ;;  %v4181_v33 = vld [vmem:[%s5222_s12 + $0x169] sm:$0xff] }
  0xff   : > { %4959 = vmatprep.subr.bf16.mxu0 %v5133_v14  ;;  %v5887_v44 = vadd.f32 %v747_v40, %v490_v26  ;;  %v4108_v26 = vld [vmem:[%s5222_s12 + $0x150] sm:$0xff]  ;;  %v4180_v40 = vld [vmem:[%s5222_s12 + $0x159] sm:$0xff] }
 0x100   : > { %v4592_v34 = vpop.f32.mrf.mxu0  ;;  %v4640_v42 = vpop.f32.mrf.mxu1 }
 0x101   : > { %v5889_v47 = vadd.f32 %v4640_v42, %v4592_v34  ;;  %v2300_v42 = vpack.c.bf16 %v4109_v27, %v4108_v26 }
 0x102   : > { %v493_v37 = vpop.f32.mrf.mxu0  ;;  %4960 = vmatpush3.bf16.msra.mxu0 %v5133_v14  ;;  %v750_v50 = vpop.f32.mrf.mxu1  ;;  %v4106_v14 = vld [vmem:[%s5222_s12 + $0x138] sm:$0xff] }
 0x103   : > { %4961 = vmatprep.subr.bf16.mxu0 %v5134_v35  ;;  %v5894_v55 = vadd.f32 %v750_v50, %v493_v37  ;;  %v2653_v37 = vpack.c.bf16 %v4180_v40, %v4179_v28 }
 0x104   : > { %v4595_v52 = vpop.f32.mrf.mxu0  ;;  %4882 = vmatmul.mubr.msk.bf16.gmra.mxu0 %vm371_vm1, %v2295_v46  ;;  %v4643_v23 = vpop.f32.mrf.mxu1  ;;  %v2652_v46 = vpack.c.bf16 %v4178_v24, %v4177_v15  ;;  %v4227_v15 = vld [vmem:[%s5222_s12 + $0x3a] sm:$0xff] }
 0x105   : > { %4930 = vmatmul.mubr.msk.bf16.gmra.mxu1 %vm371_vm1, %v2648_v57  ;;  %4885 = vmatprep.mubr.msk.bf16.mxu0 %vm371_vm1, %v2296_v38  ;;  %v5902_v51 = vadd.f32 %v4643_v23, %v4595_v52  ;;  %v4110_v52 = vld [vmem:[%s5222_s12 + $0x168] sm:$0xff]  ;;  %v4111_v23 = vld [vmem:[%s5222_s12 + $0x170] sm:$0xff] }
 0x106   : > { %v506_v29 = vpop.f32.mrf.mxu0  ;;  %4933 = vmatprep.mubr.msk.bf16.mxu1 %vm371_vm1, %v2649_v59  ;;  %4962 = vmatpush3.bf16.msra.mxu0 %v5134_v35  ;;  %v763_v5 = vpop.f32.mrf.mxu1  ;;  %v2299_v35 = vpack.c.bf16 %v4107_v20, %v4106_v14  ;;  %v4186_v14 = vld [vmem:[%s5222_s12 + $0x1a1] sm:$0xff]  ;;  %v4226_v20 = vld [vmem:[%s5222_s12 + $0x32] sm:$0xff] }
 0x107   : > { %4963 = vmatprep.subr.bf16.mxu0 %v5135_v9  ;;  %v5910_v63 = vadd.f32 %v763_v5, %v506_v29  ;;  %v4182_v29 = vld [vmem:[%s5222_s12 + $0x171] sm:$0xff]  ;;  %v2301_v5 = vpack.c.bf16 %v4111_v23, %v4110_v52  ;;  %v2994_v28 = vpack.c.bf16 %v4227_v15, %v4226_v20  ;;  %v4235_v20 = vld [vmem:[%s5222_s12 + $0x9a] sm:$0xff] }
 0x108   : > { %v4596_v21 = vpop.f32.mrf.mxu0  ;;  %v4644_v41 = vpop.f32.mrf.mxu1  ;;  %v2654_v19 = vpack.c.bf16 %v4182_v29, %v4181_v33  ;;  %v4231_v52 = vld [vmem:[%s5222_s12 + $0x6a] sm:$0xff] }
 0x109   : > { %v5912_v10 = vadd.f32 %v4644_v41, %v4596_v21 }
 0x10a   : > { %v509_v54 = vpop.f32.mrf.mxu0  ;;  %4964 = vmatpush3.bf16.msra.mxu0 %v5135_v9  ;;  %v766_v1 = vpop.f32.mrf.mxu1 }
 0x10b   : > { %v5914_v7 = vadd.f32 %v766_v1, %v509_v54  ;;  %v4114_v54 = vld [vmem:[%s5222_s12 + $0x198] sm:$0xff] }
 0x10c   : > { %v4599_v12 = vpop.f32.mrf.mxu0  ;;  %4886 = vmatmul.mubr.msk.bf16.gmra.mxu0 %vm371_vm1, %v2297_v39  ;;  %v4647_v13 = vpop.f32.mrf.mxu1  ;;  %v4185_v1 = vld [vmem:[%s5222_s12 + $0x199] sm:$0xff] }
 0x10d   : > { %4934 = vmatmul.mubr.msk.bf16.gmra.mxu1 %vm371_vm1, %v2650_v56  ;;  %4889 = vmatprep.mubr.msk.bf16.mxu0 %vm371_vm1, %v2298_v8  ;;  %v5922_v16 = vadd.f32 %v4647_v13, %v4599_v12 }
 0x10e   : > { %v522_v17 = vpop.f32.mrf.mxu0  ;;  %4937 = vmatprep.mubr.msk.bf16.mxu1 %vm371_vm1, %v2651_v0  ;;  %v779_v22 = vpop.f32.mrf.mxu1  ;;  %v4115_v0 = vld [vmem:[%s5222_s12 + $0x1a0] sm:$0xff] }
 0x10f   : > { %v5930_v30 = vadd.f32 %v779_v22, %v522_v17  ;;  %v2303_v27 = vpack.c.bf16 %v4115_v0, %v4114_v54  ;;  %v2656_v22 = vpack.c.bf16 %v4186_v14, %v4185_v1  ;;  %v4232_v0 = vld [vmem:[%s5222_s12 + $0x7a] sm:$0xff]  ;;  %v4233_v1 = vld [vmem:[%s5222_s12 + $0x82] sm:$0xff]  ;;  %v4234_v14 = vld [vmem:[%s5222_s12 + $0x92] sm:$0xff] }
 0x110   : > { %v4600_v32 = vpop.f32.mrf.mxu0  ;;  %v4648_v34 = vpop.f32.mrf.mxu1 }
 0x111   : > { %v5932_v57 = vadd.f32 %v4648_v34, %v4600_v32 }
 0x112   : > { %v5934_v38 = vpop.f32.mrf.mxu0  ;;  %v5936_v59 = vpop.f32.mrf.mxu1 }
 0x114   : > { %v4603_v50 = vpop.f32.mrf.mxu0  ;;  %4890 = vmatmul.mubr.msk.bf16.gmra.mxu0 %vm371_vm1, %v2299_v35  ;;  %v4651_v9 = vpop.f32.mrf.mxu1 }
 0x115   : > { %4938 = vmatmul.mubr.msk.bf16.gmra.mxu1 %vm371_vm1, %v2652_v46  ;;  %4893 = vmatprep.mubr.msk.bf16.mxu0 %vm371_vm1, %v2300_v42  ;;  %v5943_v61 = vadd.f32 %v4651_v9, %v4603_v50  ;;  %v4228_v46 = vld [vmem:[%s5222_s12 + $0x4a] sm:$0xff]  ;;  %v4229_v42 = vld [vmem:[%s5222_s12 + $0x52] sm:$0xff]  ;;  %v4230_v9 = vld [vmem:[%s5222_s12 + $0x62] sm:$0xff] }
 0x116   : > { %v538_v62 = vpop.f32.mrf.mxu0  ;;  %4941 = vmatprep.mubr.msk.bf16.mxu1 %vm371_vm1, %v2653_v37  ;;  %v795_v53 = vpop.f32.mrf.mxu1  ;;  %v2995_v29 = vpack.c.bf16 %v4229_v42, %v4228_v46 }
 0x117   : > { %v5948_v31 = vadd.f32 %v795_v53, %v538_v62 }
 0x118   : > { %v4604_v3 = vpop.f32.mrf.mxu0  ;;  %v4652_v48 = vpop.f32.mrf.mxu1 }
 0x119   : > { %v5950_v21 = vadd.f32 %v4652_v48, %v4604_v3  ;;  %v2996_v3 = vpack.c.bf16 %v4231_v52, %v4230_v9  ;;  %v4236_v52 = vld [vmem:[%s5222_s12 + $0xaa] sm:$0xff] }
 0x11a   : > { %v5952_v39 = vpop.f32.mrf.mxu0  ;;  %v5954_v41 = vpop.f32.mrf.mxu1 }
 0x11c   : > { %v4607_v56 = vpop.f32.mrf.mxu0  ;;  %4894 = vmatmul.mubr.msk.bf16.gmra.mxu0 %vm371_vm1, %v2301_v5  ;;  %v4655_v8 = vpop.f32.mrf.mxu1 }
 0x11d   : > { %4942 = vmatmul.mubr.msk.bf16.gmra.mxu1 %vm371_vm1, %v2654_v19  ;;  %4897 = vmatprep.mubr.msk.bf16.mxu0 %vm371_vm1, %v5674_v60  ;;  %v5963_v12 = vadd.f32 %v4655_v8, %v4607_v56 }
 0x11e   : > { %v554_v13 = vpop.f32.mrf.mxu0  ;;  %4945 = vmatprep.mubr.msk.bf16.mxu1 %vm371_vm1, %v5796_v4  ;;  %v811_v17 = vpop.f32.mrf.mxu1 }
 0x11f   : > { %v5970_v24 = vadd.f32 %v811_v17, %v554_v13 }
 0x120   : > { %v4608_v26 = vpop.f32.mrf.mxu0  ;;  %v4656_v60 = vpop.f32.mrf.mxu1 }
 0x121   : > { %v5972_v40 = vadd.f32 %v4656_v60, %v4608_v26  ;;  %v2997_v60 = vpack.c.bf16 %v4233_v1, %v4232_v0 }
 0x122   : > { %v5974_v32 = vpop.f32.mrf.mxu0  ;;  %v5976_v4 = vpop.f32.mrf.mxu1 }
 0x124   : > { %v4611_v35 = vpop.f32.mrf.mxu0  ;;  %4898 = vmatmul.mubr.msk.bf16.gmra.mxu0 %vm371_vm1, %v2303_v27  ;;  %v4659_v34 = vpop.f32.mrf.mxu1 }
 0x125   : > { %4946 = vmatmul.mubr.msk.bf16.gmra.mxu1 %vm371_vm1, %v2656_v22  ;;  %4965 = vmatprep.mubr.msk.bf16.mxu0 %vm371_vm1, %v2994_v28  ;;  %v5983_v37 = vadd.f32 %v4659_v34, %v4611_v35  ;;  %v2998_v35 = vpack.c.bf16 %v4235_v20, %v4234_v14 }
 0x126   : > { %v570_v50 = vpop.f32.mrf.mxu0  ;;  %v827_v23 = vpop.f32.mrf.mxu1 }
 0x127   : > { %v5987_v62 = vadd.f32 %v827_v23, %v570_v50  ;;  %v4237_v23 = vld [vmem:[%s5222_s12 + $0xb2] sm:$0xff] }
 0x128   : > { %v4612_v33 = vpop.f32.mrf.mxu0  ;;  %v4660_v53 = vpop.f32.mrf.mxu1 }
 0x129   : > { %v5989_v5 = vadd.f32 %v4660_v53, %v4612_v33  ;;  %v4239_v53 = vld [vmem:[%s5222_s12 + $0xca] sm:$0xff] }
 0x12a   : > { %v5991_v48 = vpop.f32.mrf.mxu0  ;;  %v5993_v19 = vpop.f32.mrf.mxu1 }
 0x12c   : > { %v4679_v56 = vpop.f32.mrf.mxu0  ;;  %4966 = vmatmul.mubr.msk.bf16.vlgmr.msra.gmra.mxu0 %vm371_vm1, %v2995_v29  ;;  %v4727_v54 = vpop.f32.mrf.mxu1  ;;  %v4238_v29 = vld [vmem:[%s5222_s12 + $0xc2] sm:$0xff] }
 0x12d   : > { %v1165_v8 = vadd.f32 %v4679_v56, %v5824_v45  ;;  %4969 = vmatprep.mubr.msk.bf16.mxu0 %vm371_vm1, %v2996_v3 }
 0x12e   : > { %v1036_v13 = vpop.f32.mrf.mxu0  ;;  %v1390_v26 = vpop.f32.mrf.mxu1 }
 0x12f   : > { %v1163_v15 = vadd.f32 %v1036_v13, %v5835_v49  ;;  %v6003_v17 = vadd.f32 %v4727_v54, %v1165_v8  ;;  %v2999_v54 = vpack.c.bf16 %v4237_v23, %v4236_v52  ;;  %v3000_v13 = vpack.c.bf16 %v4239_v53, %v4238_v29 }
 0x130   : > { %v4680_v27 = vpop.f32.mrf.mxu0  ;;  %v4728_v28 = vpop.f32.mrf.mxu1 }
 0x131   : > { %v1166_v22 = vadd.f32 %v4680_v27, %v5837_v11  ;;  %v6006_v45 = vadd.f32 %v1390_v26, %v1163_v15 }
 0x132   : > { %v1039_v34 = vpop.f32.mrf.mxu0  ;;  %v6013_v42 = vpop.f32.mrf.mxu1 }
 0x133   : > { %v6009_v46 = vadd.f32 %v1039_v34, %v5842_v36  ;;  %v6011_v49 = vadd.f32 %v4728_v28, %v1166_v22  ;;  %v4241_v22 = vld [vmem:[%s5222_s12 + $0xe2] sm:$0xff]  ;;  %v5136_v28 = vld [vmem:[%s6611_s3 + $0x38] ss:$0 sps:$4 sm:$0xff]   ;;  %v4243_v34 = vld [vmem:[%s5222_s12 + $0xfa] sm:$0xff] }
 0x134   : > { %v4683_v50 = vpop.f32.mrf.mxu0  ;;  %4970 = vmatmul.mubr.msk.bf16.gmra.mxu0 %vm371_vm1, %v2997_v60  ;;  %v4240_v60 = vld [vmem:[%s5222_s12 + $0xda] sm:$0xff]  ;;  %5054 = vmatprep.subr.msk.bf16.mxu1 %vm420_vm0, %v5136_v28 }
 0x135   : > { %v1169_v9 = vadd.f32 %v4683_v50, %v5850_v43  ;;  %v4731_v11 = vpop.f32.mrf.mxu1  ;;  %4973 = vmatprep.mubr.msk.bf16.mxu0 %vm371_vm1, %v2998_v35  ;;  %v4242_v35 = vld [vmem:[%s5222_s12 + $0xf2] sm:$0xff]  ;;  %v3001_v23 = vpack.c.bf16 %v4241_v22, %v4240_v60 }
 0x136   : > { %v1052_v33 = vpop.f32.mrf.mxu0 }
 0x137   : > { %v1167_v36 = vadd.f32 %v1052_v33, %v5861_v58  ;;  %v6023_v3 = vadd.f32 %v4731_v11, %v1169_v9  ;;  %v1406_v56 = vpop.f32.mrf.mxu1 }
 0x138   : > { %v4684_v8 = vpop.f32.mrf.mxu0 }
 0x139   : > { %v1170_v0 = vadd.f32 %v4684_v8, %v5863_v2  ;;  %v6026_v43 = vadd.f32 %v1406_v56, %v1167_v36  ;;  %v4732_v1 = vpop.f32.mrf.mxu1 }
 0x13a   : > { %v1055_v14 = vpop.f32.mrf.mxu0 }
 0x13b   : > { %v6029_v20 = vadd.f32 %v1055_v14, %v5868_v6  ;;  %v6031_v58 = vadd.f32 %v4732_v1, %v1170_v0  ;;  %v6033_v15 = vpop.f32.mrf.mxu1  ;;  %v4245_v14 = vld [vmem:[%s5222_s12 + $0x112] sm:$0xff] }
 0x13c   : > { %v4687_v26 = vpop.f32.mrf.mxu0  ;;  %4974 = vmatmul.mubr.msk.bf16.gmra.mxu0 %vm371_vm1, %v2999_v54 }
 0x13d   : > { %v1173_v27 = vadd.f32 %v4687_v26, %v5876_v25  ;;  %v4735_v2 = vpop.f32.mrf.mxu1  ;;  %4977 = vmatprep.mubr.msk.bf16.mxu0 %vm371_vm1, %v3000_v13  ;;  %v3511_v25 = vsel %vm420_vm0, %v5136_v28, 0  ;;  %v4244_v13 = vld [vmem:[%s5222_s12 + $0x10a] sm:$0xff] }
 0x13e   : > { %v1068_v6 = vpop.f32.mrf.mxu0  ;;  %4998 = vmatpush3.bf16.msra.mxu1 %v3511_v25  ;;  %v5137_v26 = vld [vmem:[%s6611_s3 + $0x30] sm:$0xff]  }
 0x13f   : > { %v1171_v50 = vadd.f32 %v1068_v6, %v5887_v44  ;;  %v6046_v9 = vadd.f32 %v4735_v2, %v1173_v27  ;;  %v1422_v11 = vpop.f32.mrf.mxu1  ;;  %v3002_v44 = vpack.c.bf16 %v4243_v34, %v4242_v35  ;;  %v4246_v27 = vld [vmem:[%s5222_s12 + $0x122] sm:$0xff]  ;;  %v4247_v2 = vld [vmem:[%s5222_s12 + $0x12a] sm:$0xff]  ;;  %4999 = vmatprep.subr.bf16.mxu1 %v5137_v26 }
 0x140   : > { %v4688_v52 = vpop.f32.mrf.mxu0 }
 0x141   : > { %v1174_v33 = vadd.f32 %v4688_v52, %v5889_v47  ;;  %v6051_v29 = vadd.f32 %v1422_v11, %v1171_v50  ;;  %v4736_v53 = vpop.f32.mrf.mxu1  ;;  %v3004_v11 = vpack.c.bf16 %v4247_v2, %v4246_v27  ;;  %v783_v27 = vadd.f32 %v5936_v59, %v5934_v38  ;;  %v4253_v59 = vld [vmem:[%s5222_s12 + $0x172] sm:$0xff] }
 0x142   : > { %v1071_v36 = vpop.f32.mrf.mxu0  ;;  %5000 = vmatpush3.bf16.msra.mxu1 %v5137_v26 }
 0x143   : > { %v6054_v56 = vadd.f32 %v1071_v36, %v5894_v55  ;;  %v6056_v8 = vadd.f32 %v4736_v53, %v1174_v33  ;;  %v6058_v54 = vpop.f32.mrf.mxu1  ;;  %v4249_v36 = vld [vmem:[%s5222_s12 + $0x142] sm:$0xff] }
 0x144   : > { %v4691_v0 = vpop.f32.mrf.mxu0  ;;  %4978 = vmatmul.mubr.msk.bf16.gmra.mxu0 %vm371_vm1, %v3001_v23 }
 0x145   : > { %v1177_v1 = vadd.f32 %v4691_v0, %v5902_v51  ;;  %v4739_v47 = vpop.f32.mrf.mxu1  ;;  %4981 = vmatprep.mubr.msk.bf16.mxu0 %vm371_vm1, %v3002_v44  ;;  %v3003_v51 = vpack.c.bf16 %v4245_v14, %v4244_v13  ;;  %v4248_v44 = vld [vmem:[%s5222_s12 + $0x13a] sm:$0xff]  ;;  %v5138_v0 = vld [vmem:[%s6611_s3 + $0x28] sm:$0xff]  }
 0x146   : > { %v1084_v55 = vpop.f32.mrf.mxu0  ;;  %5001 = vmatprep.subr.bf16.mxu1 %v5138_v0 }
 0x147   : > { %v1175_v60 = vadd.f32 %v1084_v55, %v5910_v63  ;;  %v6071_v22 = vadd.f32 %v4739_v47, %v1177_v1  ;;  %v1438_v28 = vpop.f32.mrf.mxu1  ;;  %v4250_v1 = vld [vmem:[%s5222_s12 + $0x152] sm:$0xff]  ;;  %v4251_v47 = vld [vmem:[%s5222_s12 + $0x15a] sm:$0xff]  ;;  %5002 = vmatpush3.bf16.msra.mxu1 %v5138_v0 }
 0x148   : > { %v4692_v6 = vpop.f32.mrf.mxu0 }
 0x149   : > { %v1178_v35 = vadd.f32 %v4692_v6, %v5912_v10  ;;  %v6074_v34 = vadd.f32 %v1438_v28, %v1175_v60  ;;  %v4740_v50 = vpop.f32.mrf.mxu1  ;;  %v3006_v6 = vpack.c.bf16 %v4251_v47, %v4250_v1  ;;  %v799_v1 = vadd.f32 %v5954_v41, %v5952_v39  ;;  %v4257_v39 = vld [vmem:[%s5222_s12 + $0x1a2] sm:$0xff]  ;;  %v5140_v41 = vld [vmem:[%s6611_s3 + $0x18] sm:$0xff]  }
 0x14a   : > { %v1087_v25 = vpop.f32.mrf.mxu0 }
 0x14b   : > { %v6077_v63 = vadd.f32 %v1087_v25, %v5914_v7  ;;  %v6079_v52 = vadd.f32 %v4740_v50, %v1178_v35  ;;  %v6081_v23 = vpop.f32.mrf.mxu1 }
 0x14c   : > { %v4695_v33 = vpop.f32.mrf.mxu0  ;;  %4982 = vmatmul.mubr.msk.bf16.gmra.mxu0 %vm371_vm1, %v3003_v51 }
 0x14d   : > { %v1181_v53 = vadd.f32 %v4695_v33, %v5922_v16  ;;  %v4743_v10 = vpop.f32.mrf.mxu1  ;;  %4985 = vmatprep.mubr.msk.bf16.mxu0 %vm371_vm1, %v3004_v11  ;;  %v3005_v16 = vpack.c.bf16 %v4249_v36, %v4248_v44 }
 0x14e   : > { %v1100_v7 = vpop.f32.mrf.mxu0 }
 0x14f   : > { %v1179_v13 = vadd.f32 %v1100_v7, %v5930_v30  ;;  %v6094_v14 = vadd.f32 %v4743_v10, %v1181_v53  ;;  %v1454_v26 = vpop.f32.mrf.mxu1  ;;  %v5139_v53 = vld [vmem:[%s6611_s3 + $0x20] sm:$0xff]  }
 0x150   : > { %v4696_v55 = vpop.f32.mrf.mxu0  ;;  %5003 = vmatprep.subr.bf16.mxu1 %v5139_v53 }
 0x151   : > { %v1182_v2 = vadd.f32 %v4696_v55, %v5932_v57  ;;  %v6099_v60 = vadd.f32 %v1454_v26, %v1179_v13  ;;  %v4744_v28 = vpop.f32.mrf.mxu1  ;;  %v4252_v57 = vld [vmem:[%s5222_s12 + $0x16a] sm:$0xff]  ;;  %5004 = vmatpush3.bf16.msra.mxu1 %v5139_v53 }
 0x152   : > { %v1103_v51 = vpop.f32.mrf.mxu0  ;;  %5005 = vmatprep.subr.bf16.mxu1 %v5140_v41 }
 0x153   : > { %v1180_v30 = vadd.f32 %v1103_v51, %v783_v27  ;;  %v6101_v35 = vadd.f32 %v4744_v28, %v1182_v2  ;;  %v1457_v50 = vpop.f32.mrf.mxu1 }
 0x154   : > { %v4699_v11 = vpop.f32.mrf.mxu0  ;;  %4986 = vmatmul.mubr.msk.bf16.gmra.mxu0 %vm371_vm1, %v3005_v16 }
 0x155   : > { %v1185_v25 = vadd.f32 %v4699_v11, %v5943_v61  ;;  %v6105_v33 = vadd.f32 %v1457_v50, %v1180_v30  ;;  %v4747_v38 = vpop.f32.mrf.mxu1  ;;  %4989 = vmatprep.mubr.msk.bf16.mxu0 %vm371_vm1, %v3006_v6  ;;  %v3007_v61 = vpack.c.bf16 %v4253_v59, %v4252_v57  ;;  %5006 = vmatpush3.bf16.msra.mxu1 %v5140_v41 }
 0x156   : > { %v1116_v10 = vpop.f32.mrf.mxu0  ;;  %v815_v57 = vadd.f32 %v5976_v4, %v5974_v32 }
 0x157   : > { %v1183_v44 = vadd.f32 %v1116_v10, %v5948_v31  ;;  %v6114_v36 = vadd.f32 %v4747_v38, %v1185_v25  ;;  %v1470_v0 = vpop.f32.mrf.mxu1 }
 0x158   : > { %v4700_v7 = vpop.f32.mrf.mxu0 }
 0x159   : > { %v1186_v47 = vadd.f32 %v4700_v7, %v5950_v21  ;;  %v6119_v13 = vadd.f32 %v1470_v0, %v1183_v44  ;;  %v4748_v26 = vpop.f32.mrf.mxu1  ;;  %v4256_v21 = vld [vmem:[%s5222_s12 + $0x19a] sm:$0xff] }
 0x15a   : > { %v1119_v55 = vpop.f32.mrf.mxu0  ;;  %v3009_v38 = vpack.c.bf16 %v4257_v39, %v4256_v21 }
 0x15b   : > { %v1184_v16 = vadd.f32 %v1119_v55, %v799_v1  ;;  %v6121_v31 = vadd.f32 %v4748_v26, %v1186_v47  ;;  %v1473_v27 = vpop.f32.mrf.mxu1 }
 0x15c   : > { %v4703_v2 = vpop.f32.mrf.mxu0  ;;  %4990 = vmatmul.mubr.msk.bf16.gmra.mxu0 %vm371_vm1, %v3007_v61 }
 0x15d   : > { %v1189_v28 = vadd.f32 %v4703_v2, %v5963_v12  ;;  %v6125_v6 = vadd.f32 %v1473_v27, %v1184_v16  ;;  %v4751_v51 = vpop.f32.mrf.mxu1  ;;  %4993 = vmatprep.mubr.msk.bf16.mxu0 %vm371_vm1, %v5798_v18  ;;  %v831_v27 = vadd.f32 %v5993_v19, %v5991_v48 }
 0x15e   : > { %v1132_v30 = vpop.f32.mrf.mxu0 }
 0x15f   : > { %v1187_v50 = vadd.f32 %v1132_v30, %v5970_v24  ;;  %v6135_v11 = vadd.f32 %v4751_v51, %v1189_v28  ;;  %v1486_v25 = vpop.f32.mrf.mxu1 }
 0x160   : > { %v4704_v12 = vpop.f32.mrf.mxu0 }
 0x161   : > { %v1190_v18 = vadd.f32 %v4704_v12, %v5972_v40  ;;  %v6140_v59 = vadd.f32 %v1486_v25, %v1187_v50  ;;  %v4752_v53 = vpop.f32.mrf.mxu1  ;;  %v5141_v40 = vld [vmem:[%s6611_s3 + $0x10] sm:$0xff]  }
 0x162   : > { %v1135_v10 = vpop.f32.mrf.mxu0  ;;  %5007 = vmatprep.subr.bf16.mxu1 %v5141_v40 }
 0x163   : > { %v1188_v44 = vadd.f32 %v1135_v10, %v815_v57  ;;  %v6142_v0 = vadd.f32 %v4752_v53, %v1190_v18  ;;  %v1489_v24 = vpop.f32.mrf.mxu1  ;;  %5008 = vmatpush3.bf16.msra.mxu1 %v5141_v40  ;;  %v1518_v57 = vadd.f32 %v6013_v42, %v6009_v46 }
 0x164   : > { %v4707_v7 = vpop.f32.mrf.mxu0  ;;  %4994 = vmatmul.mubr.msk.bf16.gmra.mxu0 %vm371_vm1, %v3009_v38 }
 0x165   : > { %v1193_v61 = vadd.f32 %v4707_v7, %v5983_v37  ;;  %v6146_v1 = vadd.f32 %v1489_v24, %v1188_v44  ;;  %v4755_v47 = vpop.f32.mrf.mxu1 }
 0x166   : > { %v1148_v32 = vpop.f32.mrf.mxu0 }
 0x167   : > { %v1191_v4 = vadd.f32 %v1148_v32, %v5987_v62  ;;  %v6152_v26 = vadd.f32 %v4755_v47, %v1193_v61  ;;  %v1502_v55 = vpop.f32.mrf.mxu1  ;;  %v5143_v32 = vld [vmem:[%s6611_s3] sm:$0xff]  }
 0x168   : > { %v4708_v16 = vpop.f32.mrf.mxu0 }
 0x169   : > { %v1194_v37 = vadd.f32 %v4708_v16, %v5989_v5  ;;  %v6157_v2 = vadd.f32 %v1502_v55, %v1191_v4  ;;  %v4756_v28 = vpop.f32.mrf.mxu1  ;;  %v1522_v55 = vadd.f32 %v6033_v15, %v6029_v20 }
 0x16a   : > { %v1151_v51 = vpop.f32.mrf.mxu0 }
 0x16b   : > { %v1192_v21 = vadd.f32 %v1151_v51, %v831_v27  ;;  %v6159_v39 = vadd.f32 %v4756_v28, %v1194_v37  ;;  %v1505_v41 = vpop.f32.mrf.mxu1 }
 0x16c   : > { %v4775_v62 = vpop.f32.mrf.mxu0 }
 0x16d   : > { %v6161_v30 = vadd.f32 %v1505_v41, %v1192_v21  ;;  %v1872_v50 = vadd.f32 %v4775_v62, %v6003_v17  ;;  %v4823_v25 = vpop.f32.mrf.mxu1  ;;  %v5142_v17 = vld [vmem:[%s6611_s3 + $0x8] sm:$0xff]  }
 0x16e   : > { %v1743_v12 = vpop.f32.mrf.mxu0  ;;  %5009 = vmatprep.subr.bf16.mxu1 %v5142_v17 }
 0x16f   : > { %v1870_v38 = vadd.f32 %v1743_v12, %v6006_v45  ;;  %v6165_v48 = vadd.f32 %v4823_v25, %v1872_v50  ;;  %v2096_v5 = vpop.f32.mrf.mxu1  ;;  %5010 = vmatpush3.bf16.msra.mxu1 %v5142_v17  ;;  %v1526_v25 = vadd.f32 %v6058_v54, %v6054_v56 }
 0x170   : > { %v4776_v19 = vpop.f32.mrf.mxu0  ;;  %5011 = vmatprep.subr.bf16.mxu1 %v5143_v32 }
 0x171   : > { %v6170_v18 = vadd.f32 %v4776_v19, %v6011_v49  ;;  %v6172_v53 = vadd.f32 %v2096_v5, %v1870_v38  ;;  %v6174_v10 = vpop.f32.mrf.mxu1 }
 0x172   : > { %v1746_v44 = vpop.f32.mrf.mxu0 }
 0x173   : > { %v6179_v45 = vadd.f32 %v1746_v44, %v1518_v57  ;;  %v6181_v24 = vpop.f32.mrf.mxu1  ;;  %5012 = vmatpush3.bf16.msra.mxu1 %v5143_v32 }
 0x174   : > { %v4779_v7 = vpop.f32.mrf.mxu0 }
 0x175   : > { %v1876_v46 = vadd.f32 %v4779_v7, %v6023_v3  ;;  %v4827_v49 = vpop.f32.mrf.mxu1 }
 0x176   : > { %v1759_v42 = vpop.f32.mrf.mxu0 }
 0x177   : > { %v1874_v61 = vadd.f32 %v1759_v42, %v6026_v43  ;;  %v6185_v47 = vadd.f32 %v4827_v49, %v1876_v46  ;;  %v2112_v40 = vpop.f32.mrf.mxu1  ;;  %v1530_v49 = vadd.f32 %v6081_v23, %v6077_v63 }
 0x178   : > { %v4780_v4 = vpop.f32.mrf.mxu0 }
 0x179   : > { %v6193_v16 = vadd.f32 %v4780_v4, %v6031_v58  ;;  %v6195_v27 = vadd.f32 %v2112_v40, %v1874_v61  ;;  %v6197_v3 = vpop.f32.mrf.mxu1 }
 0x17a   : > { %v1762_v43 = vpop.f32.mrf.mxu0 }
 0x17b   : > { %v6199_v37 = vadd.f32 %v1762_v43, %v1522_v55  ;;  %v6201_v28 = vpop.f32.mrf.mxu1 }
 0x17c   : > { %v4783_v51 = vpop.f32.mrf.mxu0 }
 0x17d   : > { %v1880_v21 = vadd.f32 %v4783_v51, %v6046_v9  ;;  %v4831_v41 = vpop.f32.mrf.mxu1 }
 0x17e   : > { %v1775_v62 = vpop.f32.mrf.mxu0 }
 0x17f   : > { %v1878_v20 = vadd.f32 %v1775_v62, %v6051_v29  ;;  %v6205_v58 = vadd.f32 %v4831_v41, %v1880_v21  ;;  %v2128_v15 = vpop.f32.mrf.mxu1 }
 0x180   : > { %v4784_v50 = vpop.f32.mrf.mxu0 }
 0x181   : > { %v6210_v12 = vadd.f32 %v4784_v50, %v6056_v8  ;;  %v6212_v38 = vadd.f32 %v2128_v15, %v1878_v20  ;;  %v6214_v5 = vpop.f32.mrf.mxu1 }
 0x182   : > { %v1778_v19 = vpop.f32.mrf.mxu0 }
 0x183   : > { %v6216_v9 = vadd.f32 %v1778_v19, %v1526_v25  ;;  %v6218_v57 = vpop.f32.mrf.mxu1 }
 0x184   : > { %v4787_v29 = vpop.f32.mrf.mxu0 }
 0x185   : > { %v1884_v17 = vadd.f32 %v4787_v29, %v6071_v22  ;;  %v4835_v44 = vpop.f32.mrf.mxu1 }
 0x186   : > { %v1791_v7 = vpop.f32.mrf.mxu0 }
 0x187   : > { %v1882_v46 = vadd.f32 %v1791_v7, %v6074_v34  ;;  %v6222_v56 = vadd.f32 %v4835_v44, %v1884_v17  ;;  %v2144_v8 = vpop.f32.mrf.mxu1 }
 0x188   : > { %v4788_v54 = vpop.f32.mrf.mxu0 }
 0x189   : > { %v6227_v42 = vadd.f32 %v4788_v54, %v6079_v52  ;;  %v6229_v61 = vadd.f32 %v2144_v8, %v1882_v46  ;;  %v6231_v40 = vpop.f32.mrf.mxu1 }
 0x18a   : > { %v1794_v32 = vpop.f32.mrf.mxu0 }
 0x18b   : > { %v6233_v22 = vadd.f32 %v1794_v32, %v1530_v49  ;;  %v6235_v4 = vpop.f32.mrf.mxu1 }
 0x18c   : > { %v4791_v34 = vpop.f32.mrf.mxu0 }
 0x18d   : > { %v1888_v55 = vadd.f32 %v4791_v34, %v6094_v14  ;;  %v4839_v43 = vpop.f32.mrf.mxu1 }
 0x18e   : > { %v1807_v51 = vpop.f32.mrf.mxu0 }
 0x18f   : > { %v1886_v21 = vadd.f32 %v1807_v51, %v6099_v60  ;;  %v6239_v63 = vadd.f32 %v4839_v43, %v1888_v55  ;;  %v2160_v52 = vpop.f32.mrf.mxu1 }
 0x190   : > { %v4792_v23 = vpop.f32.mrf.mxu0 }
 0x191   : > { %v6242_v41 = vadd.f32 %v4792_v23, %v6101_v35  ;;  %v6244_v62 = vadd.f32 %v2160_v52, %v1886_v21  ;;  %v6246_v20 = vpop.f32.mrf.mxu1 }
 0x192   : > { %v1810_v15 = vpop.f32.mrf.mxu0 }
 0x193   : > { %v6249_v50 = vadd.f32 %v1810_v15, %v6105_v33  ;;  %v6251_v14 = vpop.f32.mrf.mxu1 }
 0x194   : > { %v4795_v25 = vpop.f32.mrf.mxu0 }
 0x195   : > { %v1892_v60 = vadd.f32 %v4795_v25, %v6114_v36  ;;  %v4843_v19 = vpop.f32.mrf.mxu1 }
 0x196   : > { %v1823_v29 = vpop.f32.mrf.mxu0 }
 0x197   : > { %v1890_v17 = vadd.f32 %v1823_v29, %v6119_v13  ;;  %v6255_v44 = vadd.f32 %v4843_v19, %v1892_v60  ;;  %v2176_v35 = vpop.f32.mrf.mxu1 }
 0x198   : > { %v4796_v7 = vpop.f32.mrf.mxu0 }
 0x199   : > { %v6258_v46 = vadd.f32 %v4796_v7, %v6121_v31  ;;  %v6260_v8 = vadd.f32 %v2176_v35, %v1890_v17  ;;  %v6262_v33 = vpop.f32.mrf.mxu1 }
 0x19a   : > { %6614 = vst [vmem:[#allocation3_spill] sm:$0xff] %v6262_v33  ;;  %v1826_v54 = vpop.f32.mrf.mxu0 }
 0x19b   : > { %6613 = vst [vmem:[#allocation2_spill] sm:$0xff] %v6258_v46  ;;  %v6265_v49 = vadd.f32 %v1826_v54, %v6125_v6  ;;  %v6267_v36 = vpop.f32.mrf.mxu1 }
 0x19c   : > { %6616 = vst [vmem:[#allocation5_spill] sm:$0xff] %v6267_v36  ;;  %v4799_v32 = vpop.f32.mrf.mxu0 }
 0x19d   : > { %6615 = vst [vmem:[#allocation4_spill] sm:$0xff] %v6265_v49  ;;  %v1896_v13 = vadd.f32 %v4799_v32, %v6135_v11  ;;  %v4847_v34 = vpop.f32.mrf.mxu1 }
 0x19e   : > { %v1839_v55 = vpop.f32.mrf.mxu0 }
 0x19f   : > { %v1894_v43 = vadd.f32 %v1839_v55, %v6140_v59  ;;  %v6271_v51 = vadd.f32 %v4847_v34, %v1896_v13  ;;  %v2192_v31 = vpop.f32.mrf.mxu1 }
 0x1a0   : > { %v4800_v21 = vpop.f32.mrf.mxu0 }
 0x1a1   : > { %v6274_v52 = vadd.f32 %v4800_v21, %v6142_v0  ;;  %v6276_v23 = vadd.f32 %v2192_v31, %v1894_v43  ;;  %v6278_v6 = vpop.f32.mrf.mxu1 }
 0x1a2   : > { %6618 = vst [vmem:[#allocation7_spill] sm:$0xff] %v6278_v6  ;;  %v1842_v15 = vpop.f32.mrf.mxu0 }
 0x1a3   : > { %6617 = vst [vmem:[#allocation6_spill] sm:$0xff] %v6274_v52  ;;  %v6281_v25 = vadd.f32 %v1842_v15, %v6146_v1  ;;  %v6283_v11 = vpop.f32.mrf.mxu1 }
 0x1a4   : > { %6620 = vst [vmem:[#allocation9_spill] sm:$0xff] %v6283_v11  ;;  %v4803_v60 = vpop.f32.mrf.mxu0 }
 0x1a5   : > { %6619 = vst [vmem:[#allocation8_spill] sm:$0xff] %v6281_v25  ;;  %v1900_v59 = vadd.f32 %v4803_v60, %v6152_v26  ;;  %v4851_v19 = vpop.f32.mrf.mxu1 }
 0x1a6   : > { %v1855_v29 = vpop.f32.mrf.mxu0 }
 0x1a7   : > { %v1898_v17 = vadd.f32 %v1855_v29, %v6157_v2  ;;  %v6287_v35 = vadd.f32 %v4851_v19, %v1900_v59  ;;  %v2208_v0 = vpop.f32.mrf.mxu1 }
 0x1a8   : > { %v4804_v7 = vpop.f32.mrf.mxu0 }
 0x1a9   : > { %v6290_v54 = vadd.f32 %v4804_v7, %v6159_v39  ;;  %v6292_v32 = vadd.f32 %v2208_v0, %v1898_v17  ;;  %v6294_v1 = vpop.f32.mrf.mxu1 }
 0x1aa   : > { %6622 = vst [vmem:[#allocation11_spill] sm:$0xff] %v6294_v1  ;;  %v1858_v13 = vpop.f32.mrf.mxu0 }
 0x1ab   : > { %6621 = vst [vmem:[#allocation10_spill] sm:$0xff] %v6290_v54  ;;  %v6297_v34 = vadd.f32 %v1858_v13, %v6161_v30  ;;  %v6299_v26 = vpop.f32.mrf.mxu1 }
 0x1ac   : > { %6624 = vst [vmem:[#allocation13_spill] sm:$0xff] %v6299_v26  ;;  %v4871_v55 = vpop.f32.mrf.mxu0 }
 0x1ad   : > { %6623 = vst [vmem:[#allocation12_spill] sm:$0xff] %v6297_v34  ;;  %v6302_v2 = vadd.f32 %v4871_v55, %v6165_v48  ;;  %v6304_v43 = vpop.f32.mrf.mxu1 }
 0x1ae   : > { %v2450_v31 = vpop.f32.mrf.mxu0 }
 0x1af   : > { %v6307_v39 = vadd.f32 %v2450_v31, %v6172_v53  ;;  %v6309_v21 = vpop.f32.mrf.mxu1 }
 0x1b0   : > { %v4872_v15 = vpop.f32.mrf.mxu0 }
 0x1b1   : > { %v6313_v59 = vpop.f32.mrf.mxu1 }
 0x1b2   : > { %v6311_v60 = vpop.f32.mrf.mxu0 }
 0x1b3   : > { %v6318_v29 = vpop.f32.mrf.mxu1 }
 0x1b4   : > { %v4875_v30 = vpop.f32.mrf.mxu0 }
 0x1b5   : > { %v6316_v19 = vadd.f32 %v4875_v30, %v6185_v47  ;;  %v6325_v53 = vpop.f32.mrf.mxu1 }
 0x1b6   : > { %v2466_v48 = vpop.f32.mrf.mxu0 }
 0x1b7   : > { %v6321_v17 = vadd.f32 %v2466_v48, %v6195_v27  ;;  %v6332_v31 = vpop.f32.mrf.mxu1 }
 0x1b8   : > { %v6323_v0 = vpop.f32.mrf.mxu0 }
 0x1b9   : > { %v6339_v27 = vpop.f32.mrf.mxu1 }
 0x1ba   : > { %v6327_v7 = vpop.f32.mrf.mxu0 }
 0x1bb   : > { %v6346_v54 = vpop.f32.mrf.mxu1 }
 0x1bc   : > { %v4879_v13 = vpop.f32.mrf.mxu0 }
 0x1bd   : > { %v6330_v55 = vadd.f32 %v4879_v13, %v6205_v58 }
 0x1be   : > { %v2482_v47 = vpop.f32.mrf.mxu0 }
 0x1bf   : > { %v6335_v30 = vadd.f32 %v2482_v47, %v6212_v38  ;;  %v6353_v38 = vpop.f32.mrf.mxu1 }
 0x1c0   : > { %v6337_v26 = vpop.f32.mrf.mxu0 }
 0x1c1   : > { %v6360_v52 = vpop.f32.mrf.mxu1 }
 0x1c2   : > { %v6341_v48 = vpop.f32.mrf.mxu0 }
 0x1c4   : > { %v4883_v34 = vpop.f32.mrf.mxu0 }
 0x1c5   : > { %v6344_v1 = vadd.f32 %v4883_v34, %v6222_v56 }
 0x1c6   : > { %v2498_v58 = vpop.f32.mrf.mxu0 }
 0x1c7   : > { %v6349_v13 = vadd.f32 %v2498_v58, %v6229_v61  ;;  %v6367_v61 = vpop.f32.mrf.mxu1 }
 0x1c8   : > { %v6351_v11 = vpop.f32.mrf.mxu0 }
 0x1c9   : > { %v6374_v46 = vpop.f32.mrf.mxu1 }
 0x1ca   : > { %v6355_v47 = vpop.f32.mrf.mxu0 }
 0x1cc   : > { %v4887_v25 = vpop.f32.mrf.mxu0 }
 0x1cd   : > { %v6358_v6 = vadd.f32 %v4887_v25, %v6239_v63 }
 0x1ce   : > { %v2514_v56 = vpop.f32.mrf.mxu0 }
 0x1cf   : > { %6625 = vst [vmem:[#allocation14_spill] sm:$0xff] %v6358_v6  ;;  %v6363_v34 = vadd.f32 %v2514_v56, %v6244_v62  ;;  %v6381_v62 = vpop.f32.mrf.mxu1 }
 0x1d0   : > { %v6365_v36 = vpop.f32.mrf.mxu0 }
 0x1d1   : > { %6626 = vst [vmem:[#allocation15_spill] sm:$0xff] %v6363_v34  ;;  %6627 = vst [vmem:[#allocation16_spill] sm:$0xff] %v6365_v36 }
 0x1d2   : > { %v6369_v58 = vpop.f32.mrf.mxu0 }
 0x1d3   : > { %6628 = vst [vmem:[#allocation17_spill] sm:$0xff] %v6369_v58  ;;  %v6388_v58 = vpop.f32.mrf.mxu1 }
 0x1d4   : > { %v4891_v49 = vpop.f32.mrf.mxu0 }
 0x1d5   : > { %v6372_v33 = vadd.f32 %v4891_v49, %v6255_v44 }
 0x1d6   : > { %v2530_v63 = vpop.f32.mrf.mxu0 }
 0x1d7   : > { %6629 = vst [vmem:[#allocation18_spill] sm:$0xff] %v6372_v33  ;;  %v6377_v25 = vadd.f32 %v2530_v63, %v6260_v8  ;;  %v6395_v8 = vpop.f32.mrf.mxu1 }
 0x1d8   : > { %v6379_v6 = vpop.f32.mrf.mxu0 }
 0x1d9   : > { %6630 = vst [vmem:[#allocation19_spill] sm:$0xff] %v6377_v25  ;;  %6631 = vst [vmem:[#allocation20_spill] sm:$0xff] %v6379_v6 }
 0x1da   : > { %v6383_v56 = vpop.f32.mrf.mxu0 }
 0x1db   : > { %6632 = vst [vmem:[#allocation21_spill] sm:$0xff] %v6383_v56  ;;  %v6402_v56 = vpop.f32.mrf.mxu1 }
 0x1dc   : > { %v4895_v34 = vpop.f32.mrf.mxu0 }
 0x1dd   : > { %v6386_v36 = vadd.f32 %v4895_v34, %v6271_v51 }
 0x1de   : > { %v2546_v44 = vpop.f32.mrf.mxu0 }
 0x1df   : > { %6633 = vst [vmem:[#allocation22_spill] sm:$0xff] %v6386_v36  ;;  %v6391_v49 = vadd.f32 %v2546_v44, %v6276_v23  ;;  %v2226_v23 = vadd.f32 %v6174_v10, %v6170_v18  ;;  %v6411_v44 = vpop.f32.mrf.mxu1  ;;  %v6427_v18 = vld [vmem:[%s6610_s2] ss:$0 sm:$0xff] }
 0x1e0   : > { %v6393_v33 = vpop.f32.mrf.mxu0 }
 0x1e1   : > { %6634 = vst [vmem:[#allocation23_spill] sm:$0xff] %v6391_v49 }
 0x1e2   : > { %v6397_v63 = vpop.f32.mrf.mxu0 }
 0x1e3   : > { %6635 = vst [vmem:[#allocation24_spill] sm:$0xff] %v6397_v63  ;;  %v2224_v63 = vadd.f32 %v6181_v24, %v6179_v45 }
 0x1e4   : > { %v4899_v25 = vpop.f32.mrf.mxu0 }
 0x1e5   : > { %v6400_v6 = vadd.f32 %v4899_v25, %v6287_v35  ;;  %v2932_v35 = vadd.f32 %v6304_v43, %v6302_v2  ;;  %v2580_v25 = vadd.f32 %v4872_v15, %v2226_v23  ;;  %v2230_v2 = vadd.f32 %v6197_v3, %v6193_v16 }
 0x1e6   : > { %v2562_v51 = vpop.f32.mrf.mxu0  ;;  %v2228_v15 = vadd.f32 %v6201_v28, %v6199_v37 }
 0x1e7   : > { %6636 = vst [vmem:[#allocation25_spill] sm:$0xff] %v6400_v6  ;;  %v6405_v34 = vadd.f32 %v2562_v51, %v6292_v32  ;;  %v2930_v32 = vadd.f32 %v6309_v21, %v6307_v39  ;;  %v2578_v51 = vadd.f32 %v6311_v60, %v2224_v63  ;;  %v2933_v45 = vadd.f32 %v6313_v59, %v2580_v25 }
 0x1e8   : > { %v6407_v36 = vpop.f32.mrf.mxu0  ;;  %v2584_v60 = vadd.f32 %v6323_v0, %v2230_v2  ;;  %v2936_v59 = vadd.f32 %v6325_v53, %v6316_v19 }
 0x1e9   : > { %6637 = vst [vmem:[#allocation26_spill] sm:$0xff] %v6405_v34  ;;  %6638 = vst [vmem:[#allocation27_spill] sm:$0xff] %v6407_v36  ;;  %v6422_v36 = vpop.f32.mrf.mxu1  ;;  %v2931_v39 = vadd.f32 %v6318_v29, %v2578_v51  ;;  %v2934_v29 = vadd.f32 %v6332_v31, %v6321_v17  ;;  %v2234_v17 = vadd.f32 %v6214_v5, %v6210_v12 }
 0x1ea   : > { %v6413_v49 = vpop.f32.mrf.mxu0  ;;  %v2937_v51 = vadd.f32 %v6339_v27, %v2584_v60  ;;  %v2232_v27 = vadd.f32 %v6218_v57, %v6216_v9 }
 0x1eb   : > { %v6437_v63 = vpop.f32.mrf.mxu1 }
 0x1ec   : > { %v4967_v6 = vpop.f32.mrf.mxu0  ;;  %v2586_v9 = vadd.f32 %v6341_v48, %v2232_v27 }
 0x1ed   : > { %v3285_v34 = vadd.f32 %v4967_v6, %v2932_v35 }
 0x1ee   : > { %v3156_v10 = vpop.f32.mrf.mxu0  ;;  %v2939_v48 = vadd.f32 %v6374_v46, %v2586_v9 }
 0x1ef   : > { %v3283_v24 = vadd.f32 %v3156_v10, %v2930_v32  ;;  %v3324_v21 = vadd.f32 %v6427_v18, %v3285_v34  ;;  %v2582_v34 = vadd.f32 %v6327_v7, %v2228_v15  ;;  %v6448_v10 = vpop.f32.mrf.mxu1 }
 0x1f0   : > { %v4968_v43 = vpop.f32.mrf.mxu0 }
 0x1f1   : > { %v3286_v6 = vadd.f32 %v4968_v43, %v2933_v45  ;;  %v3322_v35 = vadd.f32 %v6427_v18, %v3283_v24  ;;  %v3356_v37 = vmax.f32 %v3324_v21, 0.0  ;;  %v2935_v7 = vadd.f32 %v6346_v54, %v2582_v34  ;;  %v6457_v15 = vpop.f32.mrf.mxu1 }
 0x1f2   : > { %v3159_v23 = vpop.f32.mrf.mxu0 }
 0x1f3   : > { %v3325_v16 = vadd.f32 %v6427_v18, %v3286_v6  ;;  %v3284_v3 = vadd.f32 %v3159_v23, %v2931_v39  ;;  %v3354_v53 = vmax.f32 %v3322_v35, 0.0  ;;  %v2588_v6 = vadd.f32 %v6337_v26, %v2234_v17 }
 0x1f4   : > { %v4971_v25 = vpop.f32.mrf.mxu0  ;;  %v2940_v23 = vadd.f32 %v6353_v38, %v6330_v55 }
 0x1f5   : > { %v3357_v28 = vmax.f32 %v3325_v16, 0.0  ;;  %v3323_v0 = vadd.f32 %v6427_v18, %v3284_v3  ;;  %v3289_v32 = vadd.f32 %v4971_v25, %v2936_v59  ;;  %v2938_v59 = vadd.f32 %v6360_v52, %v6335_v30  ;;  %v6470_v3 = vpop.f32.mrf.mxu1 }
 0x1f6   : > { %v3172_v19 = vpop.f32.mrf.mxu0  ;;  %v2941_v38 = vadd.f32 %v6367_v61, %v2588_v6  ;;  %v2238_v52 = vadd.f32 %v6231_v40, %v6227_v42  ;;  %v2236_v61 = vadd.f32 %v6235_v4, %v6233_v22 }
 0x1f7   : > { %v3387_v45 = vpack.c.bf16 %v3357_v28, %v3356_v37  ;;  %v3355_v24 = vmax.f32 %v3323_v0, 0.0  ;;  %v3287_v2 = vadd.f32 %v3172_v19, %v2934_v29  ;;  %v3328_v39 = vadd.f32 %v6427_v18, %v3289_v32 }
 0x1f8   : > { %v4972_v31 = vpop.f32.mrf.mxu0  ;;  %v2592_v19 = vadd.f32 %v6351_v11, %v2238_v52  ;;  %v2590_v22 = vadd.f32 %v6355_v47, %v2236_v61 }
 0x1f9   : > { %v3386_v43 = vpack.c.bf16 %v3355_v24, %v3354_v53  ;;  %v3290_v21 = vadd.f32 %v4972_v31, %v2937_v51  ;;  %v3326_v12 = vadd.f32 %v6427_v18, %v3287_v2  ;;  %v3360_v26 = vmax.f32 %v3328_v39, 0.0  ;;  %v6479_v53 = vpop.f32.mrf.mxu1 }
 0x1fa   : > { %v3175_v60 = vpop.f32.mrf.mxu0  ;;  %v2944_v24 = vadd.f32 %v6381_v62, %v6344_v1  ;;  %v2942_v2 = vadd.f32 %v6388_v58, %v6349_v13  ;;  %v2945_v62 = vadd.f32 %v6395_v8, %v2592_v19  ;;  %v2242_v13 = vadd.f32 %v6246_v20, %v6242_v41 }
 0x1fb   : > { %v3329_v5 = vadd.f32 %v6427_v18, %v3290_v21  ;;  %v3288_v54 = vadd.f32 %v3175_v60, %v2935_v7  ;;  %5013 = vmatprep.mubr.msk.bf16.mxu1 %vm371_vm1, %v3386_v43  ;;  %v3358_v34 = vmax.f32 %v3326_v12, 0.0  ;;  %v6492_v7 = vpop.f32.mrf.mxu1  ;;  %v2943_v58 = vadd.f32 %v6402_v56, %v2590_v22  ;;  %v6641_v56 = vld [vmem:[#allocation15_spill] sm:$0xff] }
 0x1fc   : > { %v4975_v57 = vpop.f32.mrf.mxu0  ;;  %5014 = vmatmul.mubr.msk.bf16.vlgmr.msra.gmra.mxu1 %vm371_vm1, %v3387_v45  ;;  %v2240_v8 = vadd.f32 %v6251_v14, %v6249_v50 }
 0x1fd   : > { %v3361_v35 = vmax.f32 %v3329_v5, 0.0  ;;  %v3327_v16 = vadd.f32 %v6427_v18, %v3288_v54  ;;  %v3293_v55 = vadd.f32 %v4975_v57, %v2940_v23  ;;  %v6639_v5 = vld [vmem:[#allocation16_spill] sm:$0xff]  ;;  %v6640_v57 = vld [vmem:[#allocation14_spill] sm:$0xff] }
 0x1fe   : > { %v3188_v29 = vpop.f32.mrf.mxu0  ;;  %v2596_v54 = vadd.f32 %v6639_v5, %v2242_v13 }
 0x1ff   : > { %v3389_v25 = vpack.c.bf16 %v3361_v35, %v3360_v26  ;;  %v3359_v37 = vmax.f32 %v3327_v16, 0.0  ;;  %v3291_v28 = vadd.f32 %v3188_v29, %v2938_v59  ;;  %v3332_v32 = vadd.f32 %v6427_v18, %v3293_v55  ;;  %v4943_v59 = vpop.f32.mrf.mxu1  ;;  %v6642_v55 = vld [vmem:[#allocation17_spill] sm:$0xff] }
 0x200   : > { %v4976_v30 = vpop.f32.mrf.mxu0  ;;  %v2948_v26 = vadd.f32 %v6411_v44, %v6640_v57  ;;  %v2946_v16 = vadd.f32 %v6422_v36, %v6641_v56  ;;  %v6644_v36 = vld [vmem:[#allocation3_spill] sm:$0xff]  ;;  %v6651_v57 = vld [vmem:[#allocation6_spill] sm:$0xff] }
 0x201   : > { %v3388_v0 = vpack.c.bf16 %v3359_v37, %v3358_v34  ;;  %v3294_v51 = vadd.f32 %v4976_v30, %v2941_v38  ;;  %v3330_v42 = vadd.f32 %v6427_v18, %v3291_v28  ;;  %v3364_v11 = vmax.f32 %v3332_v32, 0.0  ;;  %v2899_v37 = vpop.f32.mrf.mxu1  ;;  %v6643_v32 = vld [vmem:[#allocation2_spill] sm:$0xff] }
 0x202   : > { %v3191_v45 = vpop.f32.mrf.mxu0  ;;  %v2594_v38 = vadd.f32 %v6642_v55, %v2240_v8  ;;  %v6653_v55 = vld [vmem:[#allocation8_spill] sm:$0xff] }
 0x203   : > { %v3333_v40 = vadd.f32 %v6427_v18, %v3294_v51  ;;  %v3292_v46 = vadd.f32 %v3191_v45, %v2939_v48  ;;  %5017 = vmatprep.mubr.msk.bf16.mxu1 %vm371_vm1, %v3388_v0  ;;  %v3362_v39 = vmax.f32 %v3330_v42, 0.0  ;;  %v2246_v51 = vadd.f32 %v6644_v36, %v6643_v32 }
 0x204   : > { %v4979_v4 = vpop.f32.mrf.mxu0  ;;  %5018 = vmatmul.mubr.msk.bf16.gmra.mxu1 %vm371_vm1, %v3389_v25  ;;  %v2949_v25 = vadd.f32 %v6437_v63, %v2596_v54  ;;  %v2947_v19 = vadd.f32 %v6448_v10, %v2594_v38  ;;  %v6647_v63 = vld [vmem:[#allocation20_spill] sm:$0xff]  ;;  %v6649_v10 = vld [vmem:[#allocation19_spill] sm:$0xff]  ;;  %v6654_v38 = vld [vmem:[#allocation9_spill] sm:$0xff] }
 0x205   : > { %v3365_v17 = vmax.f32 %v3333_v40, 0.0  ;;  %v3331_v31 = vadd.f32 %v6427_v18, %v3292_v46  ;;  %v3297_v1 = vadd.f32 %v4979_v4, %v2944_v24  ;;  %v6645_v40 = vld [vmem:[#allocation4_spill] sm:$0xff]  ;;  %v6646_v46 = vld [vmem:[#allocation5_spill] sm:$0xff]  ;;  %v2600_v22 = vadd.f32 %v6647_v63, %v2246_v51  ;;  %v4944_v4 = vpop.f32.mrf.mxu1  ;;  %v6659_v63 = vld [vmem:[#allocation11_spill] sm:$0xff] }
 0x206   : > { %v3204_v43 = vpop.f32.mrf.mxu0 }
 0x207   : > { %v3391_v21 = vpack.c.bf16 %v3365_v17, %v3364_v11  ;;  %v3363_v27 = vmax.f32 %v3331_v31, 0.0  ;;  %v3295_v6 = vadd.f32 %v3204_v43, %v2942_v2  ;;  %v3336_v23 = vadd.f32 %v6427_v18, %v3297_v1  ;;  %v6648_v17 = vld [vmem:[#allocation18_spill] sm:$0xff] }
 0x208   : > { %v4980_v47 = vpop.f32.mrf.mxu0  ;;  %v2244_v2 = vadd.f32 %v6646_v46, %v6645_v40  ;;  %v2952_v31 = vadd.f32 %v6457_v15, %v6648_v17 }
 0x209   : > { %v3390_v60 = vpack.c.bf16 %v3363_v27, %v3362_v39  ;;  %v3298_v12 = vadd.f32 %v4980_v47, %v2945_v62  ;;  %v3334_v35 = vadd.f32 %v6427_v18, %v3295_v6  ;;  %v3368_v14 = vmax.f32 %v3336_v23, 0.0  ;;  %v2902_v23 = vpop.f32.mrf.mxu1 }
 0x20a   : > { %v3207_v9 = vpop.f32.mrf.mxu0  ;;  %v2950_v39 = vadd.f32 %v6470_v3, %v6649_v10  ;;  %v6652_v3 = vld [vmem:[#allocation7_spill] sm:$0xff] }
 0x20b   : > { %v3337_v41 = vadd.f32 %v6427_v18, %v3298_v12  ;;  %v3296_v20 = vadd.f32 %v3207_v9, %v2943_v58  ;;  %5021 = vmatprep.mubr.msk.bf16.mxu1 %vm371_vm1, %v3390_v60  ;;  %v3366_v52 = vmax.f32 %v3334_v35, 0.0  ;;  %v2953_v60 = vadd.f32 %v6479_v53, %v2600_v22 }
 0x20c   : > { %v4983_v50 = vpop.f32.mrf.mxu0  ;;  %5022 = vmatmul.mubr.msk.bf16.gmra.mxu1 %vm371_vm1, %v3391_v21  ;;  %v6650_v21 = vld [vmem:[#allocation21_spill] sm:$0xff] }
 0x20d   : > { %v3369_v29 = vmax.f32 %v3337_v41, 0.0  ;;  %v3335_v34 = vadd.f32 %v6427_v18, %v3296_v20  ;;  %v3301_v44 = vadd.f32 %v4983_v50, %v2948_v26  ;;  %v2598_v27 = vadd.f32 %v6650_v21, %v2244_v2  ;;  %v6658_v2 = vld [vmem:[#allocation10_spill] sm:$0xff] }
 0x20e   : > { %v3220_v28 = vpop.f32.mrf.mxu0  ;;  %v2250_v26 = vadd.f32 %v6652_v3, %v6651_v57  ;;  %v2248_v50 = vadd.f32 %v6654_v38, %v6653_v55 }
 0x20f   : > { %v3393_v30 = vpack.c.bf16 %v3369_v29, %v3368_v14  ;;  %v3367_v48 = vmax.f32 %v3335_v34, 0.0  ;;  %v3299_v0 = vadd.f32 %v3220_v28, %v2946_v16  ;;  %v3340_v24 = vadd.f32 %v6427_v18, %v3301_v44  ;;  %v4947_v14 = vpop.f32.mrf.mxu1  ;;  %v6655_v34 = vld [vmem:[#allocation22_spill] sm:$0xff] }
 0x210   : > { %v4984_v61 = vpop.f32.mrf.mxu0  ;;  %v2951_v41 = vadd.f32 %v6492_v7, %v2598_v27  ;;  %v2604_v53 = vadd.f32 %v6393_v33, %v2250_v26  ;;  %v2956_v44 = vadd.f32 %v4943_v59, %v6655_v34  ;;  %v6656_v7 = vld [vmem:[#allocation23_spill] sm:$0xff] }
 0x211   : > { %v3392_v45 = vpack.c.bf16 %v3367_v48, %v3366_v52  ;;  %v3302_v42 = vadd.f32 %v4984_v61, %v2949_v25  ;;  %v3338_v1 = vadd.f32 %v6427_v18, %v3299_v0  ;;  %v3372_v13 = vmax.f32 %v3340_v24, 0.0  ;;  %v6657_v48 = vld [vmem:[#allocation24_spill] sm:$0xff] }
 0x212   : > { %v3223_v11 = vpop.f32.mrf.mxu0  ;;  %v2602_v0 = vadd.f32 %v6657_v48, %v2248_v50  ;;  %v2957_v59 = vadd.f32 %v4944_v4, %v2604_v53 }
 0x213   : > { %v3341_v62 = vadd.f32 %v6427_v18, %v3302_v42  ;;  %v3300_v43 = vadd.f32 %v3223_v11, %v2947_v19  ;;  %5025 = vmatprep.mubr.msk.bf16.mxu1 %vm371_vm1, %v3392_v45  ;;  %v3370_v8 = vmax.f32 %v3338_v1, 0.0  ;;  %v2915_v19 = vpop.f32.mrf.mxu1 }
 0x214   : > { %v4987_v6 = vpop.f32.mrf.mxu0  ;;  %5026 = vmatmul.mubr.msk.bf16.gmra.mxu1 %vm371_vm1, %v3393_v30  ;;  %v2954_v30 = vadd.f32 %v2899_v37, %v6656_v7  ;;  %v2254_v37 = vadd.f32 %v6659_v63, %v6658_v2  ;;  %v2955_v11 = vadd.f32 %v2902_v23, %v2602_v0 }
 0x215   : > { %v3373_v47 = vmax.f32 %v3341_v62, 0.0  ;;  %v3339_v58 = vadd.f32 %v6427_v18, %v3300_v43  ;;  %v3305_v15 = vadd.f32 %v4987_v6, %v2952_v31  ;;  %v6660_v62 = vld [vmem:[#allocation12_spill] sm:$0xff]  ;;  %v6661_v43 = vld [vmem:[#allocation13_spill] sm:$0xff]  ;;  %v4948_v21 = vpop.f32.mrf.mxu1 }
 0x216   : > { %v3236_v12 = vpop.f32.mrf.mxu0  ;;  %v2252_v10 = vadd.f32 %v6661_v43, %v6660_v62  ;;  %v6663_v6 = vld [vmem:[#allocation25_spill] sm:$0xff] }
 0x217   : > { %v3395_v5 = vpack.c.bf16 %v3373_v47, %v3372_v13  ;;  %v3371_v54 = vmax.f32 %v3339_v58, 0.0  ;;  %v3303_v9 = vadd.f32 %v3236_v12, %v2950_v39  ;;  %v3344_v56 = vadd.f32 %v6427_v18, %v3305_v15  ;;  %v6662_v39 = vld [vmem:[#allocation27_spill] sm:$0xff]  ;;  %v2918_v26 = vpop.f32.mrf.mxu1 }
 0x218   : > { %v4988_v35 = vpop.f32.mrf.mxu0  ;;  %v2608_v4 = vadd.f32 %v6662_v39, %v2254_v37  ;;  %v2960_v13 = vadd.f32 %v4947_v14, %v6663_v6  ;;  %v2606_v12 = vadd.f32 %v6413_v49, %v2252_v10 }
 0x219   : > { %v3394_v20 = vpack.c.bf16 %v3371_v54, %v3370_v8  ;;  %v3306_v16 = vadd.f32 %v4988_v35, %v2953_v60  ;;  %v3342_v25 = vadd.f32 %v6427_v18, %v3303_v9  ;;  %v3376_v36 = vmax.f32 %v3344_v56, 0.0  ;;  %v6664_v60 = vld [vmem:[#allocation26_spill] sm:$0xff] }
 0x21a   : > { %v3239_v29 = vpop.f32.mrf.mxu0  ;;  %v2958_v23 = vadd.f32 %v2915_v19, %v6664_v60  ;;  %v2961_v3 = vadd.f32 %v4948_v21, %v2608_v4  ;;  %v2959_v38 = vadd.f32 %v2918_v26, %v2606_v12 }
 0x21b   : > { %v3345_v28 = vadd.f32 %v6427_v18, %v3306_v16  ;;  %v3304_v52 = vadd.f32 %v3239_v29, %v2951_v41  ;;  %5029 = vmatprep.mubr.msk.bf16.mxu1 %vm371_vm1, %v3394_v20  ;;  %v3374_v24 = vmax.f32 %v3342_v25, 0.0 }
 0x21c   : > { %v4991_v32 = vpop.f32.mrf.mxu0  ;;  %5030 = vmatmul.mubr.msk.bf16.gmra.mxu1 %vm371_vm1, %v3395_v5 }
 0x21d   : > { %v3377_v33 = vmax.f32 %v3345_v28, 0.0  ;;  %v3343_v51 = vadd.f32 %v6427_v18, %v3304_v52  ;;  %v3309_v61 = vadd.f32 %v4991_v32, %v2956_v44 }
 0x21e   : > { %v3252_v45 = vpop.f32.mrf.mxu0 }
 0x21f   : > { %v3397_v42 = vpack.c.bf16 %v3377_v33, %v3376_v36  ;;  %v3375_v40 = vmax.f32 %v3343_v51, 0.0  ;;  %v3307_v46 = vadd.f32 %v3252_v45, %v2954_v30  ;;  %v3348_v31 = vadd.f32 %v6427_v18, %v3309_v61 }
 0x220   : > { %v4992_v22 = vpop.f32.mrf.mxu0 }
 0x221   : > { %v3396_v17 = vpack.c.bf16 %v3375_v40, %v3374_v24  ;;  %v3310_v1 = vadd.f32 %v4992_v22, %v2957_v59  ;;  %v3346_v47 = vadd.f32 %v6427_v18, %v3307_v46  ;;  %v3380_v5 = vmax.f32 %v3348_v31, 0.0 }
 0x222   : > { %v3255_v27 = vpop.f32.mrf.mxu0 }
 0x223   : > { %v3349_v58 = vadd.f32 %v6427_v18, %v3310_v1  ;;  %v3308_v15 = vadd.f32 %v3255_v27, %v2955_v11  ;;  %5033 = vmatprep.mubr.msk.bf16.mxu1 %vm371_vm1, %v3396_v17  ;;  %v3378_v41 = vmax.f32 %v3346_v47, 0.0 }
 0x224   : > { %v4995_v8 = vpop.f32.mrf.mxu0  ;;  %5034 = vmatmul.mubr.msk.bf16.gmra.mxu1 %vm371_vm1, %v3397_v42 }
 0x225   : > { %v3381_v54 = vmax.f32 %v3349_v58, 0.0  ;;  %v3347_v9 = vadd.f32 %v6427_v18, %v3308_v15  ;;  %v3313_v57 = vadd.f32 %v4995_v8, %v2960_v13 }
 0x226   : > { %v3268_v35 = vpop.f32.mrf.mxu0 }
 0x227   : > { %v3399_v20 = vpack.c.bf16 %v3381_v54, %v3380_v5  ;;  %v3379_v56 = vmax.f32 %v3347_v9, 0.0  ;;  %v3311_v16 = vadd.f32 %v3268_v35, %v2958_v23  ;;  %v3352_v49 = vadd.f32 %v6427_v18, %v3313_v57 }
 0x228   : > { %v4996_v55 = vpop.f32.mrf.mxu0 }
 0x229   : > { %v3398_v50 = vpack.c.bf16 %v3379_v56, %v3378_v41  ;;  %v3314_v53 = vadd.f32 %v4996_v55, %v2961_v3  ;;  %v3350_v29 = vadd.f32 %v6427_v18, %v3311_v16  ;;  %v3384_v25 = vmax.f32 %v3352_v49, 0.0 }
 0x22a   : > { %v3271_v14 = vpop.f32.mrf.mxu0 }
 0x22b   : > { %v3353_v34 = vadd.f32 %v6427_v18, %v3314_v53  ;;  %v3312_v44 = vadd.f32 %v3271_v14, %v2959_v38  ;;  %5037 = vmatprep.mubr.msk.bf16.mxu1 %vm371_vm1, %v3398_v50  ;;  %v3382_v7 = vmax.f32 %v3350_v29, 0.0 }
 0x22c   : > { %5038 = vmatmul.mubr.msk.bf16.gmra.mxu1 %vm371_vm1, %v3399_v20 }
 0x22d   : > { %v3385_v28 = vmax.f32 %v3353_v34, 0.0  ;;  %v3351_v52 = vadd.f32 %v6427_v18, %v3312_v44 }
 0x22f   : > { %v3401_v30 = vpack.c.bf16 %v3385_v28, %v3384_v25  ;;  %v3383_v48 = vmax.f32 %v3351_v52, 0.0 }
 0x231   : > { %v3400_v0 = vpack.c.bf16 %v3383_v48, %v3382_v7 }
 0x233   : > { %5041 = vmatprep.mubr.msk.bf16.mxu1 %vm371_vm1, %v3400_v0 }
 0x234   : > { %5042 = vmatmul.mubr.msk.bf16.gmra.mxu1 %vm371_vm1, %v3401_v30 }
 0x2bc   : > { %v5015_v18 = vpop.f32.mrf.mxu1 }
 0x2bd   : > { %3676 = vst [vmem:[%s6571_s23 + $0x10] sm:$0xff] %v5015_v18 }
 0x2be   : > { %v3547_v32 = vpop.f32.mrf.mxu1 }
 0x2bf   : > { %3674 = vst [vmem:[%s6571_s23] sm:$0xff] %v3547_v32 }
 0x2c0   : > { %v5016_v36 = vpop.f32.mrf.mxu1 }
 0x2c1   : > { %3677 = vst [vmem:[%s6571_s23 + $0x18] sm:$0xff] %v5016_v36 }
 0x2c2   : > { %v3550_v33 = vpop.f32.mrf.mxu1 }
 0x2c3   : > { %3675 = vst [vmem:[%s6571_s23 + $0x8] sm:$0xff] %v3550_v33 }
 0x2c4   : > { %v5019_v51 = vpop.f32.mrf.mxu1 }
 0x2c5   : > { %3680 = vst [vmem:[%s6571_s23 + $0x30] sm:$0xff] %v5019_v51 }
 0x2c6   : > { %v3563_v61 = vpop.f32.mrf.mxu1 }
 0x2c7   : > { %3678 = vst [vmem:[%s6571_s23 + $0x20] sm:$0xff] %v3563_v61 }
 0x2c8   : > { %v5020_v59 = vpop.f32.mrf.mxu1 }
 0x2c9   : > { %3681 = vst [vmem:[%s6571_s23 + $0x38] sm:$0xff] %v5020_v59 }
 0x2ca   : > { %v3566_v19 = vpop.f32.mrf.mxu1 }
 0x2cb   : > { %3679 = vst [vmem:[%s6571_s23 + $0x28] sm:$0xff] %v3566_v19 }
 0x2cc   : > { %v5023_v45 = vpop.f32.mrf.mxu1 }
 0x2cd   : > { %3684 = vst [vmem:[%s6571_s23 + $0x50] sm:$0xff] %v5023_v45 }
 0x2ce   : > { %v3579_v24 = vpop.f32.mrf.mxu1 }
 0x2cf   : > { %3682 = vst [vmem:[%s6571_s23 + $0x40] sm:$0xff] %v3579_v24 }
 0x2d0   : > { %v5024_v42 = vpop.f32.mrf.mxu1 }
 0x2d1   : > { %3685 = vst [vmem:[%s6571_s23 + $0x58] sm:$0xff] %v5024_v42 }
 0x2d2   : > { %v3582_v40 = vpop.f32.mrf.mxu1 }
 0x2d3   : > { %3683 = vst [vmem:[%s6571_s23 + $0x48] sm:$0xff] %v3582_v40 }
 0x2d4   : > { %v5027_v46 = vpop.f32.mrf.mxu1 }
 0x2d5   : > { %3688 = vst [vmem:[%s6571_s23 + $0x70] sm:$0xff] %v5027_v46 }
 0x2d6   : > { %v3595_v2 = vpop.f32.mrf.mxu1 }
 0x2d7   : > { %3686 = vst [vmem:[%s6571_s23 + $0x60] sm:$0xff] %v3595_v2 }
 0x2d8   : > { %v5028_v63 = vpop.f32.mrf.mxu1 }
 0x2d9   : > { %3689 = vst [vmem:[%s6571_s23 + $0x78] sm:$0xff] %v5028_v63 }
 0x2da   : > { %v3598_v37 = vpop.f32.mrf.mxu1 }
 0x2db   : > { %3687 = vst [vmem:[%s6571_s23 + $0x68] sm:$0xff] %v3598_v37 }
 0x2dc   : > { %v5031_v22 = vpop.f32.mrf.mxu1 }
 0x2dd   : > { %3692 = vst [vmem:[%s6571_s23 + $0x90] sm:$0xff] %v5031_v22 }
 0x2de   : > { %v3611_v11 = vpop.f32.mrf.mxu1 }
 0x2df   : > { %3690 = vst [vmem:[%s6571_s23 + $0x80] sm:$0xff] %v3611_v11 }
 0x2e0   : > { %v5032_v17 = vpop.f32.mrf.mxu1 }
 0x2e1   : > { %3693 = vst [vmem:[%s6571_s23 + $0x98] sm:$0xff] %v5032_v17 }
 0x2e2   : > { %v3614_v31 = vpop.f32.mrf.mxu1 }
 0x2e3   : > { %3691 = vst [vmem:[%s6571_s23 + $0x88] sm:$0xff] %v3614_v31 }
 0x2e4   : > { %v5035_v1 = vpop.f32.mrf.mxu1 }
 0x2e5   : > { %3696 = vst [vmem:[%s6571_s23 + $0xb0] sm:$0xff] %v5035_v1 }
 0x2e6   : > { %v3627_v62 = vpop.f32.mrf.mxu1 }
 0x2e7   : > { %3694 = vst [vmem:[%s6571_s23 + $0xa0] sm:$0xff] %v3627_v62 }
 0x2e8   : > { %v5036_v43 = vpop.f32.mrf.mxu1 }
 0x2e9   : > { %3697 = vst [vmem:[%s6571_s23 + $0xb8] sm:$0xff] %v5036_v43 }
 0x2ea   : > { %v3630_v10 = vpop.f32.mrf.mxu1 }
 0x2eb   : > { %3695 = vst [vmem:[%s6571_s23 + $0xa8] sm:$0xff] %v3630_v10 }
 0x2ec   : > { %v5039_v39 = vpop.f32.mrf.mxu1 }
 0x2ed   : > { %3700 = vst [vmem:[%s6571_s23 + $0xd0] sm:$0xff] %v5039_v39 }
 0x2ee   : > { %v3643_v4 = vpop.f32.mrf.mxu1 }
 0x2ef   : > { %3698 = vst [vmem:[%s6571_s23 + $0xc0] sm:$0xff] %v3643_v4 }
 0x2f0   : > { %v5040_v21 = vpop.f32.mrf.mxu1 }
 0x2f1   : > { %3701 = vst [vmem:[%s6571_s23 + $0xd8] sm:$0xff] %v5040_v21 }
 0x2f2   : > { %v3646_v27 = vpop.f32.mrf.mxu1 }
 0x2f3   : > { %3699 = vst [vmem:[%s6571_s23 + $0xc8] sm:$0xff] %v3646_v27 }
 0x2f4   : > { %v5043_v6 = vpop.f32.mrf.mxu1 }
 0x2f5   : > { %3704 = vst [vmem:[%s6571_s23 + $0xf0] sm:$0xff] %v5043_v6 }
 0x2f6   : > { %v3659_v13 = vpop.f32.mrf.mxu1 }
 0x2f7   : > { %3702 = vst [vmem:[%s6571_s23 + $0xe0] sm:$0xff] %v3659_v13 }
 0x2f8   : > { %v5044_v47 = vpop.f32.mrf.mxu1 }
 0x2f9   : > { %3705 = vst [vmem:[%s6571_s23 + $0xf8] sm:$0xff] %v5044_v47 }
 0x2fa   : > { %v3662_v58 = vpop.f32.mrf.mxu1 }
 0x2fb   : > { %3703 = vst [vmem:[%s6571_s23 + $0xe8] sm:$0xff] %v3662_v58 }
 0x2fc PF: > { %s14_s15 = sadd.s32 1, %s5150_s15  }
 0x2fd   : > { %p11_p4 = scmp.ge.s32.totalorder %s14_s15, 4  }
 0x2ff   :  { %13 = sbr.rel (!%p11_p4) target bundleno = 1 (0x1), region = 76 }

</bundles_post_ra>
